<compile_context>
chip_gen: v5e
topology: v5e:2x2
jax: 0.10.0
libtpu: 0.0.40
codegen_flags: <defaults>
</compile_context>

<pallas_src>
import functools
import math

import jax
import jax.numpy as jnp
from jax import lax
from jax.experimental import pallas as pl
from jax.experimental.pallas import tpu as pltpu


# ---------------------------------------------------------------------------
# shared math helpers (pure jnp/lax: usable both inside Pallas kernels and in
# the pure-JAX reference path, so both compute exactly the same formulas)
# ---------------------------------------------------------------------------

def _sigmoid(x):
    return 1.0 / (1.0 + jnp.exp(-x))


def _layernorm(x, g, b, eps=1e-5):
    mu = jnp.mean(x, axis=-1, keepdims=True)
    xc = x - mu
    var = jnp.mean(xc * xc, axis=-1, keepdims=True)
    return xc * lax.rsqrt(var + eps) * g + b


def _softmax_lastdim(x):
    m = jnp.max(x, axis=-1, keepdims=True)
    e = jnp.exp(x - m)
    return e / jnp.sum(e, axis=-1, keepdims=True)


# ---------------------------------------------------------------------------
# Kernel 1: one direction of one LSTM layer (whole batch, loop over time)
# ---------------------------------------------------------------------------

def lstm_dir_kernel(x_ref, wih_ref, whh_ref, b_ref, h0_ref, c0_ref, y_ref):
    # x_ref : (T, B, Fin)  time-major input
    # wih   : (Fin, 4H), whh: (H, 4H), b: (1, 4H)  (b_ih + b_hh, PyTorch gate order i,f,g,o)
    # y_ref : (T, B, H)
    T = x_ref.shape[0]
    H = whh_ref.shape[0]
    wih = wih_ref[...]
    whh = whh_ref[...]
    b = b_ref[...]

    def step(t, carry):
        h, c = carry
        xt = x_ref[t]                                              # (B, Fin)
        gates = (jnp.dot(xt, wih, preferred_element_type=jnp.float32)
                 + jnp.dot(h, whh, preferred_element_type=jnp.float32)
                 + b)                                              # (B, 4H)
        i = _sigmoid(gates[:, 0 * H:1 * H])
        f = _sigmoid(gates[:, 1 * H:2 * H])
        g = jnp.tanh(gates[:, 2 * H:3 * H])
        o = _sigmoid(gates[:, 3 * H:4 * H])
        c_new = f * c + i * g
        h_new = o * jnp.tanh(c_new)
        y_ref[t] = h_new
        return (h_new, c_new)

    lax.fori_loop(0, T, step, (h0_ref[...], c0_ref[...]))


def lstm_dir_pallas(x_tbf, wih, whh, b, h0, c0):
    T, B, Fin = x_tbf.shape
    H = whh.shape[0]
    return pl.pallas_call(
        lstm_dir_kernel,
        out_shape=jax.ShapeDtypeStruct((T, B, H), jnp.float32),
        grid=(1,),
        in_specs=[
            pl.BlockSpec((T, B, Fin), lambda i: (0, 0, 0)),
            pl.BlockSpec((Fin, 4 * H), lambda i: (0, 0)),
            pl.BlockSpec((H, 4 * H), lambda i: (0, 0)),
            pl.BlockSpec((1, 4 * H), lambda i: (0, 0)),
            pl.BlockSpec((B, H), lambda i: (0, 0)),
            pl.BlockSpec((B, H), lambda i: (0, 0)),
        ],
        out_specs=pl.BlockSpec((T, B, H), lambda i: (0, 0, 0)),
        compiler_params=pltpu.CompilerParams(dimension_semantics=("arbitrary",)),
    )(x_tbf, wih, whh, b, h0, c0)


def lstm_dir_ref(x_tbf, wih, whh, b, h0, c0):
    H = whh.shape[0]

    def step(carry, xt):
        h, c = carry
        gates = xt @ wih + h @ whh + b
        i = _sigmoid(gates[:, 0 * H:1 * H])
        f = _sigmoid(gates[:, 1 * H:2 * H])
        g = jnp.tanh(gates[:, 2 * H:3 * H])
        o = _sigmoid(gates[:, 3 * H:4 * H])
        c = f * c + i * g
        h = o * jnp.tanh(c)
        return (h, c), h

    _, ys = lax.scan(step, (h0, c0), x_tbf)
    return ys


def lstm_bidir(x_btf, lstm_params, h0, c0, dir_fn):
    """2-layer bidirectional LSTM, batch_first. dir_fn runs one direction."""
    out = x_btf
    for layer, layer_params in enumerate(lstm_params):
        dir_ys = []
        for d, (wih, whh, b) in enumerate(layer_params):
            xin = jnp.transpose(out, (1, 0, 2))          # (T, B, Fin)
            if d == 1:
                xin = jnp.flip(xin, axis=0)
            y = dir_fn(xin, wih, whh, b, h0[2 * layer + d], c0[2 * layer + d])
            if d == 1:
                y = jnp.flip(y, axis=0)
            dir_ys.append(jnp.transpose(y, (1, 0, 2)))   # (B, T, H)
        out = jnp.concatenate(dir_ys, axis=-1)           # (B, T, 2H)
        # TODO(synk): nn.LSTM inter-layer dropout omitted (inference mode => identity).
    return out


# ---------------------------------------------------------------------------
# Kernel 2: fused TransformerEncoderLayer (post-norm, causal mask, eval mode)
# ---------------------------------------------------------------------------

def encoder_layer_kernel(x_ref, wqkv_ref, bqkv_ref, wo_ref, bo_ref,
                         ln1g_ref, ln1b_ref, w1_ref, b1_ref, w2_ref, b2_ref,
                         ln2g_ref, ln2b_ref, out_ref, *, nhead):
    Bb, S, D = x_ref.shape
    hd = D // nhead
    scale = 1.0 / math.sqrt(hd)                          # folded into q

    x2 = x_ref[...].reshape(Bb * S, D)                   # (Bb*S, D) lane-dense
    qkv = jnp.dot(x2, wqkv_ref[...], preferred_element_type=jnp.float32) + bqkv_ref[...]

    # causal additive mask built in-kernel (no HBM input)
    qpos = lax.broadcasted_iota(jnp.int32, (S, S), 0)
    kpos = lax.broadcasted_iota(jnp.int32, (S, S), 1)
    neg = jnp.where(kpos <= qpos, 0.0, -1e30).astype(jnp.float32)

    heads = []
    for h in range(nhead):
        qh = (qkv[:, h * hd:(h + 1) * hd] * scale).reshape(Bb, S, hd)
        kh = qkv[:, D + h * hd:D + (h + 1) * hd].reshape(Bb, S, hd)
        vh = qkv[:, 2 * D + h * hd:2 * D + (h + 1) * hd].reshape(Bb, S, hd)
        s = jnp.einsum('bqd,bkd->bqk', qh, kh,
                       preferred_element_type=jnp.float32) + neg[None, :, :]
        p = _softmax_lastdim(s)
        heads.append(jnp.einsum('bqk,bkd->bqd', p, vh,
                                preferred_element_type=jnp.float32))
    ctx = jnp.concatenate(heads, axis=-1).reshape(Bb * S, D)

    attn = jnp.dot(ctx, wo_ref[...], preferred_element_type=jnp.float32) + bo_ref[...]
    h1 = _layernorm(x2 + attn, ln1g_ref[...], ln1b_ref[...])

    ff = jnp.maximum(jnp.dot(h1, w1_ref[...], preferred_element_type=jnp.float32)
                     + b1_ref[...], 0.0)
    ff2 = jnp.dot(ff, w2_ref[...], preferred_element_type=jnp.float32) + b2_ref[...]
    h2 = _layernorm(h1 + ff2, ln2g_ref[...], ln2b_ref[...])

    out_ref[...] = h2.reshape(Bb, S, D)


def encoder_layer_pallas(x, p, *, nhead):
    B, S, D = x.shape
    F = p['w1'].shape[1]
    NB = 2 if (B % 2 == 0 and B >= 2) else 1             # batch split -> 'parallel' for v7x 2 TCs
    BB = B // NB
    kern = functools.partial(encoder_layer_kernel, nhead=nhead)
    return pl.pallas_call(
        kern,
        out_shape=jax.ShapeDtypeStruct((B, S, D), jnp.float32),
        grid=(NB,),
        in_specs=[
            pl.BlockSpec((BB, S, D), lambda i: (i, 0, 0)),
            pl.BlockSpec((D, 3 * D), lambda i: (0, 0)),
            pl.BlockSpec((1, 3 * D), lambda i: (0, 0)),
            pl.BlockSpec((D, D), lambda i: (0, 0)),
            pl.BlockSpec((1, D), lambda i: (0, 0)),
            pl.BlockSpec((1, D), lambda i: (0, 0)),
            pl.BlockSpec((1, D), lambda i: (0, 0)),
            pl.BlockSpec((D, F), lambda i: (0, 0)),
            pl.BlockSpec((1, F), lambda i: (0, 0)),
            pl.BlockSpec((F, D), lambda i: (0, 0)),
            pl.BlockSpec((1, D), lambda i: (0, 0)),
            pl.BlockSpec((1, D), lambda i: (0, 0)),
            pl.BlockSpec((1, D), lambda i: (0, 0)),
        ],
        out_specs=pl.BlockSpec((BB, S, D), lambda i: (i, 0, 0)),
        compiler_params=pltpu.CompilerParams(dimension_semantics=("parallel",)),
    )(x, p['wqkv'], p['bqkv'], p['wo'], p['bo'], p['ln1g'], p['ln1b'],
      p['w1'], p['b1'], p['w2'], p['b2'], p['ln2g'], p['ln2b'])


def encoder_layer_ref(x, p, *, nhead):
    B, S, D = x.shape
    hd = D // nhead
    scale = 1.0 / math.sqrt(hd)
    x2 = x.reshape(B * S, D)
    qkv = x2 @ p['wqkv'] + p['bqkv']
    qpos = lax.broadcasted_iota(jnp.int32, (S, S), 0)
    kpos = lax.broadcasted_iota(jnp.int32, (S, S), 1)
    neg = jnp.where(kpos <= qpos, 0.0, -1e30).astype(jnp.float32)
    heads = []
    for h in range(nhead):
        qh = (qkv[:, h * hd:(h + 1) * hd] * scale).reshape(B, S, hd)
        kh = qkv[:, D + h * hd:D + (h + 1) * hd].reshape(B, S, hd)
        vh = qkv[:, 2 * D + h * hd:2 * D + (h + 1) * hd].reshape(B, S, hd)
        s = jnp.einsum('bqd,bkd->bqk', qh, kh) + neg[None, :, :]
        heads.append(jnp.einsum('bqk,bkd->bqd', _softmax_lastdim(s), vh))
    ctx = jnp.concatenate(heads, axis=-1).reshape(B * S, D)
    attn = ctx @ p['wo'] + p['bo']
    h1 = _layernorm(x2 + attn, p['ln1g'], p['ln1b'])
    ff = jnp.maximum(h1 @ p['w1'] + p['b1'], 0.0)
    h2 = _layernorm(h1 + ff @ p['w2'] + p['b2'], p['ln2g'], p['ln2b'])
    return h2.reshape(B, S, D)


# ---------------------------------------------------------------------------
# Kernel 3: fused classifier head  (Linear -> ReLU -> Linear -> softmax)
# ---------------------------------------------------------------------------

def head_kernel(x_ref, w1_ref, b1_ref, w2_ref, b2_ref, logits_ref, probs_ref):
    h = jnp.maximum(jnp.dot(x_ref[...], w1_ref[...],
                            preferred_element_type=jnp.float32) + b1_ref[...], 0.0)
    # TODO(synk): dropout between decoder1 and decoder2 omitted (inference mode => identity).
    logits = jnp.dot(h, w2_ref[...], preferred_element_type=jnp.float32) + b2_ref[...]
    logits_ref[...] = logits
    probs_ref[...] = _softmax_lastdim(logits)


def head_pallas(x_flat, w1, b1, w2, b2):
    B, K = x_flat.shape
    Dh = w1.shape[1]
    C = w2.shape[1]
    return pl.pallas_call(
        head_kernel,
        out_shape=(jax.ShapeDtypeStruct((B, C), jnp.float32),
                   jax.ShapeDtypeStruct((B, C), jnp.float32)),
        grid=(1,),
        in_specs=[
            pl.BlockSpec((B, K), lambda i: (0, 0)),
            pl.BlockSpec((K, Dh), lambda i: (0, 0)),
            pl.BlockSpec((1, Dh), lambda i: (0, 0)),
            pl.BlockSpec((Dh, C), lambda i: (0, 0)),
            pl.BlockSpec((1, C), lambda i: (0, 0)),
        ],
        out_specs=(pl.BlockSpec((B, C), lambda i: (0, 0)),
                   pl.BlockSpec((B, C), lambda i: (0, 0))),
        compiler_params=pltpu.CompilerParams(dimension_semantics=("arbitrary",)),
    )(x_flat, w1, b1, w2, b2)


def head_ref(x_flat, w1, b1, w2, b2):
    h = jnp.maximum(x_flat @ w1 + b1, 0.0)
    logits = h @ w2 + b2
    return logits, _softmax_lastdim(logits)


# ---------------------------------------------------------------------------
# Full forward pass (shared glue; Pallas vs pure-JAX path selected statically)
# ---------------------------------------------------------------------------

def model_forward(kmer, ipd_means, ipd_stds, pw_means, pw_stds, params, *,
                  nhead, use_pallas):
    lstm_dir = lstm_dir_pallas if use_pallas else lstm_dir_ref
    enc_layer = encoder_layer_pallas if use_pallas else encoder_layer_ref
    head = head_pallas if use_pallas else head_ref

    # embedding gather + feature concat (tiny glue on (B,S,8))
    emb = jnp.take(params['embed'], kmer, axis=0)                       # (B, S, nembed)
    x = jnp.concatenate([emb,
                         ipd_means[..., None], ipd_stds[..., None],
                         pw_means[..., None], pw_stds[..., None]],
                        axis=-1).astype(jnp.float32)                     # (B, S, nembed+4)

    # 2-layer bidirectional LSTM -> (B, S, d_model)
    x = lstm_bidir(x, params['lstm'], params['h0'], params['c0'], lstm_dir)

    # positional encoding (dropout = identity in eval mode)
    x = x + params['pe'][None, :, :]

    # transformer encoder stack with causal src_mask (has_mask=True)
    for lp in params['layers']:
        x = enc_layer(x, lp, nhead=nhead)

    # flatten + decoder head
    B = x.shape[0]
    x_flat = x.reshape(B, -1)                                            # (B, S*d_model)
    logits, probs = head(x_flat, params['dec1_w'], params['dec1_b'],
                         params['dec2_w'], params['dec2_b'])
    return logits, probs


# ---------------------------------------------------------------------------
# main: deterministic small-shape example + self-check against pure-JAX ref
# ---------------------------------------------------------------------------

if __name__ == "__main__":
    B, S = 8, 16                       # batch, seq_len
    D_MODEL, NHEAD, NHID, NLAYERS = 128, 4, 256, 2
    NVOCAB, NEMBED, NCLASS = 16, 4, 2
    H = D_MODEL // 2                   # LSTM hidden per direction
    IN_FEAT = NEMBED + 4               # is_stds=True -> 4 ccs features

    kit = iter(jax.random.split(jax.random.PRNGKey(0), 128))

    def nrm(shape, scale=1.0):
        return (scale * jax.random.normal(next(kit), shape)).astype(jnp.float32)

    # ---- inputs ----
    kmer = jax.random.randint(next(kit), (B, S), 0, NVOCAB)
    ipd_means = nrm((B, S))
    ipd_stds = nrm((B, S))
    pw_means = nrm((B, S))
    pw_stds = nrm((B, S))

    # ---- parameters (deterministic) ----
    lstm_params = []
    fin = IN_FEAT
    for _layer in range(2):
        dirs = []
        for _d in range(2):
            dirs.append((nrm((fin, 4 * H), 0.1),     # W_ih^T
                         nrm((H, 4 * H), 0.1),       # W_hh^T
                         nrm((1, 4 * H), 0.1)))      # b_ih + b_hh
        lstm_params.append(dirs)
        fin = 2 * H
    # TODO(synk): PyTorch init_hidden draws fresh torch.randn each forward; fixed deterministic draw here.
    h0 = nrm((4, B, H))
    c0 = nrm((4, B, H))

    layers = []
    for _ in range(NLAYERS):
        layers.append(dict(
            wqkv=nrm((D_MODEL, 3 * D_MODEL), 0.05), bqkv=nrm((1, 3 * D_MODEL), 0.02),
            wo=nrm((D_MODEL, D_MODEL), 0.05), bo=nrm((1, D_MODEL), 0.02),
            ln1g=jnp.ones((1, D_MODEL), jnp.float32), ln1b=jnp.zeros((1, D_MODEL), jnp.float32),
            w1=nrm((D_MODEL, NHID), 0.05), b1=nrm((1, NHID), 0.02),
            w2=nrm((NHID, D_MODEL), 0.05), b2=nrm((1, D_MODEL), 0.02),
            ln2g=jnp.ones((1, D_MODEL), jnp.float32), ln2b=jnp.zeros((1, D_MODEL), jnp.float32),
        ))

    # sinusoidal positional encoding (same formula as the PyTorch module)
    pos = jnp.arange(S, dtype=jnp.float32)[:, None]
    div = jnp.exp(jnp.arange(0, D_MODEL, 2, dtype=jnp.float32)
                  * (-math.log(10000.0) / D_MODEL))
    pe = jnp.zeros((S, D_MODEL), jnp.float32)
    pe = pe.at[:, 0::2].set(jnp.sin(pos * div))
    pe = pe.at[:, 1::2].set(jnp.cos(pos * div))

    params = dict(
        embed=nrm((NVOCAB, NEMBED), 1.0),
        lstm=lstm_params, h0=h0, c0=c0, pe=pe, layers=layers,
        dec1_w=nrm((S * D_MODEL, D_MODEL), 0.02), dec1_b=nrm((1, D_MODEL), 0.02),
        dec2_w=nrm((D_MODEL, NCLASS), 0.05), dec2_b=nrm((1, NCLASS), 0.02),
    )

    fwd_pallas = jax.jit(functools.partial(model_forward, nhead=NHEAD, use_pallas=True))
    fwd_ref = jax.jit(functools.partial(model_forward, nhead=NHEAD, use_pallas=False))

    logits, probs = fwd_pallas(kmer, ipd_means, ipd_stds, pw_means, pw_stds, params)
    logits = jax.block_until_ready(logits)
    probs = jax.block_until_ready(probs)

    ref_logits, ref_probs = fwd_ref(kmer, ipd_means, ipd_stds, pw_means, pw_stds, params)
    ref_logits = jax.block_until_ready(ref_logits)
    ref_probs = jax.block_until_ready(ref_probs)

    assert logits.shape == (B, NCLASS) and probs.shape == (B, NCLASS)
    assert bool(jnp.all(jnp.isfinite(logits))) and bool(jnp.all(jnp.isfinite(probs)))
    assert bool(jnp.allclose(jnp.sum(probs, axis=-1), 1.0, atol=1e-5))
    assert bool(jnp.allclose(logits, ref_logits, atol=5e-2, rtol=5e-2)), \
        f"logits mismatch, max diff {float(jnp.max(jnp.abs(logits - ref_logits)))}"
    assert bool(jnp.allclose(probs, ref_probs, atol=5e-2, rtol=5e-2)), \
        f"probs mismatch, max diff {float(jnp.max(jnp.abs(probs - ref_probs)))}"

    print("KERNEL_OK")
</pallas_src>

<mosaic_0001>
module attributes {stable_mosaic.version = 11 : i64} {
  func.func @lstm_dir_kernel(%arg0: i32, %arg1: memref<16x8x128xf32, #tpu.memory_space<vmem>>, %arg2: memref<128x256xf32, #tpu.memory_space<vmem>>, %arg3: memref<64x256xf32, #tpu.memory_space<vmem>>, %arg4: memref<1x256xf32, #tpu.memory_space<vmem>>, %arg5: memref<8x64xf32, #tpu.memory_space<vmem>>, %arg6: memref<8x64xf32, #tpu.memory_space<vmem>>, %arg7: memref<16x8x64xf32, #tpu.memory_space<vmem>>) attributes {dimension_semantics = [#tpu.dimension_semantics<arbitrary>], iteration_bounds = array<i64: 1>, scalar_prefetch = 0 : i64, scratch_operands = 0 : i64, tpu.core_type = #tpu.core_type<tc>, window_params = [{pipeline_mode = #tpu.pipeline_mode<synchronous>, transform_indices = @transform_0, window_bounds = array<i64: 16, 8, 128>}, {pipeline_mode = #tpu.pipeline_mode<synchronous>, transform_indices = @transform_1, window_bounds = array<i64: 128, 256>}, {pipeline_mode = #tpu.pipeline_mode<synchronous>, transform_indices = @transform_2, window_bounds = array<i64: 64, 256>}, {pipeline_mode = #tpu.pipeline_mode<synchronous>, transform_indices = @transform_3, window_bounds = array<i64: 1, 256>}, {pipeline_mode = #tpu.pipeline_mode<synchronous>, transform_indices = @transform_4, window_bounds = array<i64: 8, 64>}, {pipeline_mode = #tpu.pipeline_mode<synchronous>, transform_indices = @transform_5, window_bounds = array<i64: 8, 64>}, {pipeline_mode = #tpu.pipeline_mode<synchronous>, transform_indices = @transform_6, window_bounds = array<i64: 16, 8, 64>}]} {
    %c0 = arith.constant 0 : index
    %c0_0 = arith.constant 0 : index
    %0 = vector.load %arg2[%c0, %c0_0] : memref<128x256xf32, #tpu.memory_space<vmem>>, vector<128x256xf32>
    %c0_1 = arith.constant 0 : index
    %c0_2 = arith.constant 0 : index
    %1 = vector.load %arg3[%c0_1, %c0_2] : memref<64x256xf32, #tpu.memory_space<vmem>>, vector<64x256xf32>
    %c0_3 = arith.constant 0 : index
    %c0_4 = arith.constant 0 : index
    %2 = vector.load %arg4[%c0_3, %c0_4] : memref<1x256xf32, #tpu.memory_space<vmem>>, vector<1x256xf32>
    %c0_5 = arith.constant 0 : index
    %c0_6 = arith.constant 0 : index
    %3 = vector.load %arg5[%c0_5, %c0_6] : memref<8x64xf32, #tpu.memory_space<vmem>>, vector<8x64xf32>
    %c0_7 = arith.constant 0 : index
    %c0_8 = arith.constant 0 : index
    %4 = vector.load %arg6[%c0_7, %c0_8] : memref<8x64xf32, #tpu.memory_space<vmem>>, vector<8x64xf32>
    %c0_i32 = arith.constant 0 : i32
    %c16_i32 = arith.constant 16 : i32
    %5 = arith.addi %c0_i32, %c16_i32 : i32
    %c1_i32 = arith.constant 1 : i32
    %6:2 = scf.for %arg8 = %c0_i32 to %5 step %c1_i32 iter_args(%arg9 = %3, %arg10 = %4) -> (vector<8x64xf32>, vector<8x64xf32>)  : i32 {
      %7 = arith.index_cast %arg8 : i32 to index
      %c0_10 = arith.constant 0 : index
      %c0_11 = arith.constant 0 : index
      %8 = vector.load %arg1[%7, %c0_10, %c0_11] : memref<16x8x128xf32, #tpu.memory_space<vmem>>, vector<1x8x128xf32>
      %9 = vector.shape_cast %8 : vector<1x8x128xf32> to vector<8x128xf32>
      %cst = arith.constant dense<0.000000e+00> : vector<8x256xf32>
      %10 = tpu.matmul %9, %0, %cst {dimension_numbers = #tpu.dot_dimension_numbers<[1], [0], [0], [1], [0, 0, 1, 1], [], []>} : vector<8x128xf32>, vector<128x256xf32>, vector<8x256xf32> -> vector<8x256xf32>
      %cst_12 = arith.constant dense<0.000000e+00> : vector<8x256xf32>
      %11 = tpu.matmul %arg9, %1, %cst_12 {dimension_numbers = #tpu.dot_dimension_numbers<[1], [0], [0], [1], [0, 0, 1, 1], [], []>} : vector<8x64xf32>, vector<64x256xf32>, vector<8x256xf32> -> vector<8x256xf32>
      %12 = arith.addf %10, %11 : vector<8x256xf32>
      %13 = vector.broadcast %2 : vector<1x256xf32> to vector<8x256xf32>
      %14 = arith.addf %12, %13 : vector<8x256xf32>
      %15 = vector.extract_strided_slice %14 {offsets = [0, 0], sizes = [8, 64], strides = [1, 1]} : vector<8x256xf32> to vector<8x64xf32>
      %cst_13 = arith.constant 0.000000e+00 : f32
      %16 = vector.broadcast %cst_13 : f32 to vector<8x64xf32>
      %17 = arith.subf %16, %15 : vector<8x64xf32>
      %18 = math.exp %17 : vector<8x64xf32>
      %cst_14 = arith.constant 1.000000e+00 : f32
      %19 = vector.broadcast %cst_14 : f32 to vector<8x64xf32>
      %20 = arith.addf %19, %18 : vector<8x64xf32>
      %cst_15 = arith.constant 1.000000e+00 : f32
      %21 = vector.broadcast %cst_15 : f32 to vector<8x64xf32>
      %22 = arith.divf %21, %20 : vector<8x64xf32>
      %23 = vector.extract_strided_slice %14 {offsets = [0, 64], sizes = [8, 64], strides = [1, 1]} : vector<8x256xf32> to vector<8x64xf32>
      %cst_16 = arith.constant 0.000000e+00 : f32
      %24 = vector.broadcast %cst_16 : f32 to vector<8x64xf32>
      %25 = arith.subf %24, %23 : vector<8x64xf32>
      %26 = math.exp %25 : vector<8x64xf32>
      %cst_17 = arith.constant 1.000000e+00 : f32
      %27 = vector.broadcast %cst_17 : f32 to vector<8x64xf32>
      %28 = arith.addf %27, %26 : vector<8x64xf32>
      %cst_18 = arith.constant 1.000000e+00 : f32
      %29 = vector.broadcast %cst_18 : f32 to vector<8x64xf32>
      %30 = arith.divf %29, %28 : vector<8x64xf32>
      %31 = vector.extract_strided_slice %14 {offsets = [0, 128], sizes = [8, 64], strides = [1, 1]} : vector<8x256xf32> to vector<8x64xf32>
      %32 = math.tanh %31 : vector<8x64xf32>
      %33 = vector.extract_strided_slice %14 {offsets = [0, 192], sizes = [8, 64], strides = [1, 1]} : vector<8x256xf32> to vector<8x64xf32>
      %cst_19 = arith.constant 0.000000e+00 : f32
      %34 = vector.broadcast %cst_19 : f32 to vector<8x64xf32>
      %35 = arith.subf %34, %33 : vector<8x64xf32>
      %36 = math.exp %35 : vector<8x64xf32>
      %cst_20 = arith.constant 1.000000e+00 : f32
      %37 = vector.broadcast %cst_20 : f32 to vector<8x64xf32>
      %38 = arith.addf %37, %36 : vector<8x64xf32>
      %cst_21 = arith.constant 1.000000e+00 : f32
      %39 = vector.broadcast %cst_21 : f32 to vector<8x64xf32>
      %40 = arith.divf %39, %38 : vector<8x64xf32>
      %41 = arith.mulf %30, %arg10 : vector<8x64xf32>
      %42 = arith.mulf %22, %32 : vector<8x64xf32>
      %43 = arith.addf %41, %42 : vector<8x64xf32>
      %44 = math.tanh %43 : vector<8x64xf32>
      %45 = arith.mulf %40, %44 : vector<8x64xf32>
      %46 = arith.index_cast %arg8 : i32 to index
      %c0_22 = arith.constant 0 : index
      %c0_23 = arith.constant 0 : index
      %47 = vector.load %arg7[%46, %c0_22, %c0_23] : memref<16x8x64xf32, #tpu.memory_space<vmem>>, vector<1x8x64xf32>
      %48 = vector.shape_cast %47 : vector<1x8x64xf32> to vector<8x64xf32>
      %49 = vector.shape_cast %45 : vector<8x64xf32> to vector<1x8x64xf32>
      tpu.vector_store %arg7[%46, %c0_22, %c0_23], %49 {strides = array<i32>} : memref<16x8x64xf32, #tpu.memory_space<vmem>>, vector<1x8x64xf32>,
      scf.yield %45, %43 : vector<8x64xf32>, vector<8x64xf32>
    }
    %c16_i32_9 = arith.constant 16 : i32
    return
  }
  func.func @transform_0(%arg0: i32) -> (i32, i32, i32) {
    %c0_i32 = arith.constant 0 : i32
    %c0_i32_0 = arith.constant 0 : i32
    %c0_i32_1 = arith.constant 0 : i32
    %c0_i32_2 = arith.constant 0 : i32
    return %c0_i32, %c0_i32_0, %c0_i32_1 : i32, i32, i32
  }
  func.func @transform_1(%arg0: i32) -> (i32, i32) {
    %c0_i32 = arith.constant 0 : i32
    %c0_i32_0 = arith.constant 0 : i32
    %c0_i32_1 = arith.constant 0 : i32
    return %c0_i32, %c0_i32_0 : i32, i32
  }
  func.func @transform_2(%arg0: i32) -> (i32, i32) {
    %c0_i32 = arith.constant 0 : i32
    %c0_i32_0 = arith.constant 0 : i32
    %c0_i32_1 = arith.constant 0 : i32
    return %c0_i32, %c0_i32_0 : i32, i32
  }
  func.func @transform_3(%arg0: i32) -> (i32, i32) {
    %c0_i32 = arith.constant 0 : i32
    %c0_i32_0 = arith.constant 0 : i32
    %c0_i32_1 = arith.constant 0 : i32
    return %c0_i32, %c0_i32_0 : i32, i32
  }
  func.func @transform_4(%arg0: i32) -> (i32, i32) {
    %c0_i32 = arith.constant 0 : i32
    %c0_i32_0 = arith.constant 0 : i32
    %c0_i32_1 = arith.constant 0 : i32
    return %c0_i32, %c0_i32_0 : i32, i32
  }
  func.func @transform_5(%arg0: i32) -> (i32, i32) {
    %c0_i32 = arith.constant 0 : i32
    %c0_i32_0 = arith.constant 0 : i32
    %c0_i32_1 = arith.constant 0 : i32
    return %c0_i32, %c0_i32_0 : i32, i32
  }
  func.func @transform_6(%arg0: i32) -> (i32, i32, i32) {
    %c0_i32 = arith.constant 0 : i32
    %c0_i32_0 = arith.constant 0 : i32
    %c0_i32_1 = arith.constant 0 : i32
    %c0_i32_2 = arith.constant 0 : i32
    return %c0_i32, %c0_i32_0, %c0_i32_1 : i32, i32, i32
  }
}

module attributes {stable_mosaic.version = 11 : i64} {
  func.func @lstm_dir_kernel(%arg0: i32, %arg1: memref<16x8x8xf32, #tpu.memory_space<vmem>>, %arg2: memref<8x256xf32, #tpu.memory_space<vmem>>, %arg3: memref<64x256xf32, #tpu.memory_space<vmem>>, %arg4: memref<1x256xf32, #tpu.memory_space<vmem>>, %arg5: memref<8x64xf32, #tpu.memory_space<vmem>>, %arg6: memref<8x64xf32, #tpu.memory_space<vmem>>, %arg7: memref<16x8x64xf32, #tpu.memory_space<vmem>>) attributes {dimension_semantics = [#tpu.dimension_semantics<arbitrary>], iteration_bounds = array<i64: 1>, scalar_prefetch = 0 : i64, scratch_operands = 0 : i64, tpu.core_type = #tpu.core_type<tc>, window_params = [{pipeline_mode = #tpu.pipeline_mode<synchronous>, transform_indices = @transform_0, window_bounds = array<i64: 16, 8, 8>}, {pipeline_mode = #tpu.pipeline_mode<synchronous>, transform_indices = @transform_1, window_bounds = array<i64: 8, 256>}, {pipeline_mode = #tpu.pipeline_mode<synchronous>, transform_indices = @transform_2, window_bounds = array<i64: 64, 256>}, {pipeline_mode = #tpu.pipeline_mode<synchronous>, transform_indices = @transform_3, window_bounds = array<i64: 1, 256>}, {pipeline_mode = #tpu.pipeline_mode<synchronous>, transform_indices = @transform_4, window_bounds = array<i64: 8, 64>}, {pipeline_mode = #tpu.pipeline_mode<synchronous>, transform_indices = @transform_5, window_bounds = array<i64: 8, 64>}, {pipeline_mode = #tpu.pipeline_mode<synchronous>, transform_indices = @transform_6, window_bounds = array<i64: 16, 8, 64>}]} {
    %c0 = arith.constant 0 : index
    %c0_0 = arith.constant 0 : index
    %0 = vector.load %arg2[%c0, %c0_0] : memref<8x256xf32, #tpu.memory_space<vmem>>, vector<8x256xf32>
    %c0_1 = arith.constant 0 : index
    %c0_2 = arith.constant 0 : index
    %1 = vector.load %arg3[%c0_1, %c0_2] : memref<64x256xf32, #tpu.memory_space<vmem>>, vector<64x256xf32>
    %c0_3 = arith.constant 0 : index
    %c0_4 = arith.constant 0 : index
    %2 = vector.load %arg4[%c0_3, %c0_4] : memref<1x256xf32, #tpu.memory_space<vmem>>, vector<1x256xf32>
    %c0_5 = arith.constant 0 : index
    %c0_6 = arith.constant 0 : index
    %3 = vector.load %arg5[%c0_5, %c0_6] : memref<8x64xf32, #tpu.memory_space<vmem>>, vector<8x64xf32>
    %c0_7 = arith.constant 0 : index
    %c0_8 = arith.constant 0 : index
    %4 = vector.load %arg6[%c0_7, %c0_8] : memref<8x64xf32, #tpu.memory_space<vmem>>, vector<8x64xf32>
    %c0_i32 = arith.constant 0 : i32
    %c16_i32 = arith.constant 16 : i32
    %5 = arith.addi %c0_i32, %c16_i32 : i32
    %c1_i32 = arith.constant 1 : i32
    %6:2 = scf.for %arg8 = %c0_i32 to %5 step %c1_i32 iter_args(%arg9 = %3, %arg10 = %4) -> (vector<8x64xf32>, vector<8x64xf32>)  : i32 {
      %7 = arith.index_cast %arg8 : i32 to index
      %c0_10 = arith.constant 0 : index
      %c0_11 = arith.constant 0 : index
      %8 = vector.load %arg1[%7, %c0_10, %c0_11] : memref<16x8x8xf32, #tpu.memory_space<vmem>>, vector<1x8x8xf32>
      %9 = vector.shape_cast %8 : vector<1x8x8xf32> to vector<8x8xf32>
      %cst = arith.constant dense<0.000000e+00> : vector<8x256xf32>
      %10 = tpu.matmul %9, %0, %cst {dimension_numbers = #tpu.dot_dimension_numbers<[1], [0], [0], [1], [0, 0, 1, 1], [], []>} : vector<8x8xf32>, vector<8x256xf32>, vector<8x256xf32> -> vector<8x256xf32>
      %cst_12 = arith.constant dense<0.000000e+00> : vector<8x256xf32>
      %11 = tpu.matmul %arg9, %1, %cst_12 {dimension_numbers = #tpu.dot_dimension_numbers<[1], [0], [0], [1], [0, 0, 1, 1], [], []>} : vector<8x64xf32>, vector<64x256xf32>, vector<8x256xf32> -> vector<8x256xf32>
      %12 = arith.addf %10, %11 : vector<8x256xf32>
      %13 = vector.broadcast %2 : vector<1x256xf32> to vector<8x256xf32>
      %14 = arith.addf %12, %13 : vector<8x256xf32>
      %15 = vector.extract_strided_slice %14 {offsets = [0, 0], sizes = [8, 64], strides = [1, 1]} : vector<8x256xf32> to vector<8x64xf32>
      %cst_13 = arith.constant 0.000000e+00 : f32
      %16 = vector.broadcast %cst_13 : f32 to vector<8x64xf32>
      %17 = arith.subf %16, %15 : vector<8x64xf32>
      %18 = math.exp %17 : vector<8x64xf32>
      %cst_14 = arith.constant 1.000000e+00 : f32
      %19 = vector.broadcast %cst_14 : f32 to vector<8x64xf32>
      %20 = arith.addf %19, %18 : vector<8x64xf32>
      %cst_15 = arith.constant 1.000000e+00 : f32
      %21 = vector.broadcast %cst_15 : f32 to vector<8x64xf32>
      %22 = arith.divf %21, %20 : vector<8x64xf32>
      %23 = vector.extract_strided_slice %14 {offsets = [0, 64], sizes = [8, 64], strides = [1, 1]} : vector<8x256xf32> to vector<8x64xf32>
      %cst_16 = arith.constant 0.000000e+00 : f32
      %24 = vector.broadcast %cst_16 : f32 to vector<8x64xf32>
      %25 = arith.subf %24, %23 : vector<8x64xf32>
      %26 = math.exp %25 : vector<8x64xf32>
      %cst_17 = arith.constant 1.000000e+00 : f32
      %27 = vector.broadcast %cst_17 : f32 to vector<8x64xf32>
      %28 = arith.addf %27, %26 : vector<8x64xf32>
      %cst_18 = arith.constant 1.000000e+00 : f32
      %29 = vector.broadcast %cst_18 : f32 to vector<8x64xf32>
      %30 = arith.divf %29, %28 : vector<8x64xf32>
      %31 = vector.extract_strided_slice %14 {offsets = [0, 128], sizes = [8, 64], strides = [1, 1]} : vector<8x256xf32> to vector<8x64xf32>
      %32 = math.tanh %31 : vector<8x64xf32>
      %33 = vector.extract_strided_slice %14 {offsets = [0, 192], sizes = [8, 64], strides = [1, 1]} : vector<8x256xf32> to vector<8x64xf32>
      %cst_19 = arith.constant 0.000000e+00 : f32
      %34 = vector.broadcast %cst_19 : f32 to vector<8x64xf32>
      %35 = arith.subf %34, %33 : vector<8x64xf32>
      %36 = math.exp %35 : vector<8x64xf32>
      %cst_20 = arith.constant 1.000000e+00 : f32
      %37 = vector.broadcast %cst_20 : f32 to vector<8x64xf32>
      %38 = arith.addf %37, %36 : vector<8x64xf32>
      %cst_21 = arith.constant 1.000000e+00 : f32
      %39 = vector.broadcast %cst_21 : f32 to vector<8x64xf32>
      %40 = arith.divf %39, %38 : vector<8x64xf32>
      %41 = arith.mulf %30, %arg10 : vector<8x64xf32>
      %42 = arith.mulf %22, %32 : vector<8x64xf32>
      %43 = arith.addf %41, %42 : vector<8x64xf32>
      %44 = math.tanh %43 : vector<8x64xf32>
      %45 = arith.mulf %40, %44 : vector<8x64xf32>
      %46 = arith.index_cast %arg8 : i32 to index
      %c0_22 = arith.constant 0 : index
      %c0_23 = arith.constant 0 : index
      %47 = vector.load %arg7[%46, %c0_22, %c0_23] : memref<16x8x64xf32, #tpu.memory_space<vmem>>, vector<1x8x64xf32>
      %48 = vector.shape_cast %47 : vector<1x8x64xf32> to vector<8x64xf32>
      %49 = vector.shape_cast %45 : vector<8x64xf32> to vector<1x8x64xf32>
      tpu.vector_store %arg7[%46, %c0_22, %c0_23], %49 {strides = array<i32>} : memref<16x8x64xf32, #tpu.memory_space<vmem>>, vector<1x8x64xf32>,
      scf.yield %45, %43 : vector<8x64xf32>, vector<8x64xf32>
    }
    %c16_i32_9 = arith.constant 16 : i32
    return
  }
  func.func @transform_0(%arg0: i32) -> (i32, i32, i32) {
    %c0_i32 = arith.constant 0 : i32
    %c0_i32_0 = arith.constant 0 : i32
    %c0_i32_1 = arith.constant 0 : i32
    %c0_i32_2 = arith.constant 0 : i32
    return %c0_i32, %c0_i32_0, %c0_i32_1 : i32, i32, i32
  }
  func.func @transform_1(%arg0: i32) -> (i32, i32) {
    %c0_i32 = arith.constant 0 : i32
    %c0_i32_0 = arith.constant 0 : i32
    %c0_i32_1 = arith.constant 0 : i32
    return %c0_i32, %c0_i32_0 : i32, i32
  }
  func.func @transform_2(%arg0: i32) -> (i32, i32) {
    %c0_i32 = arith.constant 0 : i32
    %c0_i32_0 = arith.constant 0 : i32
    %c0_i32_1 = arith.constant 0 : i32
    return %c0_i32, %c0_i32_0 : i32, i32
  }
  func.func @transform_3(%arg0: i32) -> (i32, i32) {
    %c0_i32 = arith.constant 0 : i32
    %c0_i32_0 = arith.constant 0 : i32
    %c0_i32_1 = arith.constant 0 : i32
    return %c0_i32, %c0_i32_0 : i32, i32
  }
  func.func @transform_4(%arg0: i32) -> (i32, i32) {
    %c0_i32 = arith.constant 0 : i32
    %c0_i32_0 = arith.constant 0 : i32
    %c0_i32_1 = arith.constant 0 : i32
    return %c0_i32, %c0_i32_0 : i32, i32
  }
  func.func @transform_5(%arg0: i32) -> (i32, i32) {
    %c0_i32 = arith.constant 0 : i32
    %c0_i32_0 = arith.constant 0 : i32
    %c0_i32_1 = arith.constant 0 : i32
    return %c0_i32, %c0_i32_0 : i32, i32
  }
  func.func @transform_6(%arg0: i32) -> (i32, i32, i32) {
    %c0_i32 = arith.constant 0 : i32
    %c0_i32_0 = arith.constant 0 : i32
    %c0_i32_1 = arith.constant 0 : i32
    %c0_i32_2 = arith.constant 0 : i32
    return %c0_i32, %c0_i32_0, %c0_i32_1 : i32, i32, i32
  }
}

module attributes {stable_mosaic.version = 11 : i64} {
  func.func @encoder_layer_kernel(%arg0: i32, %arg1: memref<4x16x128xf32, #tpu.memory_space<vmem>>, %arg2: memref<128x384xf32, #tpu.memory_space<vmem>>, %arg3: memref<1x384xf32, #tpu.memory_space<vmem>>, %arg4: memref<128x128xf32, #tpu.memory_space<vmem>>, %arg5: memref<1x128xf32, #tpu.memory_space<vmem>>, %arg6: memref<1x128xf32, #tpu.memory_space<vmem>>, %arg7: memref<1x128xf32, #tpu.memory_space<vmem>>, %arg8: memref<128x256xf32, #tpu.memory_space<vmem>>, %arg9: memref<1x256xf32, #tpu.memory_space<vmem>>, %arg10: memref<256x128xf32, #tpu.memory_space<vmem>>, %arg11: memref<1x128xf32, #tpu.memory_space<vmem>>, %arg12: memref<1x128xf32, #tpu.memory_space<vmem>>, %arg13: memref<1x128xf32, #tpu.memory_space<vmem>>, %arg14: memref<4x16x128xf32, #tpu.memory_space<vmem>>) attributes {dimension_semantics = [#tpu.dimension_semantics<parallel>], iteration_bounds = array<i64: 2>, scalar_prefetch = 0 : i64, scratch_operands = 0 : i64, tpu.core_type = #tpu.core_type<tc>, window_params = [{transform_indices = @transform_0, window_bounds = array<i64: 4, 16, 128>}, {pipeline_mode = #tpu.pipeline_mode<synchronous>, transform_indices = @transform_1, window_bounds = array<i64: 128, 384>}, {pipeline_mode = #tpu.pipeline_mode<synchronous>, transform_indices = @transform_2, window_bounds = array<i64: 1, 384>}, {pipeline_mode = #tpu.pipeline_mode<synchronous>, transform_indices = @transform_3, window_bounds = array<i64: 128, 128>}, {pipeline_mode = #tpu.pipeline_mode<synchronous>, transform_indices = @transform_4, window_bounds = array<i64: 1, 128>}, {pipeline_mode = #tpu.pipeline_mode<synchronous>, transform_indices = @transform_5, window_bounds = array<i64: 1, 128>}, {pipeline_mode = #tpu.pipeline_mode<synchronous>, transform_indices = @transform_6, window_bounds = array<i64: 1, 128>}, {pipeline_mode = #tpu.pipeline_mode<synchronous>, transform_indices = @transform_7, window_bounds = array<i64: 128, 256>}, {pipeline_mode = #tpu.pipeline_mode<synchronous>, transform_indices = @transform_8, window_bounds = array<i64: 1, 256>}, {pipeline_mode = #tpu.pipeline_mode<synchronous>, transform_indices = @transform_9, window_bounds = array<i64: 256, 128>}, {pipeline_mode = #tpu.pipeline_mode<synchronous>, transform_indices = @transform_10, window_bounds = array<i64: 1, 128>}, {pipeline_mode = #tpu.pipeline_mode<synchronous>, transform_indices = @transform_11, window_bounds = array<i64: 1, 128>}, {pipeline_mode = #tpu.pipeline_mode<synchronous>, transform_indices = @transform_12, window_bounds = array<i64: 1, 128>}, {transform_indices = @transform_13, window_bounds = array<i64: 4, 16, 128>}]} {
    %c0 = arith.constant 0 : index
    %c0_0 = arith.constant 0 : index
    %c0_1 = arith.constant 0 : index
    %0 = vector.load %arg1[%c0, %c0_0, %c0_1] : memref<4x16x128xf32, #tpu.memory_space<vmem>>, vector<4x16x128xf32>
    %1 = vector.shape_cast %0 : vector<4x16x128xf32> to vector<64x128xf32>
    %c0_2 = arith.constant 0 : index
    %c0_3 = arith.constant 0 : index
    %2 = vector.load %arg2[%c0_2, %c0_3] : memref<128x384xf32, #tpu.memory_space<vmem>>, vector<128x384xf32>
    %cst = arith.constant dense<0.000000e+00> : vector<64x384xf32>
    %3 = tpu.matmul %1, %2, %cst {dimension_numbers = #tpu.dot_dimension_numbers<[1], [0], [0], [1], [0, 0, 1, 1], [], []>} : vector<64x128xf32>, vector<128x384xf32>, vector<64x384xf32> -> vector<64x384xf32>
    %c0_4 = arith.constant 0 : index
    %c0_5 = arith.constant 0 : index
    %4 = vector.load %arg3[%c0_4, %c0_5] : memref<1x384xf32, #tpu.memory_space<vmem>>, vector<1x384xf32>
    %5 = vector.broadcast %4 : vector<1x384xf32> to vector<64x384xf32>
    %6 = arith.addf %3, %5 : vector<64x384xf32>
    %7 = tpu.iota {dimensions = array<i32: 0>} : vector<16x16xi32>
    %8 = tpu.iota {dimensions = array<i32: 1>} : vector<16x16xi32>
    %9 = arith.cmpi sle, %8, %7 : vector<16x16xi32>
    %cst_6 = arith.constant 0.000000e+00 : f32
    %cst_7 = arith.constant -1.000000e+30 : f32
    %10 = vector.broadcast %cst_6 : f32 to vector<16x16xf32>
    %11 = vector.broadcast %cst_7 : f32 to vector<16x16xf32>
    %12 = arith.select %9, %10, %11 : vector<16x16xi1>, vector<16x16xf32>
    %13 = vector.extract_strided_slice %6 {offsets = [0, 0], sizes = [64, 32], strides = [1, 1]} : vector<64x384xf32> to vector<64x32xf32>
    %cst_8 = arith.constant 0.176776692 : f32
    %14 = vector.broadcast %cst_8 : f32 to vector<64x32xf32>
    %15 = arith.mulf %13, %14 : vector<64x32xf32>
    %16 = vector.shape_cast %15 : vector<64x32xf32> to vector<4x16x32xf32>
    %17 = vector.extract_strided_slice %6 {offsets = [0, 128], sizes = [64, 32], strides = [1, 1]} : vector<64x384xf32> to vector<64x32xf32>
    %18 = vector.shape_cast %17 : vector<64x32xf32> to vector<4x16x32xf32>
    %19 = vector.extract_strided_slice %6 {offsets = [0, 256], sizes = [64, 32], strides = [1, 1]} : vector<64x384xf32> to vector<64x32xf32>
    %20 = vector.shape_cast %19 : vector<64x32xf32> to vector<4x16x32xf32>
    "tpu.trace_start"() <{level = 10 : i32, message = "bqd,bkd->bqk"}> : () -> ()
    %cst_9 = arith.constant dense<0.000000e+00> : vector<4x16x16xf32>
    %21 = tpu.matmul %16, %18, %cst_9 {dimension_numbers = #tpu.dot_dimension_numbers<[2], [2], [1], [1], [0, 0, 0, 1, 1, 1], [0], [0]>} : vector<4x16x32xf32>, vector<4x16x32xf32>, vector<4x16x16xf32> -> vector<4x16x16xf32>
    "tpu.trace_stop"() : () -> ()
    %22 = vector.shape_cast %12 : vector<16x16xf32> to vector<1x16x16xf32>
    %23 = vector.broadcast %22 : vector<1x16x16xf32> to vector<4x16x16xf32>
    %24 = arith.addf %21, %23 : vector<4x16x16xf32>
    %cst_10 = arith.constant dense<0xFF800000> : vector<4x16xf32>
    %25 = vector.multi_reduction <maximumf>, %24, %cst_10 [2] : vector<4x16x16xf32> to vector<4x16xf32>
    %26 = vector.shape_cast %25 : vector<4x16xf32> to vector<4x16x1xf32>
    %27 = vector.broadcast %26 : vector<4x16x1xf32> to vector<4x16x16xf32>
    %28 = arith.subf %24, %27 : vector<4x16x16xf32>
    %29 = math.exp %28 : vector<4x16x16xf32>
    %cst_11 = arith.constant dense<0.000000e+00> : vector<4x16xf32>
    %30 = vector.multi_reduction <add>, %29, %cst_11 [2] : vector<4x16x16xf32> to vector<4x16xf32>
    %31 = vector.shape_cast %30 : vector<4x16xf32> to vector<4x16x1xf32>
    %32 = vector.broadcast %31 : vector<4x16x1xf32> to vector<4x16x16xf32>
    %33 = arith.divf %29, %32 : vector<4x16x16xf32>
    "tpu.trace_start"() <{level = 10 : i32, message = "bqk,bkd->bqd"}> : () -> ()
    %cst_12 = arith.constant dense<0.000000e+00> : vector<4x16x32xf32>
    %34 = tpu.matmul %33, %20, %cst_12 {dimension_numbers = #tpu.dot_dimension_numbers<[2], [1], [1], [2], [0, 0, 0, 1, 1, 2], [0], [0]>} : vector<4x16x16xf32>, vector<4x16x32xf32>, vector<4x16x32xf32> -> vector<4x16x32xf32>
    "tpu.trace_stop"() : () -> ()
    %35 = vector.extract_strided_slice %6 {offsets = [0, 32], sizes = [64, 32], strides = [1, 1]} : vector<64x384xf32> to vector<64x32xf32>
    %cst_13 = arith.constant 0.176776692 : f32
    %36 = vector.broadcast %cst_13 : f32 to vector<64x32xf32>
    %37 = arith.mulf %35, %36 : vector<64x32xf32>
    %38 = vector.shape_cast %37 : vector<64x32xf32> to vector<4x16x32xf32>
    %39 = vector.extract_strided_slice %6 {offsets = [0, 160], sizes = [64, 32], strides = [1, 1]} : vector<64x384xf32> to vector<64x32xf32>
    %40 = vector.shape_cast %39 : vector<64x32xf32> to vector<4x16x32xf32>
    %41 = vector.extract_strided_slice %6 {offsets = [0, 288], sizes = [64, 32], strides = [1, 1]} : vector<64x384xf32> to vector<64x32xf32>
    %42 = vector.shape_cast %41 : vector<64x32xf32> to vector<4x16x32xf32>
    "tpu.trace_start"() <{level = 10 : i32, message = "bqd,bkd->bqk"}> : () -> ()
    %cst_14 = arith.constant dense<0.000000e+00> : vector<4x16x16xf32>
    %43 = tpu.matmul %38, %40, %cst_14 {dimension_numbers = #tpu.dot_dimension_numbers<[2], [2], [1], [1], [0, 0, 0, 1, 1, 1], [0], [0]>} : vector<4x16x32xf32>, vector<4x16x32xf32>, vector<4x16x16xf32> -> vector<4x16x16xf32>
    "tpu.trace_stop"() : () -> ()
    %44 = vector.shape_cast %12 : vector<16x16xf32> to vector<1x16x16xf32>
    %45 = vector.broadcast %44 : vector<1x16x16xf32> to vector<4x16x16xf32>
    %46 = arith.addf %43, %45 : vector<4x16x16xf32>
    %cst_15 = arith.constant dense<0xFF800000> : vector<4x16xf32>
    %47 = vector.multi_reduction <maximumf>, %46, %cst_15 [2] : vector<4x16x16xf32> to vector<4x16xf32>
    %48 = vector.shape_cast %47 : vector<4x16xf32> to vector<4x16x1xf32>
    %49 = vector.broadcast %48 : vector<4x16x1xf32> to vector<4x16x16xf32>
    %50 = arith.subf %46, %49 : vector<4x16x16xf32>
    %51 = math.exp %50 : vector<4x16x16xf32>
    %cst_16 = arith.constant dense<0.000000e+00> : vector<4x16xf32>
    %52 = vector.multi_reduction <add>, %51, %cst_16 [2] : vector<4x16x16xf32> to vector<4x16xf32>
    %53 = vector.shape_cast %52 : vector<4x16xf32> to vector<4x16x1xf32>
    %54 = vector.broadcast %53 : vector<4x16x1xf32> to vector<4x16x16xf32>
    %55 = arith.divf %51, %54 : vector<4x16x16xf32>
    "tpu.trace_start"() <{level = 10 : i32, message = "bqk,bkd->bqd"}> : () -> ()
    %cst_17 = arith.constant dense<0.000000e+00> : vector<4x16x32xf32>
    %56 = tpu.matmul %55, %42, %cst_17 {dimension_numbers = #tpu.dot_dimension_numbers<[2], [1], [1], [2], [0, 0, 0, 1, 1, 2], [0], [0]>} : vector<4x16x16xf32>, vector<4x16x32xf32>, vector<4x16x32xf32> -> vector<4x16x32xf32>
    "tpu.trace_stop"() : () -> ()
    %57 = vector.extract_strided_slice %6 {offsets = [0, 64], sizes = [64, 32], strides = [1, 1]} : vector<64x384xf32> to vector<64x32xf32>
    %cst_18 = arith.constant 0.176776692 : f32
    %58 = vector.broadcast %cst_18 : f32 to vector<64x32xf32>
    %59 = arith.mulf %57, %58 : vector<64x32xf32>
    %60 = vector.shape_cast %59 : vector<64x32xf32> to vector<4x16x32xf32>
    %61 = vector.extract_strided_slice %6 {offsets = [0, 192], sizes = [64, 32], strides = [1, 1]} : vector<64x384xf32> to vector<64x32xf32>
    %62 = vector.shape_cast %61 : vector<64x32xf32> to vector<4x16x32xf32>
    %63 = vector.extract_strided_slice %6 {offsets = [0, 320], sizes = [64, 32], strides = [1, 1]} : vector<64x384xf32> to vector<64x32xf32>
    %64 = vector.shape_cast %63 : vector<64x32xf32> to vector<4x16x32xf32>
    "tpu.trace_start"() <{level = 10 : i32, message = "bqd,bkd->bqk"}> : () -> ()
    %cst_19 = arith.constant dense<0.000000e+00> : vector<4x16x16xf32>
    %65 = tpu.matmul %60, %62, %cst_19 {dimension_numbers = #tpu.dot_dimension_numbers<[2], [2], [1], [1], [0, 0, 0, 1, 1, 1], [0], [0]>} : vector<4x16x32xf32>, vector<4x16x32xf32>, vector<4x16x16xf32> -> vector<4x16x16xf32>
    "tpu.trace_stop"() : () -> ()
    %66 = vector.shape_cast %12 : vector<16x16xf32> to vector<1x16x16xf32>
    %67 = vector.broadcast %66 : vector<1x16x16xf32> to vector<4x16x16xf32>
    %68 = arith.addf %65, %67 : vector<4x16x16xf32>
    %cst_20 = arith.constant dense<0xFF800000> : vector<4x16xf32>
    %69 = vector.multi_reduction <maximumf>, %68, %cst_20 [2] : vector<4x16x16xf32> to vector<4x16xf32>
    %70 = vector.shape_cast %69 : vector<4x16xf32> to vector<4x16x1xf32>
    %71 = vector.broadcast %70 : vector<4x16x1xf32> to vector<4x16x16xf32>
    %72 = arith.subf %68, %71 : vector<4x16x16xf32>
    %73 = math.exp %72 : vector<4x16x16xf32>
    %cst_21 = arith.constant dense<0.000000e+00> : vector<4x16xf32>
    %74 = vector.multi_reduction <add>, %73, %cst_21 [2] : vector<4x16x16xf32> to vector<4x16xf32>
    %75 = vector.shape_cast %74 : vector<4x16xf32> to vector<4x16x1xf32>
    %76 = vector.broadcast %75 : vector<4x16x1xf32> to vector<4x16x16xf32>
    %77 = arith.divf %73, %76 : vector<4x16x16xf32>
    "tpu.trace_start"() <{level = 10 : i32, message = "bqk,bkd->bqd"}> : () -> ()
    %cst_22 = arith.constant dense<0.000000e+00> : vector<4x16x32xf32>
    %78 = tpu.matmul %77, %64, %cst_22 {dimension_numbers = #tpu.dot_dimension_numbers<[2], [1], [1], [2], [0, 0, 0, 1, 1, 2], [0], [0]>} : vector<4x16x16xf32>, vector<4x16x32xf32>, vector<4x16x32xf32> -> vector<4x16x32xf32>
    "tpu.trace_stop"() : () -> ()
    %79 = vector.extract_strided_slice %6 {offsets = [0, 96], sizes = [64, 32], strides = [1, 1]} : vector<64x384xf32> to vector<64x32xf32>
    %cst_23 = arith.constant 0.176776692 : f32
    %80 = vector.broadcast %cst_23 : f32 to vector<64x32xf32>
    %81 = arith.mulf %79, %80 : vector<64x32xf32>
    %82 = vector.shape_cast %81 : vector<64x32xf32> to vector<4x16x32xf32>
    %83 = vector.extract_strided_slice %6 {offsets = [0, 224], sizes = [64, 32], strides = [1, 1]} : vector<64x384xf32> to vector<64x32xf32>
    %84 = vector.shape_cast %83 : vector<64x32xf32> to vector<4x16x32xf32>
    %85 = vector.extract_strided_slice %6 {offsets = [0, 352], sizes = [64, 32], strides = [1, 1]} : vector<64x384xf32> to vector<64x32xf32>
    %86 = vector.shape_cast %85 : vector<64x32xf32> to vector<4x16x32xf32>
    "tpu.trace_start"() <{level = 10 : i32, message = "bqd,bkd->bqk"}> : () -> ()
    %cst_24 = arith.constant dense<0.000000e+00> : vector<4x16x16xf32>
    %87 = tpu.matmul %82, %84, %cst_24 {dimension_numbers = #tpu.dot_dimension_numbers<[2], [2], [1], [1], [0, 0, 0, 1, 1, 1], [0], [0]>} : vector<4x16x32xf32>, vector<4x16x32xf32>, vector<4x16x16xf32> -> vector<4x16x16xf32>
    "tpu.trace_stop"() : () -> ()
    %88 = vector.shape_cast %12 : vector<16x16xf32> to vector<1x16x16xf32>
    %89 = vector.broadcast %88 : vector<1x16x16xf32> to vector<4x16x16xf32>
    %90 = arith.addf %87, %89 : vector<4x16x16xf32>
    %cst_25 = arith.constant dense<0xFF800000> : vector<4x16xf32>
    %91 = vector.multi_reduction <maximumf>, %90, %cst_25 [2] : vector<4x16x16xf32> to vector<4x16xf32>
    %92 = vector.shape_cast %91 : vector<4x16xf32> to vector<4x16x1xf32>
    %93 = vector.broadcast %92 : vector<4x16x1xf32> to vector<4x16x16xf32>
    %94 = arith.subf %90, %93 : vector<4x16x16xf32>
    %95 = math.exp %94 : vector<4x16x16xf32>
    %cst_26 = arith.constant dense<0.000000e+00> : vector<4x16xf32>
    %96 = vector.multi_reduction <add>, %95, %cst_26 [2] : vector<4x16x16xf32> to vector<4x16xf32>
    %97 = vector.shape_cast %96 : vector<4x16xf32> to vector<4x16x1xf32>
    %98 = vector.broadcast %97 : vector<4x16x1xf32> to vector<4x16x16xf32>
    %99 = arith.divf %95, %98 : vector<4x16x16xf32>
    "tpu.trace_start"() <{level = 10 : i32, message = "bqk,bkd->bqd"}> : () -> ()
    %cst_27 = arith.constant dense<0.000000e+00> : vector<4x16x32xf32>
    %100 = tpu.matmul %99, %86, %cst_27 {dimension_numbers = #tpu.dot_dimension_numbers<[2], [1], [1], [2], [0, 0, 0, 1, 1, 2], [0], [0]>} : vector<4x16x16xf32>, vector<4x16x32xf32>, vector<4x16x32xf32> -> vector<4x16x32xf32>
    "tpu.trace_stop"() : () -> ()
    %101 = tpu.concatenate %34, %56, %78, %100 in 2 : vector<4x16x32xf32>, vector<4x16x32xf32>, vector<4x16x32xf32>, vector<4x16x32xf32> -> vector<4x16x128xf32>
    %102 = vector.shape_cast %101 : vector<4x16x128xf32> to vector<64x128xf32>
    %c0_28 = arith.constant 0 : index
    %c0_29 = arith.constant 0 : index
    %103 = vector.load %arg4[%c0_28, %c0_29] : memref<128x128xf32, #tpu.memory_space<vmem>>, vector<128x128xf32>
    %cst_30 = arith.constant dense<0.000000e+00> : vector<64x128xf32>
    %104 = tpu.matmul %102, %103, %cst_30 {dimension_numbers = #tpu.dot_dimension_numbers<[1], [0], [0], [1], [0, 0, 1, 1], [], []>} : vector<64x128xf32>, vector<128x128xf32>, vector<64x128xf32> -> vector<64x128xf32>
    %c0_31 = arith.constant 0 : index
    %c0_32 = arith.constant 0 : index
    %105 = vector.load %arg5[%c0_31, %c0_32] : memref<1x128xf32, #tpu.memory_space<vmem>>, vector<1x128xf32>
    %106 = vector.broadcast %105 : vector<1x128xf32> to vector<64x128xf32>
    %107 = arith.addf %104, %106 : vector<64x128xf32>
    %108 = arith.addf %1, %107 : vector<64x128xf32>
    %c0_33 = arith.constant 0 : index
    %c0_34 = arith.constant 0 : index
    %109 = vector.load %arg6[%c0_33, %c0_34] : memref<1x128xf32, #tpu.memory_space<vmem>>, vector<1x128xf32>
    %c0_35 = arith.constant 0 : index
    %c0_36 = arith.constant 0 : index
    %110 = vector.load %arg7[%c0_35, %c0_36] : memref<1x128xf32, #tpu.memory_space<vmem>>, vector<1x128xf32>
    %cst_37 = arith.constant dense<0.000000e+00> : vector<64xf32>
    %111 = vector.multi_reduction <add>, %108, %cst_37 [1] : vector<64x128xf32> to vector<64xf32>
    %112 = vector.shape_cast %111 : vector<64xf32> to vector<64x1xf32>
    %cst_38 = arith.constant 1.280000e+02 : f32
    %113 = vector.broadcast %cst_38 : f32 to vector<64x1xf32>
    %114 = arith.divf %112, %113 : vector<64x1xf32>
    %115 = vector.broadcast %114 : vector<64x1xf32> to vector<64x128xf32>
    %116 = arith.subf %108, %115 : vector<64x128xf32>
    %117 = arith.mulf %116, %116 : vector<64x128xf32>
    %cst_39 = arith.constant dense<0.000000e+00> : vector<64xf32>
    %118 = vector.multi_reduction <add>, %117, %cst_39 [1] : vector<64x128xf32> to vector<64xf32>
    %119 = vector.shape_cast %118 : vector<64xf32> to vector<64x1xf32>
    %cst_40 = arith.constant 1.280000e+02 : f32
    %120 = vector.broadcast %cst_40 : f32 to vector<64x1xf32>
    %121 = arith.divf %119, %120 : vector<64x1xf32>
    %cst_41 = arith.constant 9.99999974E-6 : f32
    %122 = vector.broadcast %cst_41 : f32 to vector<64x1xf32>
    %123 = arith.addf %121, %122 : vector<64x1xf32>
    %124 = math.rsqrt %123 : vector<64x1xf32>
    %125 = vector.broadcast %124 : vector<64x1xf32> to vector<64x128xf32>
    %126 = arith.mulf %116, %125 : vector<64x128xf32>
    %127 = vector.broadcast %109 : vector<1x128xf32> to vector<64x128xf32>
    %128 = arith.mulf %126, %127 : vector<64x128xf32>
    %129 = vector.broadcast %110 : vector<1x128xf32> to vector<64x128xf32>
    %130 = arith.addf %128, %129 : vector<64x128xf32>
    %c0_42 = arith.constant 0 : index
    %c0_43 = arith.constant 0 : index
    %131 = vector.load %arg8[%c0_42, %c0_43] : memref<128x256xf32, #tpu.memory_space<vmem>>, vector<128x256xf32>
    %cst_44 = arith.constant dense<0.000000e+00> : vector<64x256xf32>
    %132 = tpu.matmul %130, %131, %cst_44 {dimension_numbers = #tpu.dot_dimension_numbers<[1], [0], [0], [1], [0, 0, 1, 1], [], []>} : vector<64x128xf32>, vector<128x256xf32>, vector<64x256xf32> -> vector<64x256xf32>
    %c0_45 = arith.constant 0 : index
    %c0_46 = arith.constant 0 : index
    %133 = vector.load %arg9[%c0_45, %c0_46] : memref<1x256xf32, #tpu.memory_space<vmem>>, vector<1x256xf32>
    %134 = vector.broadcast %133 : vector<1x256xf32> to vector<64x256xf32>
    %135 = arith.addf %132, %134 : vector<64x256xf32>
    %cst_47 = arith.constant 0.000000e+00 : f32
    %136 = vector.broadcast %cst_47 : f32 to vector<64x256xf32>
    %137 = arith.maximumf %135, %136 : vector<64x256xf32>
    %c0_48 = arith.constant 0 : index
    %c0_49 = arith.constant 0 : index
    %138 = vector.load %arg10[%c0_48, %c0_49] : memref<256x128xf32, #tpu.memory_space<vmem>>, vector<256x128xf32>
    %cst_50 = arith.constant dense<0.000000e+00> : vector<64x128xf32>
    %139 = tpu.matmul %137, %138, %cst_50 {dimension_numbers = #tpu.dot_dimension_numbers<[1], [0], [0], [1], [0, 0, 1, 1], [], []>} : vector<64x256xf32>, vector<256x128xf32>, vector<64x128xf32> -> vector<64x128xf32>
    %c0_51 = arith.constant 0 : index
    %c0_52 = arith.constant 0 : index
    %140 = vector.load %arg11[%c0_51, %c0_52] : memref<1x128xf32, #tpu.memory_space<vmem>>, vector<1x128xf32>
    %141 = vector.broadcast %140 : vector<1x128xf32> to vector<64x128xf32>
    %142 = arith.addf %139, %141 : vector<64x128xf32>
    %143 = arith.addf %130, %142 : vector<64x128xf32>
    %c0_53 = arith.constant 0 : index
    %c0_54 = arith.constant 0 : index
    %144 = vector.load %arg12[%c0_53, %c0_54] : memref<1x128xf32, #tpu.memory_space<vmem>>, vector<1x128xf32>
    %c0_55 = arith.constant 0 : index
    %c0_56 = arith.constant 0 : index
    %145 = vector.load %arg13[%c0_55, %c0_56] : memref<1x128xf32, #tpu.memory_space<vmem>>, vector<1x128xf32>
    %cst_57 = arith.constant dense<0.000000e+00> : vector<64xf32>
    %146 = vector.multi_reduction <add>, %143, %cst_57 [1] : vector<64x128xf32> to vector<64xf32>
    %147 = vector.shape_cast %146 : vector<64xf32> to vector<64x1xf32>
    %cst_58 = arith.constant 1.280000e+02 : f32
    %148 = vector.broadcast %cst_58 : f32 to vector<64x1xf32>
    %149 = arith.divf %147, %148 : vector<64x1xf32>
    %150 = vector.broadcast %149 : vector<64x1xf32> to vector<64x128xf32>
    %151 = arith.subf %143, %150 : vector<64x128xf32>
    %152 = arith.mulf %151, %151 : vector<64x128xf32>
    %cst_59 = arith.constant dense<0.000000e+00> : vector<64xf32>
    %153 = vector.multi_reduction <add>, %152, %cst_59 [1] : vector<64x128xf32> to vector<64xf32>
    %154 = vector.shape_cast %153 : vector<64xf32> to vector<64x1xf32>
    %cst_60 = arith.constant 1.280000e+02 : f32
    %155 = vector.broadcast %cst_60 : f32 to vector<64x1xf32>
    %156 = arith.divf %154, %155 : vector<64x1xf32>
    %cst_61 = arith.constant 9.99999974E-6 : f32
    %157 = vector.broadcast %cst_61 : f32 to vector<64x1xf32>
    %158 = arith.addf %156, %157 : vector<64x1xf32>
    %159 = math.rsqrt %158 : vector<64x1xf32>
    %160 = vector.broadcast %159 : vector<64x1xf32> to vector<64x128xf32>
    %161 = arith.mulf %151, %160 : vector<64x128xf32>
    %162 = vector.broadcast %144 : vector<1x128xf32> to vector<64x128xf32>
    %163 = arith.mulf %161, %162 : vector<64x128xf32>
    %164 = vector.broadcast %145 : vector<1x128xf32> to vector<64x128xf32>
    %165 = arith.addf %163, %164 : vector<64x128xf32>
    %166 = vector.shape_cast %165 : vector<64x128xf32> to vector<4x16x128xf32>
    %c0_62 = arith.constant 0 : index
    %c0_63 = arith.constant 0 : index
    %c0_64 = arith.constant 0 : index
    %167 = vector.load %arg14[%c0_62, %c0_63, %c0_64] : memref<4x16x128xf32, #tpu.memory_space<vmem>>, vector<4x16x128xf32>
    tpu.vector_store %arg14[%c0_62, %c0_63, %c0_64], %166 {strides = array<i32>} : memref<4x16x128xf32, #tpu.memory_space<vmem>>, vector<4x16x128xf32>,
    return
  }
  func.func @transform_0(%arg0: i32) -> (i32, i32, i32) {
    %c0_i32 = arith.constant 0 : i32
    %c0_i32_0 = arith.constant 0 : i32
    %c0_i32_1 = arith.constant 0 : i32
    return %arg0, %c0_i32, %c0_i32_0 : i32, i32, i32
  }
  func.func @transform_1(%arg0: i32) -> (i32, i32) {
    %c0_i32 = arith.constant 0 : i32
    %c0_i32_0 = arith.constant 0 : i32
    %c0_i32_1 = arith.constant 0 : i32
    return %c0_i32, %c0_i32_0 : i32, i32
  }
  func.func @transform_2(%arg0: i32) -> (i32, i32) {
    %c0_i32 = arith.constant 0 : i32
    %c0_i32_0 = arith.constant 0 : i32
    %c0_i32_1 = arith.constant 0 : i32
    return %c0_i32, %c0_i32_0 : i32, i32
  }
  func.func @transform_3(%arg0: i32) -> (i32, i32) {
    %c0_i32 = arith.constant 0 : i32
    %c0_i32_0 = arith.constant 0 : i32
    %c0_i32_1 = arith.constant 0 : i32
    return %c0_i32, %c0_i32_0 : i32, i32
  }
  func.func @transform_4(%arg0: i32) -> (i32, i32) {
    %c0_i32 = arith.constant 0 : i32
    %c0_i32_0 = arith.constant 0 : i32
    %c0_i32_1 = arith.constant 0 : i32
    return %c0_i32, %c0_i32_0 : i32, i32
  }
  func.func @transform_5(%arg0: i32) -> (i32, i32) {
    %c0_i32 = arith.constant 0 : i32
    %c0_i32_0 = arith.constant 0 : i32
    %c0_i32_1 = arith.constant 0 : i32
    return %c0_i32, %c0_i32_0 : i32, i32
  }
  func.func @transform_6(%arg0: i32) -> (i32, i32) {
    %c0_i32 = arith.constant 0 : i32
    %c0_i32_0 = arith.constant 0 : i32
    %c0_i32_1 = arith.constant 0 : i32
    return %c0_i32, %c0_i32_0 : i32, i32
  }
  func.func @transform_7(%arg0: i32) -> (i32, i32) {
    %c0_i32 = arith.constant 0 : i32
    %c0_i32_0 = arith.constant 0 : i32
    %c0_i32_1 = arith.constant 0 : i32
    return %c0_i32, %c0_i32_0 : i32, i32
  }
  func.func @transform_8(%arg0: i32) -> (i32, i32) {
    %c0_i32 = arith.constant 0 : i32
    %c0_i32_0 = arith.constant 0 : i32
    %c0_i32_1 = arith.constant 0 : i32
    return %c0_i32, %c0_i32_0 : i32, i32
  }
  func.func @transform_9(%arg0: i32) -> (i32, i32) {
    %c0_i32 = arith.constant 0 : i32
    %c0_i32_0 = arith.constant 0 : i32
    %c0_i32_1 = arith.constant 0 : i32
    return %c0_i32, %c0_i32_0 : i32, i32
  }
  func.func @transform_10(%arg0: i32) -> (i32, i32) {
    %c0_i32 = arith.constant 0 : i32
    %c0_i32_0 = arith.constant 0 : i32
    %c0_i32_1 = arith.constant 0 : i32
    return %c0_i32, %c0_i32_0 : i32, i32
  }
  func.func @transform_11(%arg0: i32) -> (i32, i32) {
    %c0_i32 = arith.constant 0 : i32
    %c0_i32_0 = arith.constant 0 : i32
    %c0_i32_1 = arith.constant 0 : i32
    return %c0_i32, %c0_i32_0 : i32, i32
  }
  func.func @transform_12(%arg0: i32) -> (i32, i32) {
    %c0_i32 = arith.constant 0 : i32
    %c0_i32_0 = arith.constant 0 : i32
    %c0_i32_1 = arith.constant 0 : i32
    return %c0_i32, %c0_i32_0 : i32, i32
  }
  func.func @transform_13(%arg0: i32) -> (i32, i32, i32) {
    %c0_i32 = arith.constant 0 : i32
    %c0_i32_0 = arith.constant 0 : i32
    %c0_i32_1 = arith.constant 0 : i32
    return %arg0, %c0_i32, %c0_i32_0 : i32, i32, i32
  }
}

module attributes {stable_mosaic.version = 11 : i64} {
  func.func @head_kernel(%arg0: i32, %arg1: memref<8x2048xf32, #tpu.memory_space<vmem>>, %arg2: memref<2048x128xf32, #tpu.memory_space<vmem>>, %arg3: memref<1x128xf32, #tpu.memory_space<vmem>>, %arg4: memref<128x2xf32, #tpu.memory_space<vmem>>, %arg5: memref<1x2xf32, #tpu.memory_space<vmem>>, %arg6: memref<8x2xf32, #tpu.memory_space<vmem>>, %arg7: memref<8x2xf32, #tpu.memory_space<vmem>>) attributes {dimension_semantics = [#tpu.dimension_semantics<arbitrary>], iteration_bounds = array<i64: 1>, scalar_prefetch = 0 : i64, scratch_operands = 0 : i64, tpu.core_type = #tpu.core_type<tc>, window_params = [{pipeline_mode = #tpu.pipeline_mode<synchronous>, transform_indices = @transform_0, window_bounds = array<i64: 8, 2048>}, {pipeline_mode = #tpu.pipeline_mode<synchronous>, transform_indices = @transform_1, window_bounds = array<i64: 2048, 128>}, {pipeline_mode = #tpu.pipeline_mode<synchronous>, transform_indices = @transform_2, window_bounds = array<i64: 1, 128>}, {pipeline_mode = #tpu.pipeline_mode<synchronous>, transform_indices = @transform_3, window_bounds = array<i64: 128, 2>}, {pipeline_mode = #tpu.pipeline_mode<synchronous>, transform_indices = @transform_4, window_bounds = array<i64: 1, 2>}, {pipeline_mode = #tpu.pipeline_mode<synchronous>, transform_indices = @transform_5, window_bounds = array<i64: 8, 2>}, {pipeline_mode = #tpu.pipeline_mode<synchronous>, transform_indices = @transform_6, window_bounds = array<i64: 8, 2>}]} {
    %c0 = arith.constant 0 : index
    %c0_0 = arith.constant 0 : index
    %0 = vector.load %arg1[%c0, %c0_0] : memref<8x2048xf32, #tpu.memory_space<vmem>>, vector<8x2048xf32>
    %c0_1 = arith.constant 0 : index
    %c0_2 = arith.constant 0 : index
    %1 = vector.load %arg2[%c0_1, %c0_2] : memref<2048x128xf32, #tpu.memory_space<vmem>>, vector<2048x128xf32>
    %cst = arith.constant dense<0.000000e+00> : vector<8x128xf32>
    %2 = tpu.matmul %0, %1, %cst {dimension_numbers = #tpu.dot_dimension_numbers<[1], [0], [0], [1], [0, 0, 1, 1], [], []>} : vector<8x2048xf32>, vector<2048x128xf32>, vector<8x128xf32> -> vector<8x128xf32>
    %c0_3 = arith.constant 0 : index
    %c0_4 = arith.constant 0 : index
    %3 = vector.load %arg3[%c0_3, %c0_4] : memref<1x128xf32, #tpu.memory_space<vmem>>, vector<1x128xf32>
    %4 = vector.broadcast %3 : vector<1x128xf32> to vector<8x128xf32>
    %5 = arith.addf %2, %4 : vector<8x128xf32>
    %cst_5 = arith.constant 0.000000e+00 : f32
    %6 = vector.broadcast %cst_5 : f32 to vector<8x128xf32>
    %7 = arith.maximumf %5, %6 : vector<8x128xf32>
    %c0_6 = arith.constant 0 : index
    %c0_7 = arith.constant 0 : index
    %8 = vector.load %arg4[%c0_6, %c0_7] : memref<128x2xf32, #tpu.memory_space<vmem>>, vector<128x2xf32>
    %cst_8 = arith.constant dense<0.000000e+00> : vector<8x2xf32>
    %9 = tpu.matmul %7, %8, %cst_8 {dimension_numbers = #tpu.dot_dimension_numbers<[1], [0], [0], [1], [0, 0, 1, 1], [], []>} : vector<8x128xf32>, vector<128x2xf32>, vector<8x2xf32> -> vector<8x2xf32>
    %c0_9 = arith.constant 0 : index
    %c0_10 = arith.constant 0 : index
    %10 = vector.load %arg5[%c0_9, %c0_10] : memref<1x2xf32, #tpu.memory_space<vmem>>, vector<1x2xf32>
    %11 = vector.broadcast %10 : vector<1x2xf32> to vector<8x2xf32>
    %12 = arith.addf %9, %11 : vector<8x2xf32>
    %c0_11 = arith.constant 0 : index
    %c0_12 = arith.constant 0 : index
    %13 = vector.load %arg6[%c0_11, %c0_12] : memref<8x2xf32, #tpu.memory_space<vmem>>, vector<8x2xf32>
    tpu.vector_store %arg6[%c0_11, %c0_12], %12 {strides = array<i32>} : memref<8x2xf32, #tpu.memory_space<vmem>>, vector<8x2xf32>,
    %cst_13 = arith.constant dense<0xFF800000> : vector<8xf32>
    %14 = vector.multi_reduction <maximumf>, %12, %cst_13 [1] : vector<8x2xf32> to vector<8xf32>
    %15 = vector.shape_cast %14 : vector<8xf32> to vector<8x1xf32>
    %16 = vector.broadcast %15 : vector<8x1xf32> to vector<8x2xf32>
    %17 = arith.subf %12, %16 : vector<8x2xf32>
    %18 = math.exp %17 : vector<8x2xf32>
    %cst_14 = arith.constant dense<0.000000e+00> : vector<8xf32>
    %19 = vector.multi_reduction <add>, %18, %cst_14 [1] : vector<8x2xf32> to vector<8xf32>
    %20 = vector.shape_cast %19 : vector<8xf32> to vector<8x1xf32>
    %21 = vector.broadcast %20 : vector<8x1xf32> to vector<8x2xf32>
    %22 = arith.divf %18, %21 : vector<8x2xf32>
    %c0_15 = arith.constant 0 : index
    %c0_16 = arith.constant 0 : index
    %23 = vector.load %arg7[%c0_15, %c0_16] : memref<8x2xf32, #tpu.memory_space<vmem>>, vector<8x2xf32>
    tpu.vector_store %arg7[%c0_15, %c0_16], %22 {strides = array<i32>} : memref<8x2xf32, #tpu.memory_space<vmem>>, vector<8x2xf32>,
    return
  }
  func.func @transform_0(%arg0: i32) -> (i32, i32) {
    %c0_i32 = arith.constant 0 : i32
    %c0_i32_0 = arith.constant 0 : i32
    %c0_i32_1 = arith.constant 0 : i32
    return %c0_i32, %c0_i32_0 : i32, i32
  }
  func.func @transform_1(%arg0: i32) -> (i32, i32) {
    %c0_i32 = arith.constant 0 : i32
    %c0_i32_0 = arith.constant 0 : i32
    %c0_i32_1 = arith.constant 0 : i32
    return %c0_i32, %c0_i32_0 : i32, i32
  }
  func.func @transform_2(%arg0: i32) -> (i32, i32) {
    %c0_i32 = arith.constant 0 : i32
    %c0_i32_0 = arith.constant 0 : i32
    %c0_i32_1 = arith.constant 0 : i32
    return %c0_i32, %c0_i32_0 : i32, i32
  }
  func.func @transform_3(%arg0: i32) -> (i32, i32) {
    %c0_i32 = arith.constant 0 : i32
    %c0_i32_0 = arith.constant 0 : i32
    %c0_i32_1 = arith.constant 0 : i32
    return %c0_i32, %c0_i32_0 : i32, i32
  }
  func.func @transform_4(%arg0: i32) -> (i32, i32) {
    %c0_i32 = arith.constant 0 : i32
    %c0_i32_0 = arith.constant 0 : i32
    %c0_i32_1 = arith.constant 0 : i32
    return %c0_i32, %c0_i32_0 : i32, i32
  }
  func.func @transform_5(%arg0: i32) -> (i32, i32) {
    %c0_i32 = arith.constant 0 : i32
    %c0_i32_0 = arith.constant 0 : i32
    %c0_i32_1 = arith.constant 0 : i32
    return %c0_i32, %c0_i32_0 : i32, i32
  }
  func.func @transform_6(%arg0: i32) -> (i32, i32) {
    %c0_i32 = arith.constant 0 : i32
    %c0_i32_0 = arith.constant 0 : i32
    %c0_i32_1 = arith.constant 0 : i32
    return %c0_i32, %c0_i32_0 : i32, i32
  }
}

</mosaic_0001>

<bundles_post_ra>
// kernel: model_forward.8
= control target key start
LH: loop header
LB: loop body
LE: loop exit
PB: predicated region body
PF: predicated region fallthrough
CT: control target
= control target key end

     0   :  { %s438_s13 = smov 0   ;;  %s490_s0 = inlined_call_operand.vmem [shape: f32[16,8,8], index: 0, kind: input, shape index: {}]   ;;  %s491_s1 = inlined_call_operand.vmem [shape: f32[8,256], index: 1, kind: input, shape index: {}]   ;;  %s492_s2 = inlined_call_operand.vmem [shape: f32[64,256], index: 2, kind: input, shape index: {}]   ;;  %s493_s6 = inlined_call_operand.vmem [shape: f32[16,8,64], index: 6, kind: output, shape index: {}]   ;;  %s494_s3 = inlined_call_operand.vmem [shape: f32[1,256], index: 3, kind: input, shape index: {}]   ;;  %s495_s4 = inlined_call_operand.vmem [shape: f32[8,64], index: 4, kind: input, shape index: {}]   ;;  %s496_s5 = inlined_call_operand.vmem [shape: f32[8,64], index: 5, kind: input, shape index: {}]  }
   0x1   :  { %v336_v0 = vld [vmem:[%s491_s1] sm:$0xff]  ;;  %v341_v1 = vld [vmem:[%s491_s1 + $0x8] sm:$0xff]  ;;  %v356_v4 = vld [vmem:[%s492_s2 + $0x10] sm:$0xff] }
   0x2   :  { %v346_v2 = vld [vmem:[%s492_s2] sm:$0xff]  ;;  %v351_v3 = vld [vmem:[%s492_s2 + $0x8] sm:$0xff]  ;;  %v361_v5 = vld [vmem:[%s492_s2 + $0x18] sm:$0xff] }
   0x3   :  { %v366_v6 = vld [vmem:[%s492_s2 + $0x20] sm:$0xff]  ;;  %v371_v7 = vld [vmem:[%s492_s2 + $0x28] sm:$0xff]  ;;  %v376_v8 = vld [vmem:[%s492_s2 + $0x30] sm:$0xff] }
   0x4   :  { %v381_v9 = vld [vmem:[%s492_s2 + $0x38] sm:$0xff]  ;;  %v386_v10 = vld [vmem:[%s492_s2 + $0x40] sm:$0xff]  ;;  %v391_v11 = vld [vmem:[%s492_s2 + $0x48] sm:$0xff] }
   0x5   :  { %v396_v12 = vld [vmem:[%s492_s2 + $0x50] sm:$0xff]  ;;  %v401_v13 = vld [vmem:[%s492_s2 + $0x58] sm:$0xff]  ;;  %v406_v14 = vld [vmem:[%s492_s2 + $0x60] sm:$0xff] }
   0x6   :  { %v411_v15 = vld [vmem:[%s492_s2 + $0x68] sm:$0xff]  ;;  %v416_v16 = vld [vmem:[%s492_s2 + $0x70] sm:$0xff]  ;;  %v421_v17 = vld [vmem:[%s492_s2 + $0x78] sm:$0xff] }
   0x7   :  { %v426_v18 = vld [vmem:[%s494_s3] sm:$0x3] }
   0x8   :  { %v42_v19 = vld [vmem:[%s495_s4] sm:$0xff]  }
   0x9   :  { %v43_v20 = vld [vmem:[%s496_s5] sm:$0xff]  }
   0xa LB: > { %67 = vmatpush.msra.mxu0 %v416_v16  ;;  %118 = vmatpush.msra.mxu2 %v336_v0  ;;  %s231_s2 = sshll.u32 %s295_s13, 3  ;;  %vm99_vm0 = vcmask 64512   ;;  %s297_s3 = smov 64   ;;  %vm55_vm1 = vcmask 523264   ;;  %v144_v23 = vperm.slane %v426_v18, 0  ;;  %v145_v34 = vperm.slane %v426_v18, 1  ;;  %s295_s13 = sphi %s438_s13, %s49_s13   ;;  %v291_v19 = vphi %v42_v19, %v204_v19   ;;  %v287_v20 = vphi %v43_v20, %v210_v20  }
   0xb   : > { %87 = vmatpush.msra.mxu1 %v421_v17  ;;  %138 = vmatpush.msra.mxu3 %v341_v1  ;;  %s53_s14 = scalar_lea.vmem %s490_s0, %s231_s2  ;;  %s206_s17 = scalar_lea.vmem %s493_s6, %s231_s2 }
   0xc   : > { %68 = vmatpush.msra.mxu0 %v406_v14  ;;  %190 = vrot.lane.b32.xlu0 %v287_v20, %s297_s3  ;;  %v54_v21 = vld [vmem:[%s53_s14] sm:$0xff]  ;;  %s49_s13 = sadd.s32 1, %s295_s13  }
   0xd   : > { %88 = vmatpush.msra.mxu1 %v411_v15  ;;  %234 = vmatmul.msk.f32.vlgmr.msra.gmra.mxu2 %vm99_vm0, %v54_v21  ;;  %p46_p0 = scmp.ge.s32.totalorder %s49_s13, 16  }
   0xe   : > { %69 = vmatpush.msra.mxu0 %v396_v12  ;;  %235 = vmatmul.msk.f32.vlgmr.msra.gmra.mxu3 %vm99_vm0, %v54_v21 }
   0xf   : > { %89 = vmatpush.msra.mxu1 %v401_v13 }
  0x10   : > { %70 = vmatpush.msra.mxu0 %v386_v10 }
  0x11   : > { %90 = vmatpush.msra.mxu1 %v391_v11 }
  0x12   : > { %71 = vmatpush.msra.mxu0 %v376_v8 }
  0x13   : > { %91 = vmatpush.msra.mxu1 %v381_v9 }
  0x14   : > { %72 = vmatpush.msra.mxu0 %v366_v6 }
  0x15   : > { %92 = vmatpush.msra.mxu1 %v371_v7 }
  0x16   : > { %73 = vmatpush.msra.mxu0 %v356_v4 }
  0x17   : > { %93 = vmatpush.msra.mxu1 %v361_v5 }
  0x18   : > { %74 = vmatpush.msra.mxu0 %v346_v2 }
  0x19   : > { %232 = vmatmul.msk.f32.vlgmr.msra.gmra.mxu0 %vm55_vm1, %v291_v19  ;;  %94 = vmatpush.msra.mxu1 %v351_v3 }
  0x1a   : > { %233 = vmatmul.msk.f32.vlgmr.msra.gmra.mxu1 %vm55_vm1, %v291_v19 }
  0x7e   : > { %v191_v54 = vpop.permute.xlu0 %190 }
  0x90   : > { %v120_v22 = vpop.f32.mrf.mxu2 }
  0x91   : > { %v140_v32 = vpop.f32.mrf.mxu3 }
  0x96   : > { %v76_v24 = vpop.f32.mrf.mxu0 }
  0x97   : > { %v121_v25 = vadd.f32 %v120_v22, %v76_v24  ;;  %v96_v31 = vpop.f32.mrf.mxu1 }
  0x98   : > { %v141_v33 = vadd.f32 %v140_v32, %v96_v31 }
  0x99   : > { %v148_v26 = vadd.f32 %v144_v23, %v121_v25 }
  0x9a   : > { %v149_v36 = vadd.f32 %v145_v34, %v141_v33 }
  0x9b   : > { %v150_v27 = vsub.f32 0.0, %v148_v26 }
  0x9c   : > { %v170_v48 = vsub.f32 0.0, %v149_v36 }
  0x9d   : > { %v151_v28 = vmul.f32 1.442695, %v150_v27 }
  0x9e   : > { %v171_v49 = vmul.f32 1.442695, %v170_v48 }
  0x9f   : > { %261 = vpow2.f32 %v151_v28 }
  0xa5   : > { %v262_v29 = vpop.eup %261 }
  0xa6   : > { %v153_v30 = vadd.f32 1.0, %v262_v29 }
  0xa8   : > { %263 = vrcp.f32 %v153_v30  ;;  %v165_v39 = vand.u32 2147483648, %v153_v30  ;;  %v163_v41 = vand.u32 2147483647, %v153_v30  ;;  %vm159_vm3 = vweird.f32 %v153_v30 }
  0xa9   : > { %265 = vtanh.f32 %v149_v36 }
  0xaa   : > { %v166_v44 = vor.u32 1.1754944e-38, %v165_v39  ;;  %vm164_vm5 = vcmp.eq.f32.partialorder %v163_v41, 8.507059e+37  ;;  %267 = vpow2.f32 %v171_v49 }
  0xae   : > { %v264_v35 = vpop.eup %263 }
  0xaf   : > { %v155_v37 = vmul.f32 %v264_v35, %v153_v30  ;;  %vm160_vm2 = vweird.f32 %v264_v35  ;;  %v266_v43 = vpop.eup %265 }
  0xb0   : > { %vm161_vm4 = vmor %vm159_vm3, %vm160_vm2  ;;  %v268_v50 = vpop.eup %267 }
  0xb1   : > { %v156_v38 = vsub.f32 1.0, %v155_v37  ;;  %v173_v51 = vadd.f32 1.0, %v268_v50 }
  0xb3   : > { %v157_v40 = vmul.f32 %v264_v35, %v156_v38  ;;  %269 = vrcp.f32 %v173_v51  ;;  %vm179_vm6 = vweird.f32 %v173_v51  ;;  %v185_v60 = vand.u32 2147483648, %v173_v51 }
  0xb4   : > { %v183_v62 = vand.u32 2147483647, %v173_v51 }
  0xb5   : > { %v158_v42 = vadd.f32 %v264_v35, %v157_v40  ;;  %v186_v63 = vor.u32 1.1754944e-38, %v185_v60 }
  0xb6   : > { %vm184_vm9 = vcmp.eq.f32.partialorder %v183_v62, 8.507059e+37 }
  0xb7   : > { %v162_v45 = vsel %vm161_vm4, %v264_v35, %v158_v42 }
  0xb8   : > { %v167_v46 = vsel %vm164_vm5, %v166_v44, %v162_v45 }
  0xb9   : > { %v194_v47 = vmul.f32 %v266_v43, %v167_v46  ;;  %v270_v52 = vpop.eup %269  ;;  %v193_v57 = vmul.f32 %v191_v54, %v167_v46 }
  0xba   : > { %v175_v53 = vmul.f32 %v270_v52, %v173_v51  ;;  %vm180_vm7 = vweird.f32 %v270_v52 }
  0xbb   : > { %196 = vrot.lane.b32.xlu0 %v194_v47, %s297_s3  ;;  %vm181_vm8 = vmor %vm179_vm6, %vm180_vm7 }
  0xbc   : > { %v176_v55 = vsub.f32 1.0, %v175_v53 }
  0xbe   : > { %v177_v56 = vmul.f32 %v270_v52, %v176_v55 }
  0xc0   : > { %v178_v61 = vadd.f32 %v270_v52, %v177_v56 }
  0xc2   : > { %v182_v19 = vsel %vm181_vm8, %v270_v52, %v178_v61 }
  0xc3   : > { %v187_v21 = vsel %vm184_vm9, %v186_v63, %v182_v19 }
 0x12d   : > { %v197_v58 = vpop.permute.xlu0 %196 }
 0x12e   : > { %v199_v59 = vadd.f32 %v197_v58, %v193_v57 }
 0x130   : > { %271 = vtanh.f32 %v199_v59 }
 0x136   : > { %v272_v20 = vpop.eup %271 }
 0x137   : > { %v201_v22 = vmul.f32 %v272_v20, %v187_v21 }
 0x139   : > { %203 = vrot.lane.b32.xlu1 %v201_v22, %s297_s3 }
 0x141   : > { %209 = vrot.lane.b32.xlu1 %v199_v59, %s297_s3 }
 0x1ab   : > { %v204_v19 = vpop.permute.xlu1 %203  }
 0x1ac   : > { %207 = vst.msk [vmem:[%s206_s17] sm:$0xff] %vm55_vm1, %v204_v19 }
 0x1af   :  { %48 = sbr.rel (!%p46_p0) target bundleno = 10 (0xa), region = 53 }
 0x1b3   : > { %v210_v20 = vpop.permute.xlu1 %209  }

// kernel: model_forward.10
= control target key start
LH: loop header
LB: loop body
LE: loop exit
PB: predicated region body
PF: predicated region fallthrough
CT: control target
= control target key end

     0   :  { %s612_s25 = smov 0   ;;  %s694_s0 = inlined_call_operand.vmem [shape: f32[16,8,128], index: 0, kind: input, shape index: {}]   ;;  %s695_s1 = inlined_call_operand.vmem [shape: f32[128,256], index: 1, kind: input, shape index: {}]   ;;  %s696_s6 = inlined_call_operand.vmem [shape: f32[16,8,64], index: 6, kind: output, shape index: {}]   ;;  %s697_s2 = inlined_call_operand.vmem [shape: f32[64,256], index: 2, kind: input, shape index: {}]   ;;  %s698_s3 = inlined_call_operand.vmem [shape: f32[1,256], index: 3, kind: input, shape index: {}]   ;;  %s699_s4 = inlined_call_operand.vmem [shape: f32[8,64], index: 4, kind: input, shape index: {}]   ;;  %s700_s5 = inlined_call_operand.vmem [shape: f32[8,64], index: 5, kind: input, shape index: {}]  }
   0x1   :  { %v360_v0 = vld [vmem:[%s695_s1] sm:$0xff]  ;;  %v365_v1 = vld [vmem:[%s695_s1 + $0x8] sm:$0xff]  ;;  %v370_v2 = vld [vmem:[%s695_s1 + $0x10] sm:$0xff] }
   0x2   :  { %701 = vst [vmem:[#allocation2_spill] sm:$0xff] %v360_v0  ;;  %v375_v3 = vld [vmem:[%s695_s1 + $0x18] sm:$0xff]  ;;  %v380_v4 = vld [vmem:[%s695_s1 + $0x20] sm:$0xff]  ;;  %v385_v5 = vld [vmem:[%s695_s1 + $0x28] sm:$0xff] }
   0x3   :  { %702 = vst [vmem:[#allocation3_spill] sm:$0xff] %v365_v1  ;;  %v390_v6 = vld [vmem:[%s695_s1 + $0x30] sm:$0xff]  ;;  %v395_v7 = vld [vmem:[%s695_s1 + $0x38] sm:$0xff]  ;;  %v400_v8 = vld [vmem:[%s695_s1 + $0x40] sm:$0xff] }
   0x4   :  { %703 = vst [vmem:[#allocation4_spill] sm:$0xff] %v370_v2  ;;  %v405_v9 = vld [vmem:[%s695_s1 + $0x48] sm:$0xff]  ;;  %v410_v10 = vld [vmem:[%s695_s1 + $0x50] sm:$0xff]  ;;  %v415_v11 = vld [vmem:[%s695_s1 + $0x58] sm:$0xff] }
   0x5   :  { %704 = vst [vmem:[#allocation5_spill] sm:$0xff] %v375_v3  ;;  %v420_v12 = vld [vmem:[%s695_s1 + $0x60] sm:$0xff]  ;;  %v425_v13 = vld [vmem:[%s695_s1 + $0x68] sm:$0xff]  ;;  %v430_v14 = vld [vmem:[%s695_s1 + $0x70] sm:$0xff] }
   0x6   :  { %705 = vst [vmem:[#allocation6_spill] sm:$0xff] %v380_v4  ;;  %v435_v15 = vld [vmem:[%s695_s1 + $0x78] sm:$0xff]  ;;  %v440_v16 = vld [vmem:[%s695_s1 + $0x80] sm:$0xff]  ;;  %v445_v17 = vld [vmem:[%s695_s1 + $0x88] sm:$0xff] }
   0x7   :  { %706 = vst [vmem:[#allocation7_spill] sm:$0xff] %v385_v5  ;;  %v450_v18 = vld [vmem:[%s695_s1 + $0x90] sm:$0xff]  ;;  %v455_v19 = vld [vmem:[%s695_s1 + $0x98] sm:$0xff]  ;;  %v460_v20 = vld [vmem:[%s695_s1 + $0xa0] sm:$0xff] }
   0x8   :  { %v465_v21 = vld [vmem:[%s695_s1 + $0xa8] sm:$0xff]  ;;  %v470_v22 = vld [vmem:[%s695_s1 + $0xb0] sm:$0xff]  ;;  %v475_v23 = vld [vmem:[%s695_s1 + $0xb8] sm:$0xff] }
   0x9   :  { %v480_v24 = vld [vmem:[%s695_s1 + $0xc0] sm:$0xff]  ;;  %v485_v25 = vld [vmem:[%s695_s1 + $0xc8] sm:$0xff]  ;;  %v490_v26 = vld [vmem:[%s695_s1 + $0xd0] sm:$0xff] }
   0xa   :  { %v495_v27 = vld [vmem:[%s695_s1 + $0xd8] sm:$0xff]  ;;  %v500_v28 = vld [vmem:[%s695_s1 + $0xe0] sm:$0xff]  ;;  %v505_v29 = vld [vmem:[%s695_s1 + $0xe8] sm:$0xff] }
   0xb   :  { %v510_v30 = vld [vmem:[%s695_s1 + $0xf0] sm:$0xff]  ;;  %v515_v31 = vld [vmem:[%s695_s1 + $0xf8] sm:$0xff]  ;;  %v520_v32 = vld [vmem:[%s697_s2] sm:$0xff] }
   0xc   :  { %v525_v33 = vld [vmem:[%s697_s2 + $0x8] sm:$0xff]  ;;  %v530_v34 = vld [vmem:[%s697_s2 + $0x10] sm:$0xff]  ;;  %v535_v35 = vld [vmem:[%s697_s2 + $0x18] sm:$0xff] }
   0xd   :  { %v540_v36 = vld [vmem:[%s697_s2 + $0x20] sm:$0xff]  ;;  %v545_v37 = vld [vmem:[%s697_s2 + $0x28] sm:$0xff]  ;;  %v550_v38 = vld [vmem:[%s697_s2 + $0x30] sm:$0xff] }
   0xe   :  { %v555_v39 = vld [vmem:[%s697_s2 + $0x38] sm:$0xff]  ;;  %v560_v40 = vld [vmem:[%s697_s2 + $0x40] sm:$0xff]  ;;  %v565_v41 = vld [vmem:[%s697_s2 + $0x48] sm:$0xff] }
   0xf   :  { %v570_v42 = vld [vmem:[%s697_s2 + $0x50] sm:$0xff]  ;;  %v575_v43 = vld [vmem:[%s697_s2 + $0x58] sm:$0xff]  ;;  %v580_v44 = vld [vmem:[%s697_s2 + $0x60] sm:$0xff] }
  0x10   :  { %v585_v45 = vld [vmem:[%s697_s2 + $0x68] sm:$0xff]  ;;  %v590_v46 = vld [vmem:[%s697_s2 + $0x70] sm:$0xff]  ;;  %v595_v47 = vld [vmem:[%s697_s2 + $0x78] sm:$0xff] }
  0x11   :  { %v600_v48 = vld [vmem:[%s698_s3] sm:$0x3] }
  0x12   :  { %v72_v49 = vld [vmem:[%s699_s4] sm:$0xff]  }
  0x13   :  { %v73_v50 = vld [vmem:[%s700_s5] sm:$0xff]  }
  0x14 LB: > { %129 = vmatpush.msra.mxu2 %v510_v30  ;;  %149 = vmatpush.msra.mxu3 %v515_v31  ;;  %vm85_vm0 = vcmask 523264   ;;  %s321_s2 = smov 64   ;;  %s257_s3 = sshll.u32 %s319_s25, 3  ;;  %v707_v4 = vld [vmem:[#allocation6_spill] sm:$0xff]  ;;  %v708_v5 = vld [vmem:[#allocation7_spill] sm:$0xff]  ;;  %v709_v2 = vld [vmem:[#allocation4_spill] sm:$0xff]  ;;  %s319_s25 = sphi %s612_s25, %s79_s25   ;;  %v315_v49 = vphi %v72_v49, %v230_v49   ;;  %v311_v50 = vphi %v73_v50, %v236_v50  }
  0x15   : > { %97 = vmatpush.msra.mxu0 %v590_v46  ;;  %117 = vmatpush.msra.mxu1 %v595_v47  ;;  %s83_s26 = scalar_lea.vmem %s694_s0, %s257_s3  ;;  %v710_v3 = vld [vmem:[#allocation5_spill] sm:$0xff]  ;;  %v711_v0 = vld [vmem:[#allocation2_spill] sm:$0xff]  ;;  %v712_v1 = vld [vmem:[#allocation3_spill] sm:$0xff]  ;;  %v170_v53 = vperm.slane %v600_v48, 0  ;;  %s232_s29 = scalar_lea.vmem %s696_s6, %s257_s3 }
  0x16   : > { %130 = vmatpush.msra.mxu2 %v500_v28  ;;  %150 = vmatpush.msra.mxu3 %v505_v29  ;;  %v84_v51 = vld [vmem:[%s83_s26] sm:$0xff]  ;;  %s79_s25 = sadd.s32 1, %s319_s25  }
  0x17   : > { %98 = vmatpush.msra.mxu0 %v580_v44  ;;  %118 = vmatpush.msra.mxu1 %v585_v45  ;;  %p76_p0 = scmp.ge.s32.totalorder %s79_s25, 16  }
  0x18   : > { %131 = vmatpush.msra.mxu2 %v490_v26  ;;  %151 = vmatpush.msra.mxu3 %v495_v27 }
  0x19   : > { %99 = vmatpush.msra.mxu0 %v570_v42  ;;  %119 = vmatpush.msra.mxu1 %v575_v43 }
  0x1a   : > { %132 = vmatpush.msra.mxu2 %v480_v24  ;;  %152 = vmatpush.msra.mxu3 %v485_v25 }
  0x1b   : > { %100 = vmatpush.msra.mxu0 %v560_v40  ;;  %120 = vmatpush.msra.mxu1 %v565_v41 }
  0x1c   : > { %133 = vmatpush.msra.mxu2 %v470_v22  ;;  %153 = vmatpush.msra.mxu3 %v475_v23 }
  0x1d   : > { %101 = vmatpush.msra.mxu0 %v550_v38  ;;  %121 = vmatpush.msra.mxu1 %v555_v39 }
  0x1e   : > { %134 = vmatpush.msra.mxu2 %v460_v20  ;;  %154 = vmatpush.msra.mxu3 %v465_v21 }
  0x1f   : > { %102 = vmatpush.msra.mxu0 %v540_v36  ;;  %122 = vmatpush.msra.mxu1 %v545_v37 }
  0x20   : > { %135 = vmatpush.msra.mxu2 %v450_v18  ;;  %155 = vmatpush.msra.mxu3 %v455_v19 }
  0x21   : > { %103 = vmatpush.msra.mxu0 %v530_v34  ;;  %123 = vmatpush.msra.mxu1 %v535_v35 }
  0x22   : > { %136 = vmatpush.msra.mxu2 %v440_v16  ;;  %156 = vmatpush.msra.mxu3 %v445_v17 }
  0x23   : > { %104 = vmatpush.msra.mxu0 %v520_v32  ;;  %124 = vmatpush.msra.mxu1 %v525_v33 }
  0x24   : > { %137 = vmatpush.msra.mxu2 %v430_v14  ;;  %157 = vmatpush.msra.mxu3 %v435_v15 }
  0x25   : > { %258 = vmatmul.msk.f32.vlgmr.msra.gmra.mxu0 %vm85_vm0, %v315_v49  ;;  %259 = vmatmul.msk.f32.vlgmr.msra.gmra.mxu1 %vm85_vm0, %v315_v49  ;;  %v171_v49 = vperm.slane %v600_v48, 1 }
  0x26   : > { %138 = vmatpush.msra.mxu2 %v420_v12  ;;  %158 = vmatpush.msra.mxu3 %v425_v13 }
  0x27   : > { %216 = vrot.lane.b32.xlu0 %v311_v50, %s321_s2 }
  0x28   : > { %139 = vmatpush.msra.mxu2 %v410_v10  ;;  %159 = vmatpush.msra.mxu3 %v415_v11 }
  0x2a   : > { %140 = vmatpush.msra.mxu2 %v400_v8  ;;  %160 = vmatpush.msra.mxu3 %v405_v9 }
  0x2c   : > { %141 = vmatpush.msra.mxu2 %v390_v6  ;;  %161 = vmatpush.msra.mxu3 %v395_v7 }
  0x2e   : > { %142 = vmatpush.msra.mxu2 %v707_v4  ;;  %162 = vmatpush.msra.mxu3 %v708_v5 }
  0x30   : > { %143 = vmatpush.msra.mxu2 %v709_v2  ;;  %163 = vmatpush.msra.mxu3 %v710_v3 }
  0x32   : > { %144 = vmatpush.msra.mxu2 %v711_v0  ;;  %164 = vmatpush.msra.mxu3 %v712_v1 }
  0x33   : > { %145 = vmatmul.f32.vlgmr.msra.gmra.mxu2 %v84_v51  ;;  %165 = vmatmul.f32.vlgmr.msra.gmra.mxu3 %v84_v51 }
  0xa2   : > { %v106_v52 = vpop.f32.mrf.mxu0  ;;  %v126_v61 = vpop.f32.mrf.mxu1 }
  0xb6   : > { %v146_v54 = vpop.f32.mrf.mxu2  ;;  %v166_v62 = vpop.f32.mrf.mxu3 }
  0xb7   : > { %v147_v55 = vadd.f32 %v146_v54, %v106_v52  ;;  %v167_v63 = vadd.f32 %v166_v62, %v126_v61 }
  0xb9   : > { %v174_v56 = vadd.f32 %v170_v53, %v147_v55  ;;  %v175_v0 = vadd.f32 %v171_v49, %v167_v63 }
  0xbb   : > { %v176_v57 = vsub.f32 0.0, %v174_v56 }
  0xbd   : > { %v177_v58 = vmul.f32 1.442695, %v176_v57 }
  0xbf   : > { %285 = vpow2.f32 %v177_v58 }
  0xc5   : > { %v286_v59 = vpop.eup %285 }
  0xc6   : > { %v179_v60 = vadd.f32 1.0, %v286_v59  ;;  %v196_v59 = vsub.f32 0.0, %v175_v0 }
  0xc8   : > { %287 = vrcp.f32 %v179_v60  ;;  %v191_v2 = vand.u32 2147483648, %v179_v60  ;;  %v189_v52 = vand.u32 2147483647, %v179_v60  ;;  %vm185_vm2 = vweird.f32 %v179_v60 }
  0xc9   : > { %289 = vtanh.f32 %v175_v0  ;;  %v197_v61 = vmul.f32 1.442695, %v196_v59 }
  0xca   : > { %v192_v55 = vor.u32 1.1754944e-38, %v191_v2  ;;  %vm190_vm4 = vcmp.eq.f32.partialorder %v189_v52, 8.507059e+37 }
  0xcb   : > { %291 = vpow2.f32 %v197_v61 }
  0xce   : > { %v288_v50 = vpop.eup %287 }
  0xcf   : > { %v181_v51 = vmul.f32 %v288_v50, %v179_v60  ;;  %vm186_vm1 = vweird.f32 %v288_v50  ;;  %v290_v54 = vpop.eup %289 }
  0xd0   : > { %vm187_vm3 = vmor %vm185_vm2, %vm186_vm1 }
  0xd1   : > { %v182_v1 = vsub.f32 1.0, %v181_v51  ;;  %v292_v62 = vpop.eup %291  ;;  %v217_v51 = vpop.permute.xlu0 %216 }
  0xd2   : > { %v199_v63 = vadd.f32 1.0, %v292_v62 }
  0xd3   : > { %v183_v3 = vmul.f32 %v288_v50, %v182_v1 }
  0xd4   : > { %293 = vrcp.f32 %v199_v63  ;;  %vm205_vm5 = vweird.f32 %v199_v63 }
  0xd5   : > { %v184_v53 = vadd.f32 %v288_v50, %v183_v3 }
  0xd7   : > { %v188_v56 = vsel %vm187_vm3, %v288_v50, %v184_v53  ;;  %v211_v50 = vand.u32 2147483648, %v199_v63  ;;  %v209_v53 = vand.u32 2147483647, %v199_v63 }
  0xd8   : > { %v193_v57 = vsel %vm190_vm4, %v192_v55, %v188_v56 }
  0xd9   : > { %v220_v58 = vmul.f32 %v290_v54, %v193_v57  ;;  %v219_v4 = vmul.f32 %v217_v51, %v193_v57  ;;  %v212_v0 = vor.u32 1.1754944e-38, %v211_v50  ;;  %vm210_vm8 = vcmp.eq.f32.partialorder %v209_v53, 8.507059e+37 }
  0xda   : > { %v294_v1 = vpop.eup %293 }
  0xdb   : > { %222 = vrot.lane.b32.xlu0 %v220_v58, %s321_s2  ;;  %v201_v49 = vmul.f32 %v294_v1, %v199_v63  ;;  %vm206_vm6 = vweird.f32 %v294_v1 }
  0xdc   : > { %vm207_vm7 = vmor %vm205_vm5, %vm206_vm6 }
  0xdd   : > { %v202_v3 = vsub.f32 1.0, %v201_v49 }
  0xdf   : > { %v203_v60 = vmul.f32 %v294_v1, %v202_v3 }
  0xe1   : > { %v204_v52 = vadd.f32 %v294_v1, %v203_v60 }
  0xe3   : > { %v208_v54 = vsel %vm207_vm7, %v294_v1, %v204_v52 }
  0xe4   : > { %v213_v56 = vsel %vm210_vm8, %v212_v0, %v208_v54 }
 0x14d   : > { %v223_v5 = vpop.permute.xlu0 %222 }
 0x14e   : > { %v225_v2 = vadd.f32 %v223_v5, %v219_v4 }
 0x150   : > { %295 = vtanh.f32 %v225_v2 }
 0x156   : > { %v296_v55 = vpop.eup %295 }
 0x157   : > { %v227_v58 = vmul.f32 %v296_v55, %v213_v56 }
 0x159   : > { %229 = vrot.lane.b32.xlu1 %v227_v58, %s321_s2 }
 0x161   : > { %235 = vrot.lane.b32.xlu1 %v225_v2, %s321_s2 }
 0x1cb   : > { %v230_v49 = vpop.permute.xlu1 %229  }
 0x1cc   : > { %233 = vst.msk [vmem:[%s232_s29] sm:$0xff] %vm85_vm0, %v230_v49 }
 0x1cf   :  { %78 = sbr.rel (!%p76_p0) target bundleno = 20 (0x14), region = 53 }
 0x1d3   : > { %v236_v50 = vpop.permute.xlu1 %235  }

// kernel: model_forward.13
= control target key start
LH: loop header
LB: loop body
LE: loop exit
PB: predicated region body
PF: predicated region fallthrough
CT: control target
= control target key end

     0   :  { %12 = vsyncpa [#allocation3], 0  ;;  %s746_s24 = smov [#allocation2]   ;;  %s747_s26 = smov 128   ;;  %s899_s0 = inlined_call_operand.vmem [shape: f32[8,2048], index: 0, kind: input, shape index: {}]   ;;  %s900_s1 = inlined_call_operand.hbm [shape: f32[2048,128], index: 1, kind: input, shape index: {}]   ;;  %s901_s2 = inlined_call_operand.vmem [shape: f32[1,128], index: 2, kind: input, shape index: {}]   ;;  %s902_s3 = inlined_call_operand.vmem [shape: f32[128,2], index: 3, kind: input, shape index: {}]   ;;  %s903_s4 = inlined_call_operand.vmem [shape: f32[1,2], index: 4, kind: input, shape index: {}]   ;;  %s904_s5 = inlined_call_operand.vmem [shape: f32[8,2], index: 5, kind: output, shape index: {0}]   ;;  %s905_s6 = inlined_call_operand.vmem [shape: f32[8,2], index: 6, kind: output, shape index: {1}]  }
   0x1   :  { %s19_s23 = sshll.u32 %s900_s1, 4  ;;  %s21_s25 = sshll.u32 %s746_s24, 4  ;;  %s20_s23 = int_to_ptr.hbm [resolvable:$true] %s19_s23  ;;  %s22_s25 = int_to_ptr.vmem [resolvable:$true] %s21_s25 }
   0x2   :  { %s748_s27 = smov 8  }
   0x3   :  { %27 = dma.hbm_to_vmem [thread:$0]  %s20_s23, 32768, %s22_s25, [#allocation3], %s747_s26, %s747_s26, %s748_s27  }
   0x4   :  { %744 = dma.done.wait [#allocation3], 32768  }
   0x5   :  { %745 = vsyncadd [#allocation3], 4294934528  ;;  %v69_v0 = vld [vmem:[#allocation2 + $0x78] sm:$0xff]  ;;  %v68_v2 = vld [vmem:[#allocation2 + $0x70] sm:$0xff]  ;;  %vm675_vm0 = vcmask 15360  }
   0x6   :  { %v101_v1 = vld [vmem:[#allocation2 + $0x178] sm:$0xff]  ;;  %314 = vmatpush.msra.mxu0 %v69_v0  ;;  %v100_v4 = vld [vmem:[#allocation2 + $0x170] sm:$0xff]  ;;  %v67_v6 = vld [vmem:[#allocation2 + $0x68] sm:$0xff] }
   0x7   :  { %354 = vmatpush.msra.mxu2 %v101_v1  ;;  %v85_v3 = vld [vmem:[#allocation2 + $0xf8] sm:$0xff]  ;;  %v84_v7 = vld [vmem:[#allocation2 + $0xf0] sm:$0xff]  ;;  %v99_v8 = vld [vmem:[#allocation2 + $0x168] sm:$0xff] }
   0x8   :  { %v117_v5 = vld [vmem:[#allocation2 + $0x1f8] sm:$0xff]  ;;  %334 = vmatpush.msra.mxu1 %v85_v3  ;;  %315 = vmatpush.msra.mxu0 %v68_v2  ;;  %v116_v9 = vld [vmem:[#allocation2 + $0x1f0] sm:$0xff]  ;;  %v83_v10 = vld [vmem:[#allocation2 + $0xe8] sm:$0xff] }
   0x9   :  { %374 = vmatpush.msra.mxu3 %v117_v5  ;;  %355 = vmatpush.msra.mxu2 %v100_v4  ;;  %v66_v11 = vld [vmem:[#allocation2 + $0x60] sm:$0xff]  ;;  %v115_v13 = vld [vmem:[#allocation2 + $0x1e8] sm:$0xff]  ;;  %v65_v16 = vld [vmem:[#allocation2 + $0x58] sm:$0xff] }
   0xa   :  { %335 = vmatpush.msra.mxu1 %v84_v7  ;;  %v98_v12 = vld [vmem:[#allocation2 + $0x160] sm:$0xff]  ;;  %316 = vmatpush.msra.mxu0 %v67_v6  ;;  %v97_v17 = vld [vmem:[#allocation2 + $0x158] sm:$0xff]  ;;  %v64_v20 = vld [vmem:[#allocation2 + $0x50] sm:$0xff] }
   0xb   :  { %375 = vmatpush.msra.mxu3 %v116_v9  ;;  %356 = vmatpush.msra.mxu2 %v99_v8  ;;  %v82_v14 = vld [vmem:[#allocation2 + $0xe0] sm:$0xff]  ;;  %v81_v18 = vld [vmem:[#allocation2 + $0xd8] sm:$0xff]  ;;  %v96_v21 = vld [vmem:[#allocation2 + $0x150] sm:$0xff] }
   0xc   :  { %v114_v15 = vld [vmem:[#allocation2 + $0x1e0] sm:$0xff]  ;;  %336 = vmatpush.msra.mxu1 %v83_v10  ;;  %317 = vmatpush.msra.mxu0 %v66_v11  ;;  %v113_v19 = vld [vmem:[#allocation2 + $0x1d8] sm:$0xff]  ;;  %v80_v22 = vld [vmem:[#allocation2 + $0xd0] sm:$0xff] }
   0xd   :  { %376 = vmatpush.msra.mxu3 %v115_v13  ;;  %357 = vmatpush.msra.mxu2 %v98_v12  ;;  %v112_v23 = vld [vmem:[#allocation2 + $0x1d0] sm:$0xff]  ;;  %v63_v24 = vld [vmem:[#allocation2 + $0x48] sm:$0xff]  ;;  %v62_v28 = vld [vmem:[#allocation2 + $0x40] sm:$0xff] }
   0xe   :  { %337 = vmatpush.msra.mxu1 %v82_v14  ;;  %318 = vmatpush.msra.mxu0 %v65_v16  ;;  %v95_v25 = vld [vmem:[#allocation2 + $0x148] sm:$0xff]  ;;  %v94_v29 = vld [vmem:[#allocation2 + $0x140] sm:$0xff]  ;;  %v61_v32 = vld [vmem:[#allocation2 + $0x38] sm:$0xff] }
   0xf   :  { %377 = vmatpush.msra.mxu3 %v114_v15  ;;  %358 = vmatpush.msra.mxu2 %v97_v17  ;;  %v79_v26 = vld [vmem:[#allocation2 + $0xc8] sm:$0xff]  ;;  %v78_v30 = vld [vmem:[#allocation2 + $0xc0] sm:$0xff]  ;;  %v93_v33 = vld [vmem:[#allocation2 + $0x138] sm:$0xff] }
  0x10   :  { %338 = vmatpush.msra.mxu1 %v81_v18  ;;  %319 = vmatpush.msra.mxu0 %v64_v20  ;;  %v111_v27 = vld [vmem:[#allocation2 + $0x1c8] sm:$0xff]  ;;  %v110_v31 = vld [vmem:[#allocation2 + $0x1c0] sm:$0xff]  ;;  %v77_v34 = vld [vmem:[#allocation2 + $0xb8] sm:$0xff] }
  0x11   :  { %378 = vmatpush.msra.mxu3 %v113_v19  ;;  %359 = vmatpush.msra.mxu2 %v96_v21  ;;  %v109_v35 = vld [vmem:[#allocation2 + $0x1b8] sm:$0xff]  ;;  %v60_v36 = vld [vmem:[#allocation2 + $0x30] sm:$0xff]  ;;  %v59_v40 = vld [vmem:[#allocation2 + $0x28] sm:$0xff] }
  0x12   :  { %339 = vmatpush.msra.mxu1 %v80_v22  ;;  %320 = vmatpush.msra.mxu0 %v63_v24  ;;  %v92_v37 = vld [vmem:[#allocation2 + $0x130] sm:$0xff]  ;;  %v91_v41 = vld [vmem:[#allocation2 + $0x128] sm:$0xff]  ;;  %v58_v44 = vld [vmem:[#allocation2 + $0x20] sm:$0xff] }
  0x13   :  { %379 = vmatpush.msra.mxu3 %v112_v23  ;;  %360 = vmatpush.msra.mxu2 %v95_v25  ;;  %v76_v38 = vld [vmem:[#allocation2 + $0xb0] sm:$0xff]  ;;  %v75_v42 = vld [vmem:[#allocation2 + $0xa8] sm:$0xff]  ;;  %v90_v45 = vld [vmem:[#allocation2 + $0x120] sm:$0xff] }
  0x14   :  { %340 = vmatpush.msra.mxu1 %v79_v26  ;;  %321 = vmatpush.msra.mxu0 %v62_v28  ;;  %v108_v39 = vld [vmem:[#allocation2 + $0x1b0] sm:$0xff]  ;;  %v107_v43 = vld [vmem:[#allocation2 + $0x1a8] sm:$0xff]  ;;  %v74_v46 = vld [vmem:[#allocation2 + $0xa0] sm:$0xff] }
  0x15   :  { %380 = vmatpush.msra.mxu3 %v111_v27  ;;  %361 = vmatpush.msra.mxu2 %v94_v29  ;;  %v106_v47 = vld [vmem:[#allocation2 + $0x1a0] sm:$0xff]  ;;  %v57_v48 = vld [vmem:[#allocation2 + $0x18] sm:$0xff]  ;;  %v56_v52 = vld [vmem:[#allocation2 + $0x10] sm:$0xff] }
  0x16   :  { %341 = vmatpush.msra.mxu1 %v78_v30  ;;  %322 = vmatpush.msra.mxu0 %v61_v32  ;;  %v89_v49 = vld [vmem:[#allocation2 + $0x118] sm:$0xff]  ;;  %v88_v53 = vld [vmem:[#allocation2 + $0x110] sm:$0xff]  ;;  %v55_v56 = vld [vmem:[#allocation2 + $0x8] sm:$0xff] }
  0x17   :  { %381 = vmatpush.msra.mxu3 %v110_v31  ;;  %362 = vmatpush.msra.mxu2 %v93_v33  ;;  %v73_v50 = vld [vmem:[#allocation2 + $0x98] sm:$0xff]  ;;  %v72_v54 = vld [vmem:[#allocation2 + $0x90] sm:$0xff]  ;;  %v87_v57 = vld [vmem:[#allocation2 + $0x108] sm:$0xff] }
  0x18   :  { %342 = vmatpush.msra.mxu1 %v77_v34  ;;  %323 = vmatpush.msra.mxu0 %v60_v36  ;;  %v105_v51 = vld [vmem:[#allocation2 + $0x198] sm:$0xff]  ;;  %v104_v55 = vld [vmem:[#allocation2 + $0x190] sm:$0xff]  ;;  %v71_v58 = vld [vmem:[#allocation2 + $0x88] sm:$0xff] }
  0x19   :  { %382 = vmatpush.msra.mxu3 %v109_v35  ;;  %363 = vmatpush.msra.mxu2 %v92_v37  ;;  %v103_v59 = vld [vmem:[#allocation2 + $0x188] sm:$0xff]  ;;  %v54_v60 = vld [vmem:[#allocation2] sm:$0xff]  ;;  %v133_v62 = vld [vmem:[#allocation2 + $0x278] sm:$0xff] }
  0x1a   :  { %343 = vmatpush.msra.mxu1 %v76_v38  ;;  %324 = vmatpush.msra.mxu0 %v59_v40  ;;  %v86_v61 = vld [vmem:[#allocation2 + $0x100] sm:$0xff]  ;;  %v165_v63 = vld [vmem:[#allocation2 + $0x378] sm:$0xff]  ;;  %v132_v2 = vld [vmem:[#allocation2 + $0x270] sm:$0xff] }
  0x1b   :  { %383 = vmatpush.msra.mxu3 %v108_v39  ;;  %364 = vmatpush.msra.mxu2 %v91_v41  ;;  %v70_v0 = vld [vmem:[#allocation2 + $0x80] sm:$0xff]  ;;  %v149_v3 = vld [vmem:[#allocation2 + $0x2f8] sm:$0xff]  ;;  %v164_v4 = vld [vmem:[#allocation2 + $0x370] sm:$0xff] }
  0x1c   :  { %344 = vmatpush.msra.mxu1 %v75_v42  ;;  %325 = vmatpush.msra.mxu0 %v58_v44  ;;  %v102_v1 = vld [vmem:[#allocation2 + $0x180] sm:$0xff]  ;;  %v181_v5 = vld [vmem:[#allocation2 + $0x3f8] sm:$0xff]  ;;  %v131_v6 = vld [vmem:[#allocation2 + $0x268] sm:$0xff] }
  0x1d   :  { %384 = vmatpush.msra.mxu3 %v107_v43  ;;  %365 = vmatpush.msra.mxu2 %v90_v45  ;;  %v148_v7 = vld [vmem:[#allocation2 + $0x2f0] sm:$0xff]  ;;  %v163_v8 = vld [vmem:[#allocation2 + $0x368] sm:$0xff]  ;;  %v130_v10 = vld [vmem:[#allocation2 + $0x260] sm:$0xff] }
  0x1e   :  { %345 = vmatpush.msra.mxu1 %v74_v46  ;;  %326 = vmatpush.msra.mxu0 %v57_v48  ;;  %v180_v9 = vld [vmem:[#allocation2 + $0x3f0] sm:$0xff]  ;;  %v147_v11 = vld [vmem:[#allocation2 + $0x2e8] sm:$0xff]  ;;  %v162_v12 = vld [vmem:[#allocation2 + $0x360] sm:$0xff] }
  0x1f   :  { %385 = vmatpush.msra.mxu3 %v106_v47  ;;  %366 = vmatpush.msra.mxu2 %v89_v49  ;;  %v179_v13 = vld [vmem:[#allocation2 + $0x3e8] sm:$0xff]  ;;  %v129_v14 = vld [vmem:[#allocation2 + $0x258] sm:$0xff]  ;;  %v146_v15 = vld [vmem:[#allocation2 + $0x2e0] sm:$0xff] }
  0x20   :  { %346 = vmatpush.msra.mxu1 %v73_v50  ;;  %327 = vmatpush.msra.mxu0 %v56_v52  ;;  %v161_v16 = vld [vmem:[#allocation2 + $0x358] sm:$0xff]  ;;  %v178_v17 = vld [vmem:[#allocation2 + $0x3e0] sm:$0xff]  ;;  %v128_v18 = vld [vmem:[#allocation2 + $0x250] sm:$0xff] }
  0x21   :  { %386 = vmatpush.msra.mxu3 %v105_v51  ;;  %367 = vmatpush.msra.mxu2 %v88_v53  ;;  %v145_v19 = vld [vmem:[#allocation2 + $0x2d8] sm:$0xff]  ;;  %v160_v20 = vld [vmem:[#allocation2 + $0x350] sm:$0xff]  ;;  %v127_v22 = vld [vmem:[#allocation2 + $0x248] sm:$0xff] }
  0x22   :  { %347 = vmatpush.msra.mxu1 %v72_v54  ;;  %328 = vmatpush.msra.mxu0 %v55_v56  ;;  %v177_v21 = vld [vmem:[#allocation2 + $0x3d8] sm:$0xff]  ;;  %v144_v23 = vld [vmem:[#allocation2 + $0x2d0] sm:$0xff]  ;;  %v159_v24 = vld [vmem:[#allocation2 + $0x348] sm:$0xff] }
  0x23   :  { %387 = vmatpush.msra.mxu3 %v104_v55  ;;  %368 = vmatpush.msra.mxu2 %v87_v57  ;;  %v176_v25 = vld [vmem:[#allocation2 + $0x3d0] sm:$0xff]  ;;  %v126_v26 = vld [vmem:[#allocation2 + $0x240] sm:$0xff]  ;;  %v143_v27 = vld [vmem:[#allocation2 + $0x2c8] sm:$0xff] }
  0x24   :  { %348 = vmatpush.msra.mxu1 %v71_v58  ;;  %329 = vmatpush.msra.mxu0 %v54_v60  ;;  %v158_v28 = vld [vmem:[#allocation2 + $0x340] sm:$0xff]  ;;  %v175_v29 = vld [vmem:[#allocation2 + $0x3c8] sm:$0xff]  ;;  %v125_v30 = vld [vmem:[#allocation2 + $0x238] sm:$0xff] }
  0x25   :  { %388 = vmatpush.msra.mxu3 %v103_v59  ;;  %369 = vmatpush.msra.mxu2 %v86_v61  ;;  %v142_v31 = vld [vmem:[#allocation2 + $0x2c0] sm:$0xff]  ;;  %v157_v32 = vld [vmem:[#allocation2 + $0x338] sm:$0xff]  ;;  %v124_v34 = vld [vmem:[#allocation2 + $0x230] sm:$0xff] }
  0x26   :  { %394 = vmatpush.msrb.mxu0 %v133_v62  ;;  %349 = vmatpush.msra.mxu1 %v70_v0  ;;  %v174_v33 = vld [vmem:[#allocation2 + $0x3c0] sm:$0xff]  ;;  %v141_v35 = vld [vmem:[#allocation2 + $0x2b8] sm:$0xff]  ;;  %v156_v36 = vld [vmem:[#allocation2 + $0x330] sm:$0xff] }
  0x27   :  { %434 = vmatpush.msrb.mxu2 %v165_v63  ;;  %389 = vmatpush.msra.mxu3 %v102_v1  ;;  %v173_v37 = vld [vmem:[#allocation2 + $0x3b8] sm:$0xff]  ;;  %v123_v38 = vld [vmem:[#allocation2 + $0x228] sm:$0xff]  ;;  %v140_v39 = vld [vmem:[#allocation2 + $0x2b0] sm:$0xff] }
  0x28   :  { %395 = vmatpush.msrb.mxu0 %v132_v2  ;;  %414 = vmatpush.msrb.mxu1 %v149_v3  ;;  %v155_v40 = vld [vmem:[#allocation2 + $0x328] sm:$0xff]  ;;  %v172_v41 = vld [vmem:[#allocation2 + $0x3b0] sm:$0xff]  ;;  %v122_v42 = vld [vmem:[#allocation2 + $0x220] sm:$0xff] }
  0x29   :  { %435 = vmatpush.msrb.mxu2 %v164_v4  ;;  %454 = vmatpush.msrb.mxu3 %v181_v5  ;;  %v139_v43 = vld [vmem:[#allocation2 + $0x2a8] sm:$0xff]  ;;  %v154_v44 = vld [vmem:[#allocation2 + $0x320] sm:$0xff]  ;;  %v121_v46 = vld [vmem:[#allocation2 + $0x218] sm:$0xff] }
  0x2a   :  { %396 = vmatpush.msrb.mxu0 %v131_v6  ;;  %415 = vmatpush.msrb.mxu1 %v148_v7  ;;  %v171_v45 = vld [vmem:[#allocation2 + $0x3a8] sm:$0xff]  ;;  %v138_v47 = vld [vmem:[#allocation2 + $0x2a0] sm:$0xff]  ;;  %v153_v48 = vld [vmem:[#allocation2 + $0x318] sm:$0xff] }
  0x2b   :  { %436 = vmatpush.msrb.mxu2 %v163_v8  ;;  %455 = vmatpush.msrb.mxu3 %v180_v9  ;;  %v170_v49 = vld [vmem:[#allocation2 + $0x3a0] sm:$0xff]  ;;  %v120_v50 = vld [vmem:[#allocation2 + $0x210] sm:$0xff]  ;;  %v137_v51 = vld [vmem:[#allocation2 + $0x298] sm:$0xff] }
  0x2c   :  { %397 = vmatpush.msrb.mxu0 %v130_v10  ;;  %416 = vmatpush.msrb.mxu1 %v147_v11  ;;  %v152_v52 = vld [vmem:[#allocation2 + $0x310] sm:$0xff]  ;;  %v169_v53 = vld [vmem:[#allocation2 + $0x398] sm:$0xff]  ;;  %v119_v54 = vld [vmem:[#allocation2 + $0x208] sm:$0xff] }
  0x2d   :  { %437 = vmatpush.msrb.mxu2 %v162_v12  ;;  %456 = vmatpush.msrb.mxu3 %v179_v13  ;;  %v136_v55 = vld [vmem:[#allocation2 + $0x290] sm:$0xff]  ;;  %v151_v56 = vld [vmem:[#allocation2 + $0x308] sm:$0xff]  ;;  %v118_v58 = vld [vmem:[#allocation2 + $0x200] sm:$0xff] }
  0x2e   :  { %398 = vmatpush.msrb.mxu0 %v129_v14  ;;  %417 = vmatpush.msrb.mxu1 %v146_v15  ;;  %v168_v57 = vld [vmem:[#allocation2 + $0x390] sm:$0xff]  ;;  %v135_v59 = vld [vmem:[#allocation2 + $0x288] sm:$0xff]  ;;  %v150_v60 = vld [vmem:[#allocation2 + $0x300] sm:$0xff] }
  0x2f   :  { %438 = vmatpush.msrb.mxu2 %v161_v16  ;;  %457 = vmatpush.msrb.mxu3 %v178_v17  ;;  %v167_v61 = vld [vmem:[#allocation2 + $0x388] sm:$0xff]  ;;  %v38_v62 = vld [vmem:[%s899_s0] sm:$0xff]  ;;  %v40_v63 = vld [vmem:[%s899_s0 + $0x10] sm:$0xff] }
  0x30   :  { %399 = vmatpush.msrb.mxu0 %v128_v18  ;;  %418 = vmatpush.msrb.mxu1 %v145_v19  ;;  %v197_v0 = vld [vmem:[#allocation2 + $0x478] sm:$0xff]  ;;  %v134_v2 = vld [vmem:[#allocation2 + $0x280] sm:$0xff]  ;;  %v39_v4 = vld [vmem:[%s899_s0 + $0x8] sm:$0xff] }
  0x31   :  { %439 = vmatpush.msrb.mxu2 %v160_v20  ;;  %458 = vmatpush.msrb.mxu3 %v177_v21  ;;  %v229_v1 = vld [vmem:[#allocation2 + $0x578] sm:$0xff]  ;;  %v166_v3 = vld [vmem:[#allocation2 + $0x380] sm:$0xff]  ;;  %v196_v6 = vld [vmem:[#allocation2 + $0x470] sm:$0xff] }
  0x32   :  { %400 = vmatpush.msrb.mxu0 %v127_v22  ;;  %419 = vmatpush.msrb.mxu1 %v144_v23  ;;  %v41_v5 = vld [vmem:[%s899_s0 + $0x18] sm:$0xff]  ;;  %v228_v8 = vld [vmem:[#allocation2 + $0x570] sm:$0xff]  ;;  %v195_v10 = vld [vmem:[#allocation2 + $0x468] sm:$0xff] }
  0x33   :  { %440 = vmatpush.msrb.mxu2 %v159_v24  ;;  %459 = vmatpush.msrb.mxu3 %v176_v25  ;;  %v213_v7 = vld [vmem:[#allocation2 + $0x4f8] sm:$0xff]  ;;  %v212_v11 = vld [vmem:[#allocation2 + $0x4f0] sm:$0xff]  ;;  %v227_v12 = vld [vmem:[#allocation2 + $0x568] sm:$0xff] }
  0x34   :  { %401 = vmatpush.msrb.mxu0 %v126_v26  ;;  %420 = vmatpush.msrb.mxu1 %v143_v27  ;;  %v245_v9 = vld [vmem:[#allocation2 + $0x5f8] sm:$0xff]  ;;  %v244_v13 = vld [vmem:[#allocation2 + $0x5f0] sm:$0xff]  ;;  %v194_v14 = vld [vmem:[#allocation2 + $0x460] sm:$0xff] }
  0x35   :  { %441 = vmatpush.msrb.mxu2 %v158_v28  ;;  %460 = vmatpush.msrb.mxu3 %v175_v29  ;;  %v211_v15 = vld [vmem:[#allocation2 + $0x4e8] sm:$0xff]  ;;  %v226_v16 = vld [vmem:[#allocation2 + $0x560] sm:$0xff]  ;;  %v44_v18 = vld [vmem:[%s899_s0 + $0x30] sm:$0xff] }
  0x36   :  { %402 = vmatpush.msrb.mxu0 %v125_v30  ;;  %421 = vmatpush.msrb.mxu1 %v142_v31  ;;  %v243_v17 = vld [vmem:[#allocation2 + $0x5e8] sm:$0xff]  ;;  %v193_v19 = vld [vmem:[#allocation2 + $0x458] sm:$0xff]  ;;  %v210_v20 = vld [vmem:[#allocation2 + $0x4e0] sm:$0xff] }
  0x37   :  { %442 = vmatpush.msrb.mxu2 %v157_v32  ;;  %461 = vmatpush.msrb.mxu3 %v174_v33  ;;  %v225_v21 = vld [vmem:[#allocation2 + $0x558] sm:$0xff]  ;;  %v242_v22 = vld [vmem:[#allocation2 + $0x5e0] sm:$0xff]  ;;  %v192_v25 = vld [vmem:[#allocation2 + $0x450] sm:$0xff] }
  0x38   :  { %403 = vmatpush.msrb.mxu0 %v124_v34  ;;  %422 = vmatpush.msrb.mxu1 %v141_v35  ;;  %v42_v23 = vld [vmem:[%s899_s0 + $0x20] sm:$0xff]  ;;  %v45_v24 = vld [vmem:[%s899_s0 + $0x38] sm:$0xff]  ;;  %v224_v27 = vld [vmem:[#allocation2 + $0x550] sm:$0xff] }
  0x39   :  { %443 = vmatpush.msrb.mxu2 %v156_v36  ;;  %462 = vmatpush.msrb.mxu3 %v173_v37  ;;  %v209_v26 = vld [vmem:[#allocation2 + $0x4d8] sm:$0xff]  ;;  %v43_v29 = vld [vmem:[%s899_s0 + $0x28] sm:$0xff]  ;;  %v208_v31 = vld [vmem:[#allocation2 + $0x4d0] sm:$0xff] }
  0x3a   :  { %404 = vmatpush.msrb.mxu0 %v123_v38  ;;  %423 = vmatpush.msrb.mxu1 %v140_v39  ;;  %v241_v28 = vld [vmem:[#allocation2 + $0x5d8] sm:$0xff]  ;;  %v191_v30 = vld [vmem:[#allocation2 + $0x448] sm:$0xff]  ;;  %v240_v33 = vld [vmem:[#allocation2 + $0x5d0] sm:$0xff] }
  0x3b   :  { %444 = vmatpush.msrb.mxu2 %v155_v40  ;;  %463 = vmatpush.msrb.mxu3 %v172_v41  ;;  %v223_v32 = vld [vmem:[#allocation2 + $0x548] sm:$0xff]  ;;  %v190_v34 = vld [vmem:[#allocation2 + $0x440] sm:$0xff]  ;;  %v189_v38 = vld [vmem:[#allocation2 + $0x438] sm:$0xff] }
  0x3c   :  { %405 = vmatpush.msrb.mxu0 %v122_v42  ;;  %424 = vmatpush.msrb.mxu1 %v139_v43  ;;  %v207_v35 = vld [vmem:[#allocation2 + $0x4c8] sm:$0xff]  ;;  %v222_v36 = vld [vmem:[#allocation2 + $0x540] sm:$0xff]  ;;  %v221_v40 = vld [vmem:[#allocation2 + $0x538] sm:$0xff] }
  0x3d   :  { %445 = vmatpush.msrb.mxu2 %v154_v44  ;;  %464 = vmatpush.msrb.mxu3 %v171_v45  ;;  %v239_v37 = vld [vmem:[#allocation2 + $0x5c8] sm:$0xff]  ;;  %v206_v39 = vld [vmem:[#allocation2 + $0x4c0] sm:$0xff]  ;;  %v188_v42 = vld [vmem:[#allocation2 + $0x430] sm:$0xff] }
  0x3e   :  { %406 = vmatpush.msrb.mxu0 %v121_v46  ;;  %425 = vmatpush.msrb.mxu1 %v138_v47  ;;  %v238_v41 = vld [vmem:[#allocation2 + $0x5c0] sm:$0xff]  ;;  %v205_v43 = vld [vmem:[#allocation2 + $0x4b8] sm:$0xff]  ;;  %v220_v44 = vld [vmem:[#allocation2 + $0x530] sm:$0xff] }
  0x3f   :  { %446 = vmatpush.msrb.mxu2 %v153_v48  ;;  %465 = vmatpush.msrb.mxu3 %v170_v49  ;;  %v237_v45 = vld [vmem:[#allocation2 + $0x5b8] sm:$0xff]  ;;  %v187_v46 = vld [vmem:[#allocation2 + $0x428] sm:$0xff]  ;;  %v204_v47 = vld [vmem:[#allocation2 + $0x4b0] sm:$0xff] }
  0x40   :  { %407 = vmatpush.msrb.mxu0 %v120_v50  ;;  %426 = vmatpush.msrb.mxu1 %v137_v51  ;;  %v219_v48 = vld [vmem:[#allocation2 + $0x528] sm:$0xff]  ;;  %v236_v49 = vld [vmem:[#allocation2 + $0x5b0] sm:$0xff]  ;;  %v186_v50 = vld [vmem:[#allocation2 + $0x420] sm:$0xff] }
  0x41   :  { %447 = vmatpush.msrb.mxu2 %v152_v52  ;;  %466 = vmatpush.msrb.mxu3 %v169_v53  ;;  %v203_v51 = vld [vmem:[#allocation2 + $0x4a8] sm:$0xff]  ;;  %v218_v52 = vld [vmem:[#allocation2 + $0x520] sm:$0xff] }
  0x42   :  { %408 = vmatpush.msrb.mxu0 %v119_v54  ;;  %427 = vmatpush.msrb.mxu1 %v136_v55  ;;  %v235_v53 = vld [vmem:[#allocation2 + $0x5a8] sm:$0xff]  ;;  %v185_v54 = vld [vmem:[#allocation2 + $0x418] sm:$0xff]  ;;  %v202_v55 = vld [vmem:[#allocation2 + $0x4a0] sm:$0xff] }
  0x43   :  { %448 = vmatpush.msrb.mxu2 %v151_v56  ;;  %467 = vmatpush.msrb.mxu3 %v168_v57  ;;  %v217_v56 = vld [vmem:[#allocation2 + $0x518] sm:$0xff]  ;;  %v234_v57 = vld [vmem:[#allocation2 + $0x5a0] sm:$0xff] }
  0x44   :  { %409 = vmatpush.msrb.mxu0 %v118_v58  ;;  %428 = vmatpush.msrb.mxu1 %v135_v59  ;;  %v184_v58 = vld [vmem:[#allocation2 + $0x410] sm:$0xff]  ;;  %v201_v59 = vld [vmem:[#allocation2 + $0x498] sm:$0xff] }
  0x45   :  { %449 = vmatpush.msrb.mxu2 %v150_v60  ;;  %468 = vmatpush.msrb.mxu3 %v167_v61  ;;  %v216_v60 = vld [vmem:[#allocation2 + $0x510] sm:$0xff]  ;;  %v233_v61 = vld [vmem:[#allocation2 + $0x598] sm:$0xff] }
  0x46   :  { %330 = vmatmul.f32.vlgmr.msra.gmra.mxu0 %v38_v62  ;;  %370 = vmatmul.f32.vlgmr.msra.gmra.mxu2 %v40_v63  ;;  %v183_v62 = vld [vmem:[#allocation2 + $0x408] sm:$0xff]  ;;  %v200_v63 = vld [vmem:[#allocation2 + $0x490] sm:$0xff] }
  0x47   :  { %474 = vmatpush.msra.mxu0 %v197_v0  ;;  %514 = vmatpush.msra.mxu2 %v229_v1  ;;  %v215_v0 = vld [vmem:[#allocation2 + $0x508] sm:$0xff]  ;;  %v232_v1 = vld [vmem:[#allocation2 + $0x590] sm:$0xff] }
  0x48   :  { %429 = vmatpush.msrb.mxu1 %v134_v2  ;;  %469 = vmatpush.msrb.mxu3 %v166_v3  ;;  %v182_v2 = vld [vmem:[#allocation2 + $0x400] sm:$0xff]  ;;  %v199_v3 = vld [vmem:[#allocation2 + $0x488] sm:$0xff] }
  0x49   :  { %350 = vmatmul.f32.vlgmr.msra.gmra.mxu1 %v39_v4  ;;  %390 = vmatmul.f32.vlgmr.msra.gmra.mxu3 %v41_v5  ;;  %v214_v4 = vld [vmem:[#allocation2 + $0x500] sm:$0xff]  ;;  %v231_v5 = vld [vmem:[#allocation2 + $0x588] sm:$0xff] }
  0x4a   :  { %475 = vmatpush.msra.mxu0 %v196_v6  ;;  %494 = vmatpush.msra.mxu1 %v213_v7  ;;  %v46_v6 = vld [vmem:[%s899_s0 + $0x40] sm:$0xff]  ;;  %v48_v7 = vld [vmem:[%s899_s0 + $0x50] sm:$0xff] }
  0x4b   :  { %515 = vmatpush.msra.mxu2 %v228_v8  ;;  %534 = vmatpush.msra.mxu3 %v245_v9  ;;  %v261_v8 = vld [vmem:[#allocation2 + $0x678] sm:$0xff] }
  0x4c   :  { %476 = vmatpush.msra.mxu0 %v195_v10  ;;  %495 = vmatpush.msra.mxu1 %v212_v11  ;;  %v293_v9 = vld [vmem:[#allocation2 + $0x778] sm:$0xff]  ;;  %v198_v10 = vld [vmem:[#allocation2 + $0x480] sm:$0xff] }
  0x4d   :  { %516 = vmatpush.msra.mxu2 %v227_v12  ;;  %535 = vmatpush.msra.mxu3 %v244_v13  ;;  %v230_v11 = vld [vmem:[#allocation2 + $0x580] sm:$0xff]  ;;  %v47_v12 = vld [vmem:[%s899_s0 + $0x48] sm:$0xff]  ;;  %v49_v13 = vld [vmem:[%s899_s0 + $0x58] sm:$0xff] }
  0x4e   :  { %477 = vmatpush.msra.mxu0 %v194_v14  ;;  %496 = vmatpush.msra.mxu1 %v211_v15  ;;  %v260_v14 = vld [vmem:[#allocation2 + $0x670] sm:$0xff]  ;;  %v277_v15 = vld [vmem:[#allocation2 + $0x6f8] sm:$0xff] }
  0x4f   :  { %517 = vmatpush.msra.mxu2 %v226_v16  ;;  %536 = vmatpush.msra.mxu3 %v243_v17  ;;  %v292_v16 = vld [vmem:[#allocation2 + $0x770] sm:$0xff]  ;;  %v309_v17 = vld [vmem:[#allocation2 + $0x7f8] sm:$0xff] }
  0x50   :  { %450 = vmatmul.f32.vlgmr.msrb.gmra.mxu2 %v44_v18  ;;  %478 = vmatpush.msra.mxu0 %v193_v19  ;;  %v259_v18 = vld [vmem:[#allocation2 + $0x668] sm:$0xff]  ;;  %v276_v19 = vld [vmem:[#allocation2 + $0x6f0] sm:$0xff] }
  0x51   :  { %497 = vmatpush.msra.mxu1 %v210_v20  ;;  %518 = vmatpush.msra.mxu2 %v225_v21  ;;  %v291_v20 = vld [vmem:[#allocation2 + $0x768] sm:$0xff]  ;;  %v308_v21 = vld [vmem:[#allocation2 + $0x7f0] sm:$0xff] }
  0x52   :  { %537 = vmatpush.msra.mxu3 %v242_v22  ;;  %410 = vmatmul.f32.vlgmr.msrb.gmra.mxu0 %v42_v23  ;;  %v258_v22 = vld [vmem:[#allocation2 + $0x660] sm:$0xff]  ;;  %v275_v23 = vld [vmem:[#allocation2 + $0x6e8] sm:$0xff] }
  0x53   :  { %470 = vmatmul.f32.vlgmr.msrb.gmra.mxu3 %v45_v24  ;;  %479 = vmatpush.msra.mxu0 %v192_v25  ;;  %v290_v24 = vld [vmem:[#allocation2 + $0x760] sm:$0xff]  ;;  %v307_v25 = vld [vmem:[#allocation2 + $0x7e8] sm:$0xff] }
  0x54   :  { %498 = vmatpush.msra.mxu1 %v209_v26  ;;  %519 = vmatpush.msra.mxu2 %v224_v27  ;;  %v257_v26 = vld [vmem:[#allocation2 + $0x658] sm:$0xff]  ;;  %v274_v27 = vld [vmem:[#allocation2 + $0x6e0] sm:$0xff] }
  0x55   :  { %538 = vmatpush.msra.mxu3 %v241_v28  ;;  %430 = vmatmul.f32.vlgmr.msrb.gmra.mxu1 %v43_v29  ;;  %v289_v28 = vld [vmem:[#allocation2 + $0x758] sm:$0xff]  ;;  %v306_v29 = vld [vmem:[#allocation2 + $0x7e0] sm:$0xff] }
  0x56   :  { %480 = vmatpush.msra.mxu0 %v191_v30  ;;  %499 = vmatpush.msra.mxu1 %v208_v31  ;;  %v256_v30 = vld [vmem:[#allocation2 + $0x650] sm:$0xff]  ;;  %v273_v31 = vld [vmem:[#allocation2 + $0x6d8] sm:$0xff] }
  0x57   :  { %520 = vmatpush.msra.mxu2 %v223_v32  ;;  %539 = vmatpush.msra.mxu3 %v240_v33  ;;  %v288_v32 = vld [vmem:[#allocation2 + $0x750] sm:$0xff]  ;;  %v305_v33 = vld [vmem:[#allocation2 + $0x7d8] sm:$0xff] }
  0x58   :  { %481 = vmatpush.msra.mxu0 %v190_v34  ;;  %500 = vmatpush.msra.mxu1 %v207_v35  ;;  %v255_v34 = vld [vmem:[#allocation2 + $0x648] sm:$0xff]  ;;  %v272_v35 = vld [vmem:[#allocation2 + $0x6d0] sm:$0xff] }
  0x59   :  { %521 = vmatpush.msra.mxu2 %v222_v36  ;;  %540 = vmatpush.msra.mxu3 %v239_v37  ;;  %v287_v36 = vld [vmem:[#allocation2 + $0x748] sm:$0xff]  ;;  %v304_v37 = vld [vmem:[#allocation2 + $0x7d0] sm:$0xff] }
  0x5a   :  { %482 = vmatpush.msra.mxu0 %v189_v38  ;;  %501 = vmatpush.msra.mxu1 %v206_v39  ;;  %v254_v38 = vld [vmem:[#allocation2 + $0x640] sm:$0xff]  ;;  %v271_v39 = vld [vmem:[#allocation2 + $0x6c8] sm:$0xff] }
  0x5b   :  { %522 = vmatpush.msra.mxu2 %v221_v40  ;;  %541 = vmatpush.msra.mxu3 %v238_v41  ;;  %v286_v40 = vld [vmem:[#allocation2 + $0x740] sm:$0xff]  ;;  %v303_v41 = vld [vmem:[#allocation2 + $0x7c8] sm:$0xff] }
  0x5c   :  { %483 = vmatpush.msra.mxu0 %v188_v42  ;;  %502 = vmatpush.msra.mxu1 %v205_v43  ;;  %v253_v42 = vld [vmem:[#allocation2 + $0x638] sm:$0xff]  ;;  %v270_v43 = vld [vmem:[#allocation2 + $0x6c0] sm:$0xff] }
  0x5d   :  { %523 = vmatpush.msra.mxu2 %v220_v44  ;;  %542 = vmatpush.msra.mxu3 %v237_v45  ;;  %v285_v44 = vld [vmem:[#allocation2 + $0x738] sm:$0xff]  ;;  %v302_v45 = vld [vmem:[#allocation2 + $0x7c0] sm:$0xff] }
  0x5e   :  { %484 = vmatpush.msra.mxu0 %v187_v46  ;;  %503 = vmatpush.msra.mxu1 %v204_v47  ;;  %v252_v46 = vld [vmem:[#allocation2 + $0x630] sm:$0xff]  ;;  %v269_v47 = vld [vmem:[#allocation2 + $0x6b8] sm:$0xff] }
  0x5f   :  { %524 = vmatpush.msra.mxu2 %v219_v48  ;;  %543 = vmatpush.msra.mxu3 %v236_v49  ;;  %v284_v48 = vld [vmem:[#allocation2 + $0x730] sm:$0xff]  ;;  %v301_v49 = vld [vmem:[#allocation2 + $0x7b8] sm:$0xff] }
  0x60   :  { %485 = vmatpush.msra.mxu0 %v186_v50  ;;  %504 = vmatpush.msra.mxu1 %v203_v51  ;;  %v251_v50 = vld [vmem:[#allocation2 + $0x628] sm:$0xff]  ;;  %v268_v51 = vld [vmem:[#allocation2 + $0x6b0] sm:$0xff] }
  0x61   :  { %525 = vmatpush.msra.mxu2 %v218_v52  ;;  %544 = vmatpush.msra.mxu3 %v235_v53  ;;  %v283_v52 = vld [vmem:[#allocation2 + $0x728] sm:$0xff]  ;;  %v300_v53 = vld [vmem:[#allocation2 + $0x7b0] sm:$0xff] }
  0x62   :  { %486 = vmatpush.msra.mxu0 %v185_v54  ;;  %505 = vmatpush.msra.mxu1 %v202_v55  ;;  %v250_v54 = vld [vmem:[#allocation2 + $0x620] sm:$0xff]  ;;  %v267_v55 = vld [vmem:[#allocation2 + $0x6a8] sm:$0xff] }
  0x63   :  { %526 = vmatpush.msra.mxu2 %v217_v56  ;;  %545 = vmatpush.msra.mxu3 %v234_v57  ;;  %v282_v56 = vld [vmem:[#allocation2 + $0x720] sm:$0xff]  ;;  %v299_v57 = vld [vmem:[#allocation2 + $0x7a8] sm:$0xff] }
  0x64   :  { %487 = vmatpush.msra.mxu0 %v184_v58  ;;  %506 = vmatpush.msra.mxu1 %v201_v59  ;;  %v249_v58 = vld [vmem:[#allocation2 + $0x618] sm:$0xff]  ;;  %v266_v59 = vld [vmem:[#allocation2 + $0x6a0] sm:$0xff] }
  0x65   :  { %527 = vmatpush.msra.mxu2 %v216_v60  ;;  %546 = vmatpush.msra.mxu3 %v233_v61  ;;  %v281_v60 = vld [vmem:[#allocation2 + $0x718] sm:$0xff]  ;;  %v298_v61 = vld [vmem:[#allocation2 + $0x7a0] sm:$0xff] }
  0x66   :  { %488 = vmatpush.msra.mxu0 %v183_v62  ;;  %507 = vmatpush.msra.mxu1 %v200_v63  ;;  %v248_v62 = vld [vmem:[#allocation2 + $0x610] sm:$0xff]  ;;  %v265_v63 = vld [vmem:[#allocation2 + $0x698] sm:$0xff] }
  0x67   :  { %528 = vmatpush.msra.mxu2 %v215_v0  ;;  %547 = vmatpush.msra.mxu3 %v232_v1  ;;  %v280_v0 = vld [vmem:[#allocation2 + $0x710] sm:$0xff]  ;;  %v297_v1 = vld [vmem:[#allocation2 + $0x798] sm:$0xff] }
  0x68   :  { %489 = vmatpush.msra.mxu0 %v182_v2  ;;  %508 = vmatpush.msra.mxu1 %v199_v3  ;;  %v247_v2 = vld [vmem:[#allocation2 + $0x608] sm:$0xff]  ;;  %v264_v3 = vld [vmem:[#allocation2 + $0x690] sm:$0xff] }
  0x69   :  { %529 = vmatpush.msra.mxu2 %v214_v4  ;;  %548 = vmatpush.msra.mxu3 %v231_v5  ;;  %v279_v4 = vld [vmem:[#allocation2 + $0x708] sm:$0xff]  ;;  %v296_v5 = vld [vmem:[#allocation2 + $0x790] sm:$0xff] }
  0x6a   :  { %490 = vmatmul.f32.vlgmr.msra.gmra.mxu0 %v46_v6  ;;  %530 = vmatmul.f32.vlgmr.msra.gmra.mxu2 %v48_v7  ;;  %v246_v6 = vld [vmem:[#allocation2 + $0x600] sm:$0xff]  ;;  %v263_v7 = vld [vmem:[#allocation2 + $0x688] sm:$0xff] }
  0x6b   :  { %554 = vmatpush.msrb.mxu0 %v261_v8  ;;  %594 = vmatpush.msrb.mxu2 %v293_v9  ;;  %v278_v8 = vld [vmem:[#allocation2 + $0x700] sm:$0xff]  ;;  %v295_v9 = vld [vmem:[#allocation2 + $0x788] sm:$0xff] }
  0x6c   :  { %509 = vmatpush.msra.mxu1 %v198_v10  ;;  %549 = vmatpush.msra.mxu3 %v230_v11  ;;  %v50_v10 = vld [vmem:[%s899_s0 + $0x60] sm:$0xff]  ;;  %v52_v11 = vld [vmem:[%s899_s0 + $0x70] sm:$0xff] }
  0x6d   :  { %510 = vmatmul.f32.vlgmr.msra.gmra.mxu1 %v47_v12  ;;  %550 = vmatmul.f32.vlgmr.msra.gmra.mxu3 %v49_v13  ;;  %v262_v12 = vld [vmem:[#allocation2 + $0x680] sm:$0xff] }
  0x6e   :  { %555 = vmatpush.msrb.mxu0 %v260_v14  ;;  %574 = vmatpush.msrb.mxu1 %v277_v15  ;;  %v294_v13 = vld [vmem:[#allocation2 + $0x780] sm:$0xff]  ;;  %v51_v14 = vld [vmem:[%s899_s0 + $0x68] sm:$0xff]  ;;  %v53_v15 = vld [vmem:[%s899_s0 + $0x78] sm:$0xff] }
  0x6f   :  { %595 = vmatpush.msrb.mxu2 %v292_v16  ;;  %614 = vmatpush.msrb.mxu3 %v309_v17  ;;  %v650_v16 = vld [vmem:[%s902_s3 + $0x78] sm:$0xff]  ;;  %v649_v17 = vld [vmem:[%s902_s3 + $0x70] sm:$0xff] }
  0x70   :  { %556 = vmatpush.msrb.mxu0 %v259_v18  ;;  %575 = vmatpush.msrb.mxu1 %v276_v19  ;;  %v648_v18 = vld [vmem:[%s902_s3 + $0x68] sm:$0xff]  ;;  %v647_v19 = vld [vmem:[%s902_s3 + $0x60] sm:$0xff] }
  0x71   :  { %596 = vmatpush.msrb.mxu2 %v291_v20  ;;  %615 = vmatpush.msrb.mxu3 %v308_v21  ;;  %v646_v20 = vld [vmem:[%s902_s3 + $0x58] sm:$0xff]  ;;  %v645_v21 = vld [vmem:[%s902_s3 + $0x50] sm:$0xff] }
  0x72   :  { %557 = vmatpush.msrb.mxu0 %v258_v22  ;;  %576 = vmatpush.msrb.mxu1 %v275_v23  ;;  %v644_v22 = vld [vmem:[%s902_s3 + $0x48] sm:$0xff]  ;;  %v714_v23 = vld [vmem:[%s901_s2] ss:$0 sm:$0xff] }
  0x73   :  { %597 = vmatpush.msrb.mxu2 %v290_v24  ;;  %616 = vmatpush.msrb.mxu3 %v307_v25  ;;  %v643_v25 = vld [vmem:[%s902_s3 + $0x40] sm:$0xff] }
  0x74   :  { %558 = vmatpush.msrb.mxu0 %v257_v26  ;;  %577 = vmatpush.msrb.mxu1 %v274_v27  ;;  %v642_v26 = vld [vmem:[%s902_s3 + $0x38] sm:$0xff] }
  0x75   :  { %598 = vmatpush.msrb.mxu2 %v289_v28  ;;  %617 = vmatpush.msrb.mxu3 %v306_v29 }
  0x76   :  { %559 = vmatpush.msrb.mxu0 %v256_v30  ;;  %578 = vmatpush.msrb.mxu1 %v273_v31 }
  0x77   :  { %599 = vmatpush.msrb.mxu2 %v288_v32  ;;  %618 = vmatpush.msrb.mxu3 %v305_v33  ;;  %v641_v32 = vld [vmem:[%s902_s3 + $0x30] sm:$0xff] }
  0x78   :  { %560 = vmatpush.msrb.mxu0 %v255_v34  ;;  %579 = vmatpush.msrb.mxu1 %v272_v35  ;;  %v640_v34 = vld [vmem:[%s902_s3 + $0x28] sm:$0xff] }
  0x79   :  { %600 = vmatpush.msrb.mxu2 %v287_v36  ;;  %619 = vmatpush.msrb.mxu3 %v304_v37  ;;  %v639_v36 = vld [vmem:[%s902_s3 + $0x20] sm:$0xff] }
  0x7a   :  { %561 = vmatpush.msrb.mxu0 %v254_v38  ;;  %580 = vmatpush.msrb.mxu1 %v271_v39  ;;  %v638_v38 = vld [vmem:[%s902_s3 + $0x18] sm:$0xff] }
  0x7b   :  { %601 = vmatpush.msrb.mxu2 %v286_v40  ;;  %620 = vmatpush.msrb.mxu3 %v303_v41  ;;  %v637_v40 = vld [vmem:[%s902_s3 + $0x10] sm:$0xff] }
  0x7c   :  { %562 = vmatpush.msrb.mxu0 %v253_v42  ;;  %581 = vmatpush.msrb.mxu1 %v270_v43  ;;  %v636_v42 = vld [vmem:[%s902_s3 + $0x8] sm:$0xff] }
  0x7d   :  { %602 = vmatpush.msrb.mxu2 %v285_v44  ;;  %621 = vmatpush.msrb.mxu3 %v302_v45  ;;  %v635_v44 = vld [vmem:[%s902_s3] sm:$0xff] }
  0x7e   :  { %563 = vmatpush.msrb.mxu0 %v252_v46  ;;  %582 = vmatpush.msrb.mxu1 %v269_v47 }
  0x7f   :  { %603 = vmatpush.msrb.mxu2 %v284_v48  ;;  %622 = vmatpush.msrb.mxu3 %v301_v49 }
  0x80   :  { %564 = vmatpush.msrb.mxu0 %v251_v50  ;;  %583 = vmatpush.msrb.mxu1 %v268_v51 }
  0x81   :  { %604 = vmatpush.msrb.mxu2 %v283_v52  ;;  %623 = vmatpush.msrb.mxu3 %v300_v53 }
  0x82   :  { %565 = vmatpush.msrb.mxu0 %v250_v54  ;;  %584 = vmatpush.msrb.mxu1 %v267_v55 }
  0x83   :  { %605 = vmatpush.msrb.mxu2 %v282_v56  ;;  %624 = vmatpush.msrb.mxu3 %v299_v57 }
  0x84   :  { %566 = vmatpush.msrb.mxu0 %v249_v58  ;;  %585 = vmatpush.msrb.mxu1 %v266_v59 }
  0x85   :  { %606 = vmatpush.msrb.mxu2 %v281_v60  ;;  %625 = vmatpush.msrb.mxu3 %v298_v61 }
  0x86   :  { %567 = vmatpush.msrb.mxu0 %v248_v62  ;;  %586 = vmatpush.msrb.mxu1 %v265_v63 }
  0x87   :  { %607 = vmatpush.msrb.mxu2 %v280_v0  ;;  %626 = vmatpush.msrb.mxu3 %v297_v1 }
  0x88   :  { %568 = vmatpush.msrb.mxu0 %v247_v2  ;;  %587 = vmatpush.msrb.mxu1 %v264_v3  ;;  %v715_v2 = vld [vmem:[%s903_s4] ss:$0 sm:$0xff] }
  0x89   :  { %608 = vmatpush.msrb.mxu2 %v279_v4  ;;  %627 = vmatpush.msrb.mxu3 %v296_v5 }
  0x8a   :  { %569 = vmatpush.msrb.mxu0 %v246_v6  ;;  %588 = vmatpush.msrb.mxu1 %v263_v7 }
  0x8b   :  { %609 = vmatpush.msrb.mxu2 %v278_v8  ;;  %628 = vmatpush.msrb.mxu3 %v295_v9 }
  0x8c   :  { %570 = vmatmul.f32.vlgmr.msrb.gmra.mxu0 %v50_v10  ;;  %610 = vmatmul.f32.vlgmr.msrb.gmra.mxu2 %v52_v11 }
  0x8d   :  { %589 = vmatpush.msrb.mxu1 %v262_v12  ;;  %629 = vmatpush.msrb.mxu3 %v294_v13 }
  0x8e   :  { %590 = vmatmul.f32.vlgmr.msrb.gmra.mxu1 %v51_v14  ;;  %630 = vmatmul.f32.vlgmr.msrb.gmra.mxu3 %v53_v15 }
  0x8f   :  { %655 = vmatpush.msra.mxu0 %v650_v16 }
  0x91   :  { %656 = vmatpush.msra.mxu0 %v649_v17 }
  0x93   :  { %657 = vmatpush.msra.mxu0 %v648_v18 }
  0x95   :  { %658 = vmatpush.msra.mxu0 %v647_v19 }
  0x97   :  { %659 = vmatpush.msra.mxu0 %v646_v20 }
  0x99   :  { %660 = vmatpush.msra.mxu0 %v645_v21 }
  0x9b   :  { %661 = vmatpush.msra.mxu0 %v644_v22 }
  0x9d   :  { %662 = vmatpush.msra.mxu0 %v643_v25 }
  0x9f   :  { %663 = vmatpush.msra.mxu0 %v642_v26 }
  0xa1   :  { %664 = vmatpush.msra.mxu0 %v641_v32 }
  0xa3   :  { %665 = vmatpush.msra.mxu0 %v640_v34 }
  0xa5   :  { %666 = vmatpush.msra.mxu0 %v639_v36 }
  0xa7   :  { %667 = vmatpush.msra.mxu0 %v638_v38 }
  0xa9   :  { %668 = vmatpush.msra.mxu0 %v637_v40 }
  0xab   :  { %669 = vmatpush.msra.mxu0 %v636_v42 }
  0xad   :  { %670 = vmatpush.msra.mxu0 %v635_v44 }
  0xc3   :  { %v331_v24 = vpop.f32.mrf.mxu0 }
  0xc4   :  { %v332_v27 = vadd.f32 %v714_v23, %v331_v24 }
  0xc6   :  { %v351_v28 = vpop.f32.mrf.mxu1 }
  0xc7   :  { %v352_v29 = vadd.f32 %v351_v28, %v332_v27 }
  0xc9   :  { %v371_v30 = vpop.f32.mrf.mxu2 }
  0xca   :  { %v372_v31 = vadd.f32 %v371_v30, %v352_v29 }
  0xcc   :  { %v391_v33 = vpop.f32.mrf.mxu3 }
  0xcd   :  { %v392_v35 = vadd.f32 %v391_v33, %v372_v31 }
  0xcf   :  { %v411_v37 = vpop.f32.mrf.mxu0 }
  0xd0   :  { %v412_v39 = vadd.f32 %v411_v37, %v392_v35 }
  0xd2   :  { %v431_v41 = vpop.f32.mrf.mxu1 }
  0xd3   :  { %v432_v43 = vadd.f32 %v431_v41, %v412_v39  ;;  %v451_v45 = vpop.f32.mrf.mxu2 }
  0xd5   :  { %v452_v46 = vadd.f32 %v451_v45, %v432_v43 }
  0xd6   :  { %v471_v47 = vpop.f32.mrf.mxu3 }
  0xd7   :  { %v472_v49 = vadd.f32 %v471_v47, %v452_v46 }
  0xe7   :  { %v491_v48 = vpop.f32.mrf.mxu0 }
  0xe8   :  { %v492_v50 = vadd.f32 %v491_v48, %v472_v49 }
  0xea   :  { %v511_v51 = vpop.f32.mrf.mxu1 }
  0xeb   :  { %v512_v53 = vadd.f32 %v511_v51, %v492_v50 }
  0xed   :  { %v531_v52 = vpop.f32.mrf.mxu2 }
  0xee   :  { %v532_v54 = vadd.f32 %v531_v52, %v512_v53 }
  0xf0   :  { %v551_v55 = vpop.f32.mrf.mxu3 }
  0xf1   :  { %v552_v56 = vadd.f32 %v551_v55, %v532_v54 }
 0x109   :  { %v571_v57 = vpop.f32.mrf.mxu0 }
 0x10a   :  { %v572_v58 = vadd.f32 %v571_v57, %v552_v56 }
 0x10b   :  { %v591_v59 = vpop.f32.mrf.mxu1 }
 0x10c   :  { %v592_v60 = vadd.f32 %v591_v59, %v572_v58 }
 0x10f   :  { %v611_v61 = vpop.f32.mrf.mxu2 }
 0x110   :  { %v612_v62 = vadd.f32 %v611_v61, %v592_v60 }
 0x111   :  { %v631_v63 = vpop.f32.mrf.mxu3 }
 0x112   :  { %v632_v0 = vadd.f32 %v631_v63, %v612_v62 }
 0x114   :  { %v634_v1 = vmax.f32 %v632_v0, 0.0 }
 0x116   :  { %671 = vmatmul.f32.vlgmr.msra.gmra.mxu0 %v634_v1 }
 0x193   :  { %v672_v3 = vpop.f32.mrf.mxu0 }
 0x194   :  { %v673_v4 = vadd.f32 %v715_v2, %v672_v3 }
 0x196   :  { %v677_v5 = vsel %vm675_vm0, %v673_v4, -inf  ;;  %676 = vst.msk [vmem:[%s904_s5] sm:$0xff] %vm675_vm0, %v673_v4 }
 0x197   :  { %678 = vmax.xlane.f32.xlu0 %v677_v5 }
 0x20a   :  { %v679_v6 = vpop.xlane.xlu0 %678 }
 0x20b   :  { %v680_v7 = vsub.f32 %v673_v4, %v679_v6 }
 0x20d   :  { %v681_v8 = vmul.f32 1.442695, %v680_v7 }
 0x20f   :  { %716 = vpow2.f32 %v681_v8 }
 0x215   :  { %v717_v9 = vpop.eup %716 }
 0x216   :  { %v683_v10 = vsel %vm675_vm0, %v717_v9, 0.0 }
 0x217   :  { %684 = vadd.xlane.f32.xlu0 %v683_v10 }
 0x28a   :  { %v685_v11 = vpop.xlane.xlu0 %684 }
 0x28b   :  { %718 = vrcp.f32 %v685_v11  ;;  %v697_v15 = vand.u32 2147483648, %v685_v11  ;;  %v695_v17 = vand.u32 2147483647, %v685_v11  ;;  %vm691_vm2 = vweird.f32 %v685_v11 }
 0x28d   :  { %v698_v19 = vor.u32 1.1754944e-38, %v697_v15  ;;  %vm696_vm4 = vcmp.eq.f32.partialorder %v695_v17, 8.507059e+37 }
 0x291   :  { %v719_v12 = vpop.eup %718 }
 0x292   :  { %v687_v13 = vmul.f32 %v719_v12, %v685_v11  ;;  %vm692_vm1 = vweird.f32 %v719_v12 }
 0x293   :  { %vm693_vm3 = vmor %vm691_vm2, %vm692_vm1 }
 0x294   :  { %v688_v14 = vsub.f32 1.0, %v687_v13 }
 0x296   :  { %v689_v16 = vmul.f32 %v719_v12, %v688_v14 }
 0x298   :  { %v690_v18 = vadd.f32 %v719_v12, %v689_v16 }
 0x29a   :  { %v694_v20 = vsel %vm693_vm3, %v719_v12, %v690_v18 }
 0x29b   :  { %v699_v21 = vsel %vm696_vm4, %v698_v19, %v694_v20 }
 0x29c   :  { %v700_v22 = vmul.f32 %v717_v9, %v699_v21 }
 0x29e   :  { %701 = vst.msk [vmem:[%s905_s6] sm:$0xff] %vm675_vm0, %v700_v22 }
 0x29f   :  { %710 = vsyncpa [#allocation3], 1 }

// kernel: model_forward.11
= control target key start
LH: loop header
LB: loop body
LE: loop exit
PB: predicated region body
PF: predicated region fallthrough
CT: control target
= control target key end

     0   :  { %s3960_s25 = smov 0   ;;  %s5532_s0 = inlined_call_operand.vmem [shape: f32[8,16,128], index: 0, kind: input, shape index: {}]   ;;  %s5533_s1 = inlined_call_operand.vmem [shape: f32[128,384], index: 1, kind: input, shape index: {}]   ;;  %s5534_s2 = inlined_call_operand.vmem [shape: f32[1,384], index: 2, kind: input, shape index: {}]   ;;  %s5535_s3 = inlined_call_operand.vmem [shape: f32[128,128], index: 3, kind: input, shape index: {}]   ;;  %s5536_s4 = inlined_call_operand.vmem [shape: f32[1,128], index: 4, kind: input, shape index: {}]   ;;  %s5537_s5 = inlined_call_operand.vmem [shape: f32[1,128], index: 5, kind: input, shape index: {}]   ;;  %s5538_s6 = inlined_call_operand.vmem [shape: f32[1,128], index: 6, kind: input, shape index: {}]   ;;  %s5539_s7 = inlined_call_operand.vmem [shape: f32[128,256], index: 7, kind: input, shape index: {}]   ;;  %s5540_s8 = inlined_call_operand.vmem [shape: f32[1,256], index: 8, kind: input, shape index: {}]   ;;  %s5541_s9 = inlined_call_operand.vmem [shape: f32[256,128], index: 9, kind: input, shape index: {}]   ;;  %s5542_s10 = inlined_call_operand.vmem [shape: f32[1,128], index: 10, kind: input, shape index: {}]   ;;  %s5543_s11 = inlined_call_operand.vmem [shape: f32[1,128], index: 11, kind: input, shape index: {}]   ;;  %s5544_s12 = inlined_call_operand.vmem [shape: f32[1,128], index: 12, kind: input, shape index: {}]   ;;  %s5545_s13 = inlined_call_operand.vmem [shape: f32[8,16,128], index: 13, kind: output, shape index: {}]  }
   0x1 LB: > { %s3469_s26 = sadd.s32 4294967295, %s3883_s25   ;;  %p3473_p0 = scmp.ge.s32.totalorder %s3883_s25, 1  ;;  %s3883_s25 = sphi %s3960_s25, %s23_s25  }
   0x2   : > { %p389_p1 = scmp.lt.s32.totalorder %s3883_s25, 3 }
   0x4   : > { %p390_p2 = pnand %p3473_p0, %p389_p1 }
   0x5   : > { %s3474_s27 = sshll.u32 (!%p390_p2), %s3469_s26, 2  ;;  %s3885_s21 = smov (!%p390_p2), 96  }
   0x6   : > { %393 = sbr.rel (%p390_p2) target bundleno = 3136 (0xc40), region = 72  ;;  %p436_p3 = scmp.lt.s32.totalorder (!%p390_p2), %s3474_s27, 7 }
   0x7   : > { %s3887_s18 = smov (!%p390_p2), 64   ;;  %s3888_s26 = smov (!%p390_p2), 32  }
   0xb   : > { %v503_v0 = vld [vmem:[%s5533_s1 + $0x170] sm:$0xff]  ;;  %v500_v1 = vld [vmem:[%s5533_s1 + $0x158] sm:$0xff]  ;;  %v497_v2 = vld [vmem:[%s5533_s1 + $0x140] sm:$0xff]  ;;  %s5547_s27 = smov (!%p436_p3, %s3474_s27), 7  ;;  %vm653_vm0 = vcmask 261120   ;;  %vm794_vm3 = vcmask 130048  }
   0xc   : > { %554 = vmatpush.msra.mxu1 %v503_v0  ;;  %v502_v3 = vld [vmem:[%s5533_s1 + $0x168] sm:$0xff]  ;;  %v499_v4 = vld [vmem:[%s5533_s1 + $0x150] sm:$0xff]  ;;  %v496_v6 = vld [vmem:[%s5533_s1 + $0x138] sm:$0xff]  ;;  %s3578_s16 = sshll.u32 %s5547_s27, 4 }
   0xd   : > { %513 = vmatpush.msra.mxu0 %v502_v3  ;;  %v494_v5 = vld [vmem:[%s5533_s1 + $0x128] sm:$0xff]  ;;  %v491_v7 = vld [vmem:[%s5533_s1 + $0x110] sm:$0xff]  ;;  %v493_v8 = vld [vmem:[%s5533_s1 + $0x120] sm:$0xff]  ;;  %s4062_s24 = scalar_lea.vmem %s5532_s0, %s3578_s16  ;;  %s5491_s23 = scalar_lea.vmem %s5545_s13, %s3578_s16 }
   0xe   : > { %555 = vmatpush.msra.mxu1 %v500_v1  ;;  %v488_v9 = vld [vmem:[%s5533_s1 + $0xf8] sm:$0xff]  ;;  %v490_v10 = vld [vmem:[%s5533_s1 + $0x108] sm:$0xff]  ;;  %v485_v11 = vld [vmem:[%s5533_s1 + $0xe0] sm:$0xff] }
   0xf   : > { %514 = vmatpush.msra.mxu0 %v499_v4  ;;  %v487_v12 = vld [vmem:[%s5533_s1 + $0xf0] sm:$0xff]  ;;  %v482_v13 = vld [vmem:[%s5533_s1 + $0xc8] sm:$0xff]  ;;  %v484_v14 = vld [vmem:[%s5533_s1 + $0xd8] sm:$0xff] }
  0x10   : > { %556 = vmatpush.msra.mxu1 %v497_v2  ;;  %v479_v15 = vld [vmem:[%s5533_s1 + $0xb0] sm:$0xff]  ;;  %v481_v16 = vld [vmem:[%s5533_s1 + $0xc0] sm:$0xff]  ;;  %v476_v17 = vld [vmem:[%s5533_s1 + $0x98] sm:$0xff] }
  0x11   : > { %515 = vmatpush.msra.mxu0 %v496_v6  ;;  %v478_v18 = vld [vmem:[%s5533_s1 + $0xa8] sm:$0xff]  ;;  %v473_v19 = vld [vmem:[%s5533_s1 + $0x80] sm:$0xff]  ;;  %v475_v20 = vld [vmem:[%s5533_s1 + $0x90] sm:$0xff] }
  0x12   : > { %557 = vmatpush.msra.mxu1 %v494_v5  ;;  %v470_v21 = vld [vmem:[%s5533_s1 + $0x68] sm:$0xff]  ;;  %v472_v22 = vld [vmem:[%s5533_s1 + $0x78] sm:$0xff]  ;;  %v467_v23 = vld [vmem:[%s5533_s1 + $0x50] sm:$0xff] }
  0x13   : > { %516 = vmatpush.msra.mxu0 %v493_v8  ;;  %v469_v24 = vld [vmem:[%s5533_s1 + $0x60] sm:$0xff]  ;;  %v464_v25 = vld [vmem:[%s5533_s1 + $0x38] sm:$0xff]  ;;  %v466_v26 = vld [vmem:[%s5533_s1 + $0x48] sm:$0xff] }
  0x14   : > { %558 = vmatpush.msra.mxu1 %v491_v7  ;;  %v461_v27 = vld [vmem:[%s5533_s1 + $0x20] sm:$0xff]  ;;  %v463_v28 = vld [vmem:[%s5533_s1 + $0x30] sm:$0xff]  ;;  %v458_v29 = vld [vmem:[%s5533_s1 + $0x8] sm:$0xff] }
  0x15   : > { %517 = vmatpush.msra.mxu0 %v490_v10  ;;  %v460_v30 = vld [vmem:[%s5533_s1 + $0x18] sm:$0xff]  ;;  %v4074_v31 = vld [vmem:[%s4062_s24] sm:$0xff]  ;;  %v4082_v33 = vld [vmem:[%s4062_s24 + $0x8] sm:$0xff] }
  0x16   : > { %559 = vmatpush.msra.mxu1 %v488_v9  ;;  %v457_v32 = vld [vmem:[%s5533_s1] sm:$0xff]  ;;  %v4087_v34 = vld [vmem:[%s4062_s24 + $0x10] sm:$0xff]  ;;  %v4092_v35 = vld [vmem:[%s4062_s24 + $0x18] sm:$0xff] }
  0x17   : > { %518 = vmatpush.msra.mxu0 %v487_v12  ;;  %v4097_v36 = vld [vmem:[%s4062_s24 + $0x20] sm:$0xff]  ;;  %v4102_v37 = vld [vmem:[%s4062_s24 + $0x28] sm:$0xff]  ;;  %v4107_v38 = vld [vmem:[%s4062_s24 + $0x30] sm:$0xff] }
  0x18   : > { %560 = vmatpush.msra.mxu1 %v485_v11  ;;  %v4112_v39 = vld [vmem:[%s4062_s24 + $0x38] sm:$0xff]  ;;  %v4119_v40 = vld [vmem:[%s5534_s2] sm:$0x7]  ;;  %v498_v53 = vld [vmem:[%s5533_s1 + $0x148] sm:$0xff] }
  0x19   : > { %519 = vmatpush.msra.mxu0 %v484_v14  ;;  %v4122_v41 = vperm.slane %v4119_v40, 1  ;;  %v4125_v42 = vperm.slane %v4119_v40, 0  ;;  %v504_v48 = vld [vmem:[%s5533_s1 + $0x178] sm:$0xff]  ;;  %v501_v50 = vld [vmem:[%s5533_s1 + $0x160] sm:$0xff]  ;;  %v495_v55 = vld [vmem:[%s5533_s1 + $0x130] sm:$0xff] }
  0x1a   : > { %561 = vmatpush.msra.mxu1 %v482_v13  ;;  %595 = vmatpush.msra.mxu2 %v504_v48  ;;  %v492_v56 = vld [vmem:[%s5533_s1 + $0x118] sm:$0xff]  ;;  %v489_v59 = vld [vmem:[%s5533_s1 + $0x100] sm:$0xff]  ;;  %v486_v62 = vld [vmem:[%s5533_s1 + $0xe8] sm:$0xff] }
  0x1b   : > { %520 = vmatpush.msra.mxu0 %v481_v16  ;;  %v483_v0 = vld [vmem:[%s5533_s1 + $0xd0] sm:$0xff]  ;;  %v480_v1 = vld [vmem:[%s5533_s1 + $0xb8] sm:$0xff]  ;;  %v477_v4 = vld [vmem:[%s5533_s1 + $0xa0] sm:$0xff] }
  0x1c   : > { %562 = vmatpush.msra.mxu1 %v479_v15  ;;  %596 = vmatpush.msra.mxu2 %v501_v50  ;;  %v474_v7 = vld [vmem:[%s5533_s1 + $0x88] sm:$0xff]  ;;  %v471_v8 = vld [vmem:[%s5533_s1 + $0x70] sm:$0xff]  ;;  %v468_v9 = vld [vmem:[%s5533_s1 + $0x58] sm:$0xff] }
  0x1d   : > { %521 = vmatpush.msra.mxu0 %v478_v18  ;;  %v465_v11 = vld [vmem:[%s5533_s1 + $0x40] sm:$0xff]  ;;  %v462_v15 = vld [vmem:[%s5533_s1 + $0x28] sm:$0xff]  ;;  %v459_v16 = vld [vmem:[%s5533_s1 + $0x10] sm:$0xff] }
  0x1e   : > { %563 = vmatpush.msra.mxu1 %v476_v17  ;;  %597 = vmatpush.msra.mxu2 %v498_v53 }
  0x1f   : > { %522 = vmatpush.msra.mxu0 %v475_v20 }
  0x20   : > { %564 = vmatpush.msra.mxu1 %v473_v19  ;;  %598 = vmatpush.msra.mxu2 %v495_v55 }
  0x21   : > { %523 = vmatpush.msra.mxu0 %v472_v22 }
  0x22   : > { %565 = vmatpush.msra.mxu1 %v470_v21  ;;  %599 = vmatpush.msra.mxu2 %v492_v56 }
  0x23   : > { %524 = vmatpush.msra.mxu0 %v469_v24 }
  0x24   : > { %566 = vmatpush.msra.mxu1 %v467_v23  ;;  %600 = vmatpush.msra.mxu2 %v489_v59 }
  0x25   : > { %525 = vmatpush.msra.mxu0 %v466_v26 }
  0x26   : > { %567 = vmatpush.msra.mxu1 %v464_v25  ;;  %601 = vmatpush.msra.mxu2 %v486_v62 }
  0x27   : > { %526 = vmatpush.msra.mxu0 %v463_v28 }
  0x28   : > { %568 = vmatpush.msra.mxu1 %v461_v27  ;;  %602 = vmatpush.msra.mxu2 %v483_v0 }
  0x29   : > { %527 = vmatpush.msra.mxu0 %v460_v30 }
  0x2a   : > { %569 = vmatpush.msra.mxu1 %v458_v29  ;;  %603 = vmatpush.msra.mxu2 %v480_v1 }
  0x2b   : > { %570 = vmatmul.f32.vlgmr.msra.gmra.mxu1 %v4074_v31  ;;  %528 = vmatpush.msra.mxu0 %v457_v32 }
  0x2c   : > { %529 = vmatmul.f32.vlgmr.msra.gmra.mxu0 %v4074_v31  ;;  %604 = vmatpush.msra.mxu2 %v477_v4 }
  0x2e   : > { %605 = vmatpush.msra.mxu2 %v474_v7 }
  0x30   : > { %606 = vmatpush.msra.mxu2 %v471_v8 }
  0x32   : > { %607 = vmatpush.msra.mxu2 %v468_v9 }
  0x33   : > { %573 = vmatmul.f32.gmra.mxu1 %v4082_v33 }
  0x34   : > { %532 = vmatmul.f32.gmra.mxu0 %v4082_v33  ;;  %608 = vmatpush.msra.mxu2 %v465_v11 }
  0x36   : > { %609 = vmatpush.msra.mxu2 %v462_v15 }
  0x38   : > { %610 = vmatpush.msra.mxu2 %v459_v16 }
  0x39   : > { %611 = vmatmul.f32.vlgmr.msra.gmra.mxu2 %v4074_v31 }
  0x3b   : > { %576 = vmatmul.f32.gmra.mxu1 %v4087_v34 }
  0x3c   : > { %535 = vmatmul.f32.gmra.mxu0 %v4087_v34 }
  0x41   : > { %614 = vmatmul.f32.gmra.mxu2 %v4082_v33 }
  0x43   : > { %579 = vmatmul.f32.gmra.mxu1 %v4092_v35 }
  0x44   : > { %538 = vmatmul.f32.gmra.mxu0 %v4092_v35 }
  0x49   : > { %617 = vmatmul.f32.gmra.mxu2 %v4087_v34 }
  0x4b   : > { %582 = vmatmul.f32.gmra.mxu1 %v4097_v36 }
  0x4c   : > { %541 = vmatmul.f32.gmra.mxu0 %v4097_v36 }
  0x51   : > { %620 = vmatmul.f32.gmra.mxu2 %v4092_v35 }
  0x53   : > { %585 = vmatmul.f32.gmra.mxu1 %v4102_v37 }
  0x54   : > { %544 = vmatmul.f32.gmra.mxu0 %v4102_v37 }
  0x59   : > { %623 = vmatmul.f32.gmra.mxu2 %v4097_v36 }
  0x5b   : > { %588 = vmatmul.f32.gmra.mxu1 %v4107_v38 }
  0x5c   : > { %547 = vmatmul.f32.gmra.mxu0 %v4107_v38 }
  0x61   : > { %626 = vmatmul.f32.gmra.mxu2 %v4102_v37  ;;  %v3886_v37 = vmov -1e+30  }
  0x63   : > { %591 = vmatmul.f32.gmra.mxu1 %v4112_v39 }
  0x64   : > { %550 = vmatmul.f32.gmra.mxu0 %v4112_v39 }
  0x69   : > { %629 = vmatmul.f32.gmra.mxu2 %v4107_v38 }
  0x71   : > { %632 = vmatmul.f32.gmra.mxu2 %v4112_v39 }
  0xa8   : > { %v571_v43 = vpop.f32.mrf.mxu1 }
  0xa9   : > { %v4128_v44 = vadd.f32 %v571_v43, %v4122_v41  ;;  %v530_v45 = vpop.f32.mrf.mxu0 }
  0xaa   : > { %v531_v46 = vadd.f32 %v530_v45, %v4125_v42 }
  0xab   : > { %1107 = vrot.lane.b32.xlu1 %v4128_v44, %s3885_s21 }
  0xac   : > { %v4133_v47 = vmul.f32 0.17677669, %v531_v46 }
  0xae   : > { %1103 = vrot.lane.b32.xlu2 %v4133_v47, %s3885_s21 }
  0xb0   : > { %v574_v49 = vpop.f32.mrf.mxu1 }
  0xb1   : > { %v4144_v51 = vadd.f32 %v574_v49, %v4122_v41  ;;  %v533_v52 = vpop.f32.mrf.mxu0 }
  0xb2   : > { %v534_v54 = vadd.f32 %v533_v52, %v4125_v42 }
  0xb3   : > { %1109 = vrot.lane.b32.xlu0 %v4144_v51, %s3885_s21  ;;  %3480 = vmatpush.xpose.msk.msrb.mxu0 %vm653_vm0, %v4144_v51 }
  0xb4   : > { %3580 = vmatpush.xpose.msk.msrb.mxu1 %vm653_vm0, %v4144_v51  ;;  %v4164_v57 = vmul.f32 0.17677669, %v534_v54 }
  0xb7   : > { %3481 = vmatpush.xpose.msk.msrb.mxu0 %vm653_vm0, %v4128_v44 }
  0xb8   : > { %3581 = vmatpush.xpose.msk.msrb.mxu1 %vm653_vm0, %v4128_v44  ;;  %v577_v58 = vpop.f32.mrf.mxu1 }
  0xb9   : > { %v4172_v60 = vadd.f32 %v577_v58, %v4122_v41  ;;  %v536_v61 = vpop.f32.mrf.mxu0 }
  0xba   : > { %3482 = vmatmul.msk.f32.vlgmr.msrb.gmra.mxu0 %vm653_vm0, %v4133_v47  ;;  %v537_v63 = vadd.f32 %v536_v61, %v4125_v42 }
  0xbb   : > { %3483 = vmatmul.msk.f32.vlgmr.msrb.gmra.mxu1 %vm653_vm0, %v4164_v57  ;;  %1146 = vrot.lane.b32.xlu1 %v4172_v60, %s3885_s21 }
  0xbc   : > { %1105 = vrot.lane.b32.xlu0 %v4164_v57, %s3885_s21  ;;  %v4192_v3 = vmul.f32 0.17677669, %v537_v63  ;;  %v612_v61 = vpop.f32.mrf.mxu2 }
  0xc0   : > { %v580_v2 = vpop.f32.mrf.mxu1 }
  0xc1   : > { %v4198_v5 = vadd.f32 %v580_v2, %v4122_v41  ;;  %v539_v6 = vpop.f32.mrf.mxu0 }
  0xc2   : > { %v540_v13 = vadd.f32 %v539_v6, %v4125_v42  ;;  %v509_v6 = vperm.slane %v4119_v40, 2 }
  0xc3   : > { %3484 = vmatpush.xpose.msk.msra.mxu3 %vm653_vm0, %v4198_v5  ;;  %1148 = vrot.lane.b32.xlu2 %v4198_v5, %s3885_s21 }
  0xc4   : > { %1142 = vrot.lane.b32.xlu0 %v4192_v3, %s3885_s21  ;;  %v4234_v17 = vmul.f32 0.17677669, %v540_v13  ;;  %v615_v1 = vpop.f32.mrf.mxu2  ;;  %v4313_v8 = vadd.f32 %v612_v61, %v509_v6 }
  0xc5   : > { %v4315_v9 = vadd.f32 %v615_v1, %v509_v6 }
  0xc7   : > { %3485 = vmatpush.xpose.msk.msra.mxu3 %vm653_vm0, %v4172_v60 }
  0xc8   : > { %v583_v10 = vpop.f32.mrf.mxu1 }
  0xc9   : > { %v4221_v12 = vadd.f32 %v583_v10, %v4122_v41  ;;  %v542_v14 = vpop.f32.mrf.mxu0 }
  0xca   : > { %3486 = vmatmul.msk.f32.vlgmr.msra.gmra.mxu3 %vm653_vm0, %v4192_v3  ;;  %v543_v20 = vadd.f32 %v542_v14, %v4125_v42 }
  0xcb   : > { %1185 = vrot.lane.b32.xlu2 %v4221_v12, %s3885_s21 }
  0xcc   : > { %v4245_v22 = vmul.f32 0.17677669, %v543_v20  ;;  %v618_v10 = vpop.f32.mrf.mxu2 }
  0xcd   : > { %v4319_v14 = vadd.f32 %v618_v10, %v509_v6 }
  0xd0   : > { %v586_v18 = vpop.f32.mrf.mxu1 }
  0xd1   : > { %v4238_v19 = vadd.f32 %v586_v18, %v4122_v41  ;;  %v545_v21 = vpop.f32.mrf.mxu0 }
  0xd2   : > { %3487 = vmatmul.msk.f32.gmra.mxu3 %vm653_vm0, %v4234_v17  ;;  %v546_v24 = vadd.f32 %v545_v21, %v4125_v42 }
  0xd3   : > { %3488 = vmatpush.xpose.msk.msrb.mxu3 %vm653_vm0, %v4238_v19 }
  0xd4   : > { %v4253_v26 = vmul.f32 0.17677669, %v546_v24  ;;  %v621_v13 = vpop.f32.mrf.mxu2 }
  0xd5   : > { %v4321_v15 = vadd.f32 %v621_v13, %v509_v6 }
  0xd7   : > { %3489 = vmatpush.xpose.msk.msrb.mxu3 %vm653_vm0, %v4221_v12 }
  0xd8   : > { %v589_v23 = vpop.f32.mrf.mxu1 }
  0xd9   : > { %v548_v25 = vpop.f32.mrf.mxu0  ;;  %v4263_v30 = vadd.f32 %v589_v23, %v4122_v41 }
  0xda   : > { %3490 = vmatmul.msk.f32.vlgmr.msrb.gmra.mxu3 %vm653_vm0, %v4245_v22  ;;  %v549_v29 = vadd.f32 %v548_v25, %v4125_v42 }
  0xdc   : > { %v4267_v31 = vmul.f32 0.17677669, %v549_v29  ;;  %v624_v16 = vpop.f32.mrf.mxu2 }
  0xdd   : > { %v4335_v25 = vadd.f32 %v624_v16, %v509_v6 }
  0xe0   : > { %v592_v27 = vpop.f32.mrf.mxu1 }
  0xe1   : > { %v4257_v28 = vadd.f32 %v592_v27, %v4122_v41  ;;  %v551_v32 = vpop.f32.mrf.mxu0 }
  0xe2   : > { %3491 = vmatmul.msk.f32.gmra.mxu3 %vm653_vm0, %v4253_v26  ;;  %v552_v33 = vadd.f32 %v551_v32, %v4125_v42  ;;  %v636_v42 = vlaneseq }
  0xe3   : > { %3492 = vmatpush.xpose.msk.msra.mxu3 %vm653_vm0, %v4257_v28 }
  0xe4   : > { %v4275_v34 = vmul.f32 0.17677669, %v552_v33  ;;  %v637_v36 = vshrl.u32 %v636_v42, 7  ;;  %v640_v45 = vand.u32 127, %v636_v42  ;;  %v627_v24 = vpop.f32.mrf.mxu2 }
  0xe5   : > { %v4337_v27 = vadd.f32 %v627_v24, %v509_v6 }
  0xe6   : > { %vm641_vm1 = vcmp.le.s32.totalorder %v640_v45, %v637_v36  ;;  %v638_v46 = vadd.s32 8, %v637_v36 }
  0xe7   : > { %3493 = vmatpush.xpose.msk.msra.mxu3 %vm653_vm0, %v4263_v30  ;;  %v4286_v49 = vsel %vm641_vm1, 0.0, %v3886_v37  ;;  %1065 = vmatpush.msra.mxu0 %v4337_v27 }
  0xe8   : > { %vm642_vm2 = vcmp.le.s32.totalorder %v640_v45, %v638_v46 }
  0xe9   : > { %v4290_v50 = vsel %vm642_vm2, 0.0, %v3886_v37  ;;  %1066 = vmatpush.msra.mxu0 %v4335_v25 }
  0xea   : > { %3494 = vmatmul.msk.f32.vlgmr.msra.gmra.mxu3 %vm653_vm0, %v4267_v31 }
  0xeb   : > { %1007 = vmatpush.msrb.mxu3 %v4315_v9 }
  0xec   : > { %v630_v32 = vpop.f32.mrf.mxu2 }
  0xed   : > { %1008 = vmatpush.msrb.mxu3 %v4313_v8  ;;  %v4345_v42 = vadd.f32 %v630_v32, %v509_v6 }
  0xef   : > { %1036 = vmatpush.msra.mxu3 %v4321_v15 }
  0xf1   : > { %1037 = vmatpush.msra.mxu3 %v4319_v14 }
  0xf2   : > { %3495 = vmatmul.msk.f32.gmra.mxu3 %vm653_vm0, %v4275_v34 }
 0x108   : > { %v1104_v43 = vpop.permute.xlu2 %1103 }
 0x11d   : > { %v1108_v35 = vpop.permute.xlu1 %1107 }
 0x125   : > { %v1110_v41 = vpop.permute.xlu0 %1109 }
 0x126   : > { %3504 = vmatpush.xpose.msk.msrb.mxu2 %vm653_vm0, %v1110_v41 }
 0x12a   : > { %3505 = vmatpush.xpose.msk.msrb.mxu2 %vm653_vm0, %v1108_v35  ;;  %v633_v35 = vpop.f32.mrf.mxu2 }
 0x12d   : > { %3506 = vmatmul.msk.f32.vlgmr.msrb.gmra.mxu2 %vm653_vm0, %v1104_v43  ;;  %v4347_v43 = vadd.f32 %v633_v35, %v509_v6 }
 0x12e   : > { %v1106_v48 = vpop.permute.xlu0 %1105 }
 0x12f   : > { %1094 = vmatpush.msra.mxu1 %v4347_v43 }
 0x131   : > { %1095 = vmatpush.msra.mxu1 %v4345_v42 }
 0x135   : > { %3507 = vmatmul.msk.f32.gmra.mxu2 %vm653_vm0, %v1106_v48 }
 0x136   : > { %v4351_v36 = vpop.permute.xlu0 %1142 }
 0x137   : > { %v683_v38 = vpop.f32.mrf.mxu0 }
 0x138   : > { %v684_v39 = vadd.f32 %v683_v38, %v4286_v49  ;;  %v686_v52 = vpop.f32.mrf.mxu1 }
 0x139   : > { %v687_v54 = vadd.f32 %v686_v52, %v4290_v50 }
 0x13a   : > { %v795_v53 = vsel %vm794_vm3, %v684_v39, -inf }
 0x13b   : > { %796 = vmax.xlane.f32.xlu0 %v795_v53  ;;  %v798_v55 = vsel %vm794_vm3, %v687_v54, -inf }
 0x143   : > { %799 = vmax.xlane.f32.xlu0 %v798_v55 }
 0x14d   : > { %v718_v56 = vpop.f32.mrf.mxu3 }
 0x14e   : > { %v4296_v58 = vadd.f32 %v718_v56, %v4286_v49  ;;  %v4357_v56 = vpop.permute.xlu1 %1146 }
 0x150   : > { %v801_v59 = vsel %vm794_vm3, %v4296_v58, -inf }
 0x151   : > { %802 = vmax.xlane.f32.xlu1 %v801_v59 }
 0x155   : > { %v721_v62 = vpop.f32.mrf.mxu3 }
 0x156   : > { %v4301_v63 = vadd.f32 %v721_v62, %v4290_v50 }
 0x157   : > { %1187 = vrot.lane.b32.xlu0 %v4238_v19, %s3885_s21 }
 0x158   : > { %v804_v0 = vsel %vm794_vm3, %v4301_v63, -inf }
 0x159   : > { %805 = vmax.xlane.f32.xlu1 %v804_v0 }
 0x15d   : > { %v753_v2 = vpop.f32.mrf.mxu3 }
 0x15e   : > { %v4308_v4 = vadd.f32 %v753_v2, %v4286_v49 }
 0x160   : > { %v807_v7 = vsel %vm794_vm3, %v4308_v4, -inf }
 0x161   : > { %808 = vmax.xlane.f32.xlu2 %v807_v7 }
 0x165   : > { %v756_v11 = vpop.f32.mrf.mxu3 }
 0x166   : > { %v757_v33 = vadd.f32 %v756_v11, %v4290_v50 }
 0x168   : > { %v810_v41 = vsel %vm794_vm3, %v757_v33, -inf }
 0x16d   : > { %v788_v40 = vpop.f32.mrf.mxu3 }
 0x16e   : > { %v4333_v23 = vadd.f32 %v788_v40, %v4286_v49 }
 0x170   : > { %v813_v29 = vsel %vm794_vm3, %v4333_v23, -inf }
 0x172   : > { %1144 = vrot.lane.b32.xlu1 %v4234_v17, %s3885_s21 }
 0x175   : > { %v791_v18 = vpop.f32.mrf.mxu3 }
 0x176   : > { %v4328_v20 = vadd.f32 %v791_v18, %v4290_v50 }
 0x178   : > { %v816_v21 = vsel %vm794_vm3, %v4328_v20, -inf }
 0x179   : > { %817 = vmax.xlane.f32.xlu2 %v816_v21 }
 0x181   : > { %814 = vmax.xlane.f32.xlu0 %v813_v29 }
 0x19c   : > { %811 = vmax.xlane.f32.xlu1 %v810_v41 }
 0x1ae   : > { %v797_v45 = vpop.xlane.xlu0 %796 }
 0x1af   : > { %v819_v46 = vsub.f32 %v684_v39, %v797_v45  ;;  %v4363_v39 = vpop.permute.xlu2 %1148 }
 0x1b1   : > { %v827_v48 = vmul.f32 1.442695, %v819_v46 }
 0x1b3   : > { %3707 = vpow2.f32 %v827_v48 }
 0x1b6   : > { %v800_v37 = vpop.xlane.xlu0 %799 }
 0x1b7   : > { %v820_v38 = vsub.f32 %v687_v54, %v800_v37  ;;  %v1186_v2 = vpop.permute.xlu2 %1185 }
 0x1b9   : > { %v4353_v52 = vpop.eup %3707  ;;  %v829_v53 = vmul.f32 1.442695, %v820_v38 }
 0x1ba   : > { %v843_v55 = vsel %vm794_vm3, %v4353_v52, 0.0 }
 0x1bb   : > { %3709 = vpow2.f32 %v829_v53  ;;  %844 = vadd.xlane.f32.xlu2 %v843_v55 }
 0x1c1   : > { %v4359_v59 = vpop.eup %3709 }
 0x1c2   : > { %v846_v61 = vsel %vm794_vm3, %v4359_v59, 0.0 }
 0x1c3   : > { %847 = vadd.xlane.f32.xlu0 %v846_v61 }
 0x1c4   : > { %v803_v62 = vpop.xlane.xlu1 %802 }
 0x1c5   : > { %v821_v54 = vsub.f32 %v4296_v58, %v803_v62 }
 0x1c7   : > { %v831_v0 = vmul.f32 1.442695, %v821_v54 }
 0x1c9   : > { %3711 = vpow2.f32 %v831_v0  ;;  %v1188_v1 = vpop.permute.xlu0 %1187 }
 0x1ca   : > { %3512 = vmatpush.xpose.msk.msrb.mxu0 %vm653_vm0, %v1188_v1 }
 0x1cc   : > { %v806_v6 = vpop.xlane.xlu1 %805 }
 0x1cd   : > { %v822_v7 = vsub.f32 %v4301_v63, %v806_v6 }
 0x1ce   : > { %3513 = vmatpush.xpose.msk.msrb.mxu0 %vm653_vm0, %v1186_v2 }
 0x1cf   : > { %v4369_v10 = vpop.eup %3711  ;;  %v833_v11 = vmul.f32 1.442695, %v822_v7 }
 0x1d0   : > { %v849_v13 = vsel %vm794_vm3, %v4369_v10, 0.0 }
 0x1d1   : > { %3713 = vpow2.f32 %v833_v11  ;;  %850 = vadd.xlane.f32.xlu2 %v849_v13 }
 0x1d4   : > { %v809_v58 = vpop.xlane.xlu2 %808 }
 0x1d5   : > { %v823_v40 = vsub.f32 %v4308_v4, %v809_v58 }
 0x1d7   : > { %v4374_v16 = vpop.eup %3713  ;;  %v835_v18 = vmul.f32 1.442695, %v823_v40  ;;  %1183 = vrot.lane.b32.xlu0 %v4253_v26, %s3885_s21 }
 0x1d8   : > { %v852_v63 = vsel %vm794_vm3, %v4374_v16, 0.0 }
 0x1d9   : > { %3715 = vpow2.f32 %v835_v18  ;;  %853 = vadd.xlane.f32.xlu1 %v852_v63 }
 0x1df   : > { %v4380_v21 = vpop.eup %3715 }
 0x1e0   : > { %v855_v24 = vsel %vm794_vm3, %v4380_v21, 0.0 }
 0x1e1   : > { %856 = vadd.xlane.f32.xlu2 %v855_v24 }
 0x1e4   : > { %v4388_v4 = vpop.permute.xlu1 %1144 }
 0x1ec   : > { %v818_v41 = vpop.xlane.xlu2 %817 }
 0x1ed   : > { %v826_v46 = vsub.f32 %v4328_v20, %v818_v41 }
 0x1ef   : > { %v841_v38 = vmul.f32 1.442695, %v826_v46 }
 0x1f2   : > { %1181 = vrot.lane.b32.xlu1 %v4245_v22, %s3885_s21 }
 0x1f4   : > { %v815_v29 = vpop.xlane.xlu0 %814 }
 0x1f5   : > { %v825_v32 = vsub.f32 %v4333_v23, %v815_v29 }
 0x1f7   : > { %v839_v35 = vmul.f32 1.442695, %v825_v32 }
 0x1f9   : > { %1226 = vrot.lane.b32.xlu2 %v4257_v28, %s3885_s21  ;;  %3717 = vpow2.f32 %v839_v35 }
 0x1ff   : > { %v4392_v53 = vpop.eup %3717 }
 0x200   : > { %v861_v23 = vsel %vm794_vm3, %v4392_v53, 0.0 }
 0x20f   : > { %v812_v45 = vpop.xlane.xlu1 %811 }
 0x210   : > { %v824_v48 = vsub.f32 %v757_v33, %v812_v45 }
 0x212   : > { %v837_v37 = vmul.f32 1.442695, %v824_v48 }
 0x214   : > { %3719 = vpow2.f32 %v837_v37 }
 0x215   : > { %3721 = vpow2.f32 %v841_v38 }
 0x21a   : > { %v4394_v55 = vpop.eup %3719 }
 0x21b   : > { %v858_v61 = vsel %vm794_vm3, %v4394_v55, 0.0  ;;  %v4400_v62 = vpop.eup %3721 }
 0x21c   : > { %859 = vadd.xlane.f32.xlu0 %v858_v61  ;;  %862 = vadd.xlane.f32.xlu1 %v861_v23  ;;  %v864_v20 = vsel %vm794_vm3, %v4400_v62, 0.0 }
 0x222   : > { %865 = vadd.xlane.f32.xlu2 %v864_v20 }
 0x22e   : > { %v845_v33 = vpop.xlane.xlu2 %844 }
 0x22f   : > { %3723 = vrcp.f32 %v845_v33  ;;  %v878_v6 = vand.u32 2147483648, %v845_v33  ;;  %v876_v11 = vand.u32 2147483647, %v845_v33  ;;  %vm872_vm5 = vweird.f32 %v845_v33 }
 0x230   : > { %1224 = vrot.lane.b32.xlu0 %v4263_v30, %s3885_s21 }
 0x231   : > { %v879_v40 = vor.u32 1.1754944e-38, %v878_v6  ;;  %vm877_vm7 = vcmp.eq.f32.partialorder %v876_v11, 8.507059e+37 }
 0x235   : > { %v3724_v54 = vpop.eup %3723  ;;  %1220 = vrot.lane.b32.xlu1 %v4267_v31, %s3885_s21 }
 0x236   : > { %v868_v0 = vmul.f32 %v3724_v54, %v845_v33  ;;  %v848_v1 = vpop.xlane.xlu0 %847  ;;  %vm873_vm4 = vweird.f32 %v3724_v54  ;;  %v1136_v33 = vpop.f32.mrf.mxu2 }
 0x237   : > { %3725 = vrcp.f32 %v848_v1  ;;  %vm874_vm6 = vmor %vm872_vm5, %vm873_vm4  ;;  %v893_v41 = vand.u32 2147483648, %v848_v1  ;;  %v891_v45 = vand.u32 2147483647, %v848_v1  ;;  %vm887_vm9 = vweird.f32 %v848_v1 }
 0x238   : > { %v869_v2 = vsub.f32 1.0, %v868_v0 }
 0x239   : > { %v894_v37 = vor.u32 1.1754944e-38, %v893_v41  ;;  %vm892_vm11 = vcmp.eq.f32.partialorder %v891_v45, 8.507059e+37 }
 0x23a   : > { %v870_v7 = vmul.f32 %v3724_v54, %v869_v2  ;;  %1222 = vrot.lane.b32.xlu2 %v4275_v34, %s3885_s21 }
 0x23c   : > { %v871_v13 = vadd.f32 %v3724_v54, %v870_v7 }
 0x23d   : > { %v3726_v58 = vpop.eup %3725 }
 0x23e   : > { %v875_v18 = vsel %vm874_vm6, %v3724_v54, %v871_v13  ;;  %v883_v63 = vmul.f32 %v3726_v58, %v848_v1  ;;  %vm888_vm8 = vweird.f32 %v3726_v58 }
 0x23f   : > { %v880_v24 = vsel %vm877_vm7, %v879_v40, %v875_v18  ;;  %vm889_vm10 = vmor %vm887_vm9, %vm888_vm8 }
 0x240   : > { %v884_v29 = vsub.f32 1.0, %v883_v63  ;;  %v881_v32 = vmul.f32 %v4353_v52, %v880_v24  ;;  %v1139_v63 = vpop.f32.mrf.mxu2 }
 0x241   : > { %v4432_v45 = vadd.f32 %v1139_v63, %v4290_v50 }
 0x242   : > { %1605 = vrot.lane.b32.xlu2 %v4144_v51, %s3887_s18  ;;  %3496 = vmatmul.msk.f32.vlgmr.msrb.gmra.mxu3 %vm794_vm3, %v881_v32  ;;  %v885_v35 = vmul.f32 %v3726_v58, %v884_v29 }
 0x243   : > { %3508 = vmatpush.xpose.msk.msrb.mxu3 %vm653_vm0, %v4363_v39 }
 0x244   : > { %v851_v46 = vpop.xlane.xlu2 %850  ;;  %v886_v48 = vadd.f32 %v3726_v58, %v885_v35 }
 0x245   : > { %3727 = vrcp.f32 %v851_v46  ;;  %v908_v1 = vand.u32 2147483648, %v851_v46  ;;  %v906_v2 = vand.u32 2147483647, %v851_v46  ;;  %vm902_vm13 = vweird.f32 %v851_v46 }
 0x246   : > { %v890_v52 = vsel %vm889_vm10, %v3726_v58, %v886_v48  ;;  %v4425_v58 = vadd.f32 %v1136_v33, %v4286_v49 }
 0x247   : > { %3509 = vmatpush.xpose.msk.msrb.mxu3 %vm653_vm0, %v4357_v56  ;;  %v895_v38 = vsel %vm892_vm11, %v894_v37, %v890_v52  ;;  %v909_v7 = vor.u32 1.1754944e-38, %v908_v1  ;;  %vm907_vm15 = vcmp.eq.f32.partialorder %v906_v2, 8.507059e+37 }
 0x248   : > { %v896_v61 = vmul.f32 %v4359_v59, %v895_v38  ;;  %v1259_v35 = vsel %vm794_vm3, %v4425_v58, -inf }
 0x24a   : > { %1644 = vrot.lane.b32.xlu2 %v4198_v5, %s3887_s18  ;;  %3497 = vmatmul.msk.f32.gmra.mxu3 %vm794_vm3, %v896_v61 }
 0x24b   : > { %v3728_v39 = vpop.eup %3727 }
 0x24c   : > { %v898_v23 = vmul.f32 %v3728_v39, %v851_v46  ;;  %v854_v20 = vpop.xlane.xlu1 %853  ;;  %vm903_vm12 = vweird.f32 %v3728_v39 }
 0x24d   : > { %3729 = vrcp.f32 %v854_v20  ;;  %vm904_vm14 = vmor %vm902_vm13, %vm903_vm12  ;;  %v923_v24 = vand.u32 2147483648, %v854_v20  ;;  %v921_v41 = vand.u32 2147483647, %v854_v20  ;;  %vm917_vm2 = vweird.f32 %v854_v20 }
 0x24e   : > { %v899_v54 = vsub.f32 1.0, %v898_v23  ;;  %v1262_v23 = vsel %vm794_vm3, %v4432_v45, -inf }
 0x24f   : > { %v924_v37 = vor.u32 1.1754944e-38, %v923_v24  ;;  %vm922_vm5 = vcmp.eq.f32.partialorder %v921_v41, 8.507059e+37 }
 0x250   : > { %v900_v0 = vmul.f32 %v3728_v39, %v899_v54 }
 0x252   : > { %v901_v6 = vadd.f32 %v3728_v39, %v900_v0  ;;  %1638 = vrot.lane.b32.xlu2 %v4192_v3, %s3887_s18 }
 0x253   : > { %v3730_v56 = vpop.eup %3729 }
 0x254   : > { %v905_v59 = vsel %vm904_vm14, %v3728_v39, %v901_v6  ;;  %v913_v11 = vmul.f32 %v3730_v56, %v854_v20  ;;  %v857_v13 = vpop.xlane.xlu2 %856  ;;  %vm918_vm1 = vweird.f32 %v3730_v56 }
 0x255   : > { %3731 = vrcp.f32 %v857_v13  ;;  %v910_v18 = vsel %vm907_vm15, %v909_v7, %v905_v59  ;;  %vm919_vm4 = vmor %vm917_vm2, %vm918_vm1  ;;  %v938_v33 = vand.u32 2147483648, %v857_v13  ;;  %v936_v0 = vand.u32 2147483647, %v857_v13 }
 0x256   : > { %v914_v40 = vsub.f32 1.0, %v913_v11  ;;  %v911_v29 = vmul.f32 %v4369_v10, %v910_v18  ;;  %vm932_vm7 = vweird.f32 %v857_v13 }
 0x257   : > { %v939_v2 = vor.u32 1.1754944e-38, %v938_v33  ;;  %vm937_vm9 = vcmp.eq.f32.partialorder %v936_v0, 8.507059e+37 }
 0x258   : > { %v915_v32 = vmul.f32 %v3730_v56, %v914_v40  ;;  %3498 = vmatmul.msk.f32.vlgmr.msra.gmra.mxu3 %vm794_vm3, %v911_v29 }
 0x25a   : > { %1640 = vrot.lane.b32.xlu2 %v4234_v17, %s3887_s18  ;;  %1260 = vmax.xlane.f32.xlu0 %v1259_v35  ;;  %v916_v46 = vadd.f32 %v3730_v56, %v915_v32 }
 0x25b   : > { %v3732_v48 = vpop.eup %3731 }
 0x25c   : > { %v928_v10 = vmul.f32 %v3732_v48, %v857_v13  ;;  %v1227_v52 = vpop.permute.xlu2 %1226  ;;  %v920_v38 = vsel %vm919_vm4, %v3730_v56, %v916_v46  ;;  %vm933_vm6 = vweird.f32 %v3732_v48 }
 0x25d   : > { %3516 = vmatpush.xpose.msk.msrb.mxu1 %vm653_vm0, %v1227_v52  ;;  %v925_v61 = vsel %vm922_vm5, %v924_v37, %v920_v38  ;;  %vm934_vm8 = vmor %vm932_vm7, %vm933_vm6 }
 0x25e   : > { %v929_v39 = vsub.f32 1.0, %v928_v10  ;;  %v926_v20 = vmul.f32 %v4374_v16, %v925_v61  ;;  %v4447_v16 = vpack.i.bf16 %v4319_v14, %v4321_v15  ;;  %v4463_v14 = vpack.i.bf16 %v4335_v25, %v4337_v27  ;;  %v4469_v15 = vpop.permute.xlu0 %1183 }
 0x25f   : > { %1263 = vmax.xlane.f32.xlu1 %v1262_v23 }
 0x260   : > { %v930_v54 = vmul.f32 %v3732_v48, %v929_v39  ;;  %3499 = vmatmul.msk.f32.gmra.mxu3 %vm794_vm3, %v926_v20 }
 0x262   : > { %v931_v1 = vadd.f32 %v3732_v48, %v930_v54 }
 0x264   : > { %v935_v6 = vsel %vm934_vm8, %v3732_v48, %v931_v1 }
 0x265   : > { %v940_v56 = vsel %vm937_vm9, %v939_v2, %v935_v6 }
 0x266   : > { %v941_v59 = vmul.f32 %v4380_v21, %v940_v56  ;;  %v4457_v21 = vpack.i.bf16 %v4313_v8, %v4315_v9 }
 0x268   : > { %3500 = vmatmul.msk.f32.vlgmr.msra.gmra.mxu0 %vm794_vm3, %v941_v59  ;;  %3510 = vmatmul.msk.f32.vlgmr.msrb.gmra.mxu3 %vm653_vm0, %v4351_v36  ;;  %v1182_v36 = vpop.permute.xlu1 %1181 }
 0x26e   : > { %3617 = vrot.lane.b32.xlu0 %v4447_v16, %s3885_s21 }
 0x270   : > { %3511 = vmatmul.msk.f32.gmra.mxu3 %vm653_vm0, %v4388_v4 }
 0x276   : > { %1601 = vrot.lane.b32.xlu0 %v4164_v57, %s3887_s18 }
 0x278   : > { %3612 = vrot.lane.b32.xlu1 %v4457_v21, %s3885_s21 }
 0x27e   : > { %3622 = vrot.lane.b32.xlu0 %v4463_v14, %s3885_s21 }
 0x280   : > { %1603 = vrot.lane.b32.xlu1 %v4128_v44, %s3887_s18 }
 0x288   : > { %1599 = vrot.lane.b32.xlu1 %v4133_v47, %s3887_s18 }
 0x28f   : > { %v863_v8 = vpop.xlane.xlu1 %862  ;;  %v860_v9 = vpop.xlane.xlu0 %859 }
 0x290   : > { %3733 = vrcp.f32 %v863_v8  ;;  %1642 = vrot.lane.b32.xlu1 %v4172_v60, %s3887_s18  ;;  %v966_v40 = vand.u32 2147483647, %v863_v8  ;;  %v968_v18 = vand.u32 2147483648, %v863_v8  ;;  %v951_v29 = vand.u32 2147483647, %v860_v9 }
 0x291   : > { %3735 = vrcp.f32 %v860_v9  ;;  %v953_v32 = vand.u32 2147483648, %v860_v9  ;;  %vm962_vm12 = vweird.f32 %v863_v8  ;;  %vm947_vm15 = vweird.f32 %v860_v9 }
 0x292   : > { %vm967_vm14 = vcmp.eq.f32.partialorder %v966_v40, 8.507059e+37  ;;  %v969_v37 = vor.u32 1.1754944e-38, %v968_v18  ;;  %vm952_vm2 = vcmp.eq.f32.partialorder %v951_v29, 8.507059e+37 }
 0x293   : > { %v954_v61 = vor.u32 1.1754944e-38, %v953_v32 }
 0x295   : > { %v866_v25 = vpop.xlane.xlu2 %865 }
 0x296   : > { %v3734_v27 = vpop.eup %3733  ;;  %3737 = vrcp.f32 %v866_v25  ;;  %v981_v20 = vand.u32 2147483647, %v866_v25  ;;  %v983_v33 = vand.u32 2147483648, %v866_v25  ;;  %vm977_vm5 = vweird.f32 %v866_v25 }
 0x297   : > { %v3736_v4 = vpop.eup %3735  ;;  %v958_v7 = vmul.f32 %v3734_v27, %v863_v8  ;;  %vm963_vm10 = vweird.f32 %v3734_v27 }
 0x298   : > { %v943_v11 = vmul.f32 %v3736_v4, %v860_v9  ;;  %1683 = vrot.lane.b32.xlu1 %v4238_v19, %s3887_s18  ;;  %vm948_vm11 = vweird.f32 %v3736_v4  ;;  %vm964_vm13 = vmor %vm962_vm12, %vm963_vm10  ;;  %v984_v59 = vor.u32 1.1754944e-38, %v983_v33  ;;  %vm982_vm7 = vcmp.eq.f32.partialorder %v981_v20, 8.507059e+37 }
 0x299   : > { %v959_v13 = vsub.f32 1.0, %v958_v7  ;;  %vm949_vm1 = vmor %vm947_vm15, %vm948_vm11 }
 0x29a   : > { %v944_v63 = vsub.f32 1.0, %v943_v11 }
 0x29b   : > { %v960_v24 = vmul.f32 %v3734_v27, %v959_v13 }
 0x29c   : > { %v3738_v41 = vpop.eup %3737  ;;  %v945_v35 = vmul.f32 %v3736_v4, %v944_v63 }
 0x29d   : > { %v961_v46 = vadd.f32 %v3734_v27, %v960_v24  ;;  %v973_v48 = vmul.f32 %v3738_v41, %v866_v25  ;;  %vm978_vm4 = vweird.f32 %v3738_v41  ;;  %v1223_v25 = vpop.permute.xlu2 %1222 }
 0x29e   : > { %v946_v10 = vadd.f32 %v3736_v4, %v945_v35  ;;  %vm979_vm6 = vmor %vm977_vm5, %vm978_vm4 }
 0x29f   : > { %v965_v52 = vsel %vm964_vm13, %v3734_v27, %v961_v46  ;;  %v974_v38 = vsub.f32 1.0, %v973_v48 }
 0x2a0   : > { %v970_v39 = vsel %vm967_vm14, %v969_v37, %v965_v52  ;;  %v950_v23 = vsel %vm949_vm1, %v3736_v4, %v946_v10 }
 0x2a1   : > { %v955_v54 = vsel %vm952_vm2, %v954_v61, %v950_v23  ;;  %v971_v0 = vmul.f32 %v4392_v53, %v970_v39  ;;  %v975_v1 = vmul.f32 %v3738_v41, %v974_v38 }
 0x2a2   : > { %v1225_v2 = vpop.permute.xlu0 %1224  ;;  %v956_v6 = vmul.f32 %v4394_v55, %v955_v54 }
 0x2a3   : > { %3502 = vmatmul.msk.f32.vlgmr.msra.gmra.mxu1 %vm794_vm3, %v971_v0  ;;  %v976_v56 = vadd.f32 %v3738_v41, %v975_v1 }
 0x2a4   : > { %3501 = vmatmul.msk.f32.gmra.mxu0 %vm794_vm3, %v956_v6  ;;  %3517 = vmatpush.xpose.msk.msrb.mxu1 %vm653_vm0, %v1225_v2 }
 0x2a5   : > { %v980_v8 = vsel %vm979_vm6, %v3738_v41, %v976_v56  ;;  %v1606_v63 = vpop.permute.xlu2 %1605 }
 0x2a6   : > { %v985_v9 = vsel %vm982_vm7, %v984_v59, %v980_v8  ;;  %v4527_v59 = vpack.i.bf16 %v4345_v42, %v4347_v43 }
 0x2a7   : > { %v986_v53 = vmul.f32 %v4400_v62, %v985_v9  ;;  %v1221_v55 = vpop.permute.xlu1 %1220 }
 0x2ab   : > { %3503 = vmatmul.msk.f32.gmra.mxu1 %vm794_vm3, %v986_v53 }
 0x2ac   : > { %3514 = vmatmul.msk.f32.vlgmr.msrb.gmra.mxu0 %vm653_vm0, %v1182_v36 }
 0x2ad   : > { %v1645_v46 = vpop.permute.xlu2 %1644 }
 0x2b3   : > { %3518 = vmatmul.msk.f32.vlgmr.msrb.gmra.mxu1 %vm653_vm0, %v1221_v55 }
 0x2b4   : > { %3515 = vmatmul.msk.f32.gmra.mxu0 %vm653_vm0, %v4469_v15 }
 0x2bb   : > { %3519 = vmatmul.msk.f32.gmra.mxu1 %vm653_vm0, %v1223_v25 }
 0x2c5   : > { %v4489_v27 = vpop.f32.mrf.mxu3 }
 0x2cd   : > { %v1261_v4 = vpop.xlane.xlu0 %1260  ;;  %v4493_v36 = vpop.f32.mrf.mxu3 }
 0x2ce   : > { %v1283_v7 = vsub.f32 %v4425_v58, %v1261_v4 }
 0x2d0   : > { %v1291_v11 = vmul.f32 1.442695, %v1283_v7 }
 0x2d2   : > { %3739 = vpow2.f32 %v1291_v11  ;;  %v1264_v62 = vpop.xlane.xlu1 %1263 }
 0x2d3   : > { %v1284_v13 = vsub.f32 %v4432_v45, %v1264_v62 }
 0x2d5   : > { %v1293_v40 = vmul.f32 1.442695, %v1284_v13 }
 0x2d7   : > { %3741 = vpow2.f32 %v1293_v40 }
 0x2d8   : > { %v4495_v18 = vpop.eup %3739 }
 0x2d9   : > { %v1307_v15 = vsel %vm794_vm3, %v4495_v18, 0.0 }
 0x2da   : > { %1308 = vadd.xlane.f32.xlu2 %v1307_v15 }
 0x2db   : > { %v4499_v24 = vpop.f32.mrf.mxu3 }
 0x2dd   : > { %v4501_v29 = vpop.eup %3741 }
 0x2de   : > { %v1310_v58 = vsel %vm794_vm3, %v4501_v29, 0.0 }
 0x2df   : > { %1311 = vadd.xlane.f32.xlu1 %v1310_v58 }
 0x2e0   : > { %v3618_v45 = vpop.permute.xlu0 %3617 }
 0x2e1   : > { %v3619_v32 = vunpack.i.l.bf16 %v3618_v45  ;;  %v3620_v41 = vunpack.i.h.bf16 %v3618_v45  ;;  %v4558_v45 = vpop.permute.xlu2 %1638 }
 0x2e3   : > { %1516 = vmatpush.msra.mxu3 %v3619_v32  ;;  %v4505_v35 = vpop.f32.mrf.mxu3 }
 0x2e5   : > { %1517 = vmatpush.msra.mxu3 %v3620_v41  ;;  %v4532_v9 = vpop.f32.mrf.mxu0 }
 0x2e7   : > { %3532 = vmatpush.xpose.msk.msrb.mxu3 %vm653_vm0, %v1645_v46 }
 0x2e8   : > { %v4508_v48 = vpop.permute.xlu0 %1601 }
 0x2e9   : > { %v4562_v41 = vpop.permute.xlu2 %1640 }
 0x2ea   : > { %v3613_v37 = vpop.permute.xlu1 %3612 }
 0x2eb   : > { %v3614_v10 = vunpack.i.l.bf16 %v3613_v37  ;;  %v1175_v52 = vpop.f32.mrf.mxu3  ;;  %v3615_v38 = vunpack.i.h.bf16 %v3613_v37 }
 0x2ec   : > { %v4511_v61 = vadd.f32 %v1175_v52, %v4286_v49 }
 0x2ed   : > { %1479 = vmatpush.msra.mxu2 %v3614_v10 }
 0x2ee   : > { %v1265_v39 = vsel %vm794_vm3, %v4511_v61, -inf }
 0x2ef   : > { %1480 = vmatpush.msra.mxu2 %v3615_v38  ;;  %1266 = vmax.xlane.f32.xlu2 %v1265_v39 }
 0x2f0   : > { %v3623_v23 = vpop.permute.xlu0 %3622 }
 0x2f1   : > { %3528 = vmatpush.xpose.msk.msrb.mxu2 %vm653_vm0, %v1606_v63  ;;  %v3624_v20 = vunpack.i.l.bf16 %v3623_v23  ;;  %v3625_v54 = vunpack.i.h.bf16 %v3623_v23 }
 0x2f2   : > { %v1604_v33 = vpop.permute.xlu1 %1603 }
 0x2f3   : > { %1553 = vmatpush.msra.mxu0 %v3624_v20  ;;  %v1178_v0 = vpop.f32.mrf.mxu3 }
 0x2f4   : > { %v4518_v1 = vadd.f32 %v1178_v0, %v4290_v50 }
 0x2f5   : > { %3529 = vmatpush.xpose.msk.msrb.mxu2 %vm653_vm0, %v1604_v33  ;;  %1554 = vmatpush.msra.mxu0 %v3625_v54 }
 0x2f6   : > { %v1268_v2 = vsel %vm794_vm3, %v4518_v1, -inf }
 0x2f7   : > { %1269 = vmax.xlane.f32.xlu0 %v1268_v2 }
 0x2fa   : > { %v4522_v6 = vpop.permute.xlu1 %1599 }
 0x302   : > { %v1643_v56 = vpop.permute.xlu1 %1642 }
 0x303   : > { %3533 = vmatpush.xpose.msk.msrb.mxu3 %vm653_vm0, %v1643_v56 }
 0x307   : > { %3627 = vrot.lane.b32.xlu2 %v4527_v59, %s3885_s21 }
 0x30a   : > { %v1684_v8 = vpop.permute.xlu1 %1683 }
 0x30b   : > { %3536 = vmatpush.xpose.msk.msrb.mxu0 %vm653_vm0, %v1684_v8 }
 0x320   : > { %v4534_v53 = vpop.f32.mrf.mxu1 }
 0x321   : > { %v4536_v55 = vpop.f32.mrf.mxu0 }
 0x328   : > { %v4538_v25 = vpop.f32.mrf.mxu1 }
 0x329   : > { %v1214_v4 = vpop.f32.mrf.mxu0 }
 0x32a   : > { %v4541_v7 = vadd.f32 %v1214_v4, %v4286_v49 }
 0x32c   : > { %v1271_v42 = vsel %vm794_vm3, %v4541_v7, -inf }
 0x32d   : > { %1272 = vmax.xlane.f32.xlu1 %v1271_v42 }
 0x330   : > { %v1253_v43 = vpop.f32.mrf.mxu1 }
 0x331   : > { %v1217_v11 = vpop.f32.mrf.mxu0  ;;  %v4546_v62 = vadd.f32 %v1253_v43, %v4286_v49 }
 0x332   : > { %v4549_v13 = vadd.f32 %v1217_v11, %v4290_v50 }
 0x333   : > { %v1277_v40 = vsel %vm794_vm3, %v4546_v62, -inf }
 0x334   : > { %v1274_v15 = vsel %vm794_vm3, %v4549_v13, -inf  ;;  %1278 = vmax.xlane.f32.xlu2 %v1277_v40 }
 0x335   : > { %1275 = vmax.xlane.f32.xlu0 %v1274_v15 }
 0x338   : > { %v1256_v63 = vpop.f32.mrf.mxu1 }
 0x339   : > { %v4556_v58 = vadd.f32 %v1256_v63, %v4290_v50 }
 0x33b   : > { %v1280_v32 = vsel %vm794_vm3, %v4556_v58, -inf }
 0x33c   : > { %1281 = vmax.xlane.f32.xlu2 %v1280_v32 }
 0x34d   : > { %v1309_v46 = vpop.xlane.xlu2 %1308 }
 0x34e   : > { %3743 = vrcp.f32 %v1309_v46  ;;  %v1342_v39 = vand.u32 2147483648, %v1309_v46  ;;  %v1340_v33 = vand.u32 2147483647, %v1309_v46  ;;  %vm1336_vm9 = vweird.f32 %v1309_v46 }
 0x350   : > { %v1343_v2 = vor.u32 1.1754944e-38, %v1342_v39  ;;  %vm1341_vm11 = vcmp.eq.f32.partialorder %v1340_v33, 8.507059e+37 }
 0x352   : > { %v1312_v37 = vpop.xlane.xlu1 %1311 }
 0x353   : > { %3745 = vrcp.f32 %v1312_v37  ;;  %v1357_v43 = vand.u32 2147483648, %v1312_v37  ;;  %v1355_v40 = vand.u32 2147483647, %v1312_v37  ;;  %vm1351_vm13 = vweird.f32 %v1312_v37 }
 0x354   : > { %v3744_v10 = vpop.eup %3743 }
 0x355   : > { %v1332_v52 = vmul.f32 %v3744_v10, %v1309_v46  ;;  %vm1337_vm8 = vweird.f32 %v3744_v10  ;;  %v1358_v63 = vor.u32 1.1754944e-38, %v1357_v43  ;;  %vm1356_vm15 = vcmp.eq.f32.partialorder %v1355_v40, 8.507059e+37 }
 0x356   : > { %vm1338_vm10 = vmor %vm1336_vm9, %vm1337_vm8 }
 0x357   : > { %v1333_v38 = vsub.f32 1.0, %v1332_v52 }
 0x359   : > { %v3746_v23 = vpop.eup %3745  ;;  %v1334_v20 = vmul.f32 %v3744_v10, %v1333_v38 }
 0x35a   : > { %v1347_v54 = vmul.f32 %v3746_v23, %v1312_v37  ;;  %vm1352_vm12 = vweird.f32 %v3746_v23 }
 0x35b   : > { %v1335_v0 = vadd.f32 %v3744_v10, %v1334_v20  ;;  %vm1353_vm14 = vmor %vm1351_vm13, %vm1352_vm12 }
 0x35c   : > { %v1348_v56 = vsub.f32 1.0, %v1347_v54 }
 0x35d   : > { %v1339_v8 = vsel %vm1338_vm10, %v3744_v10, %v1335_v0 }
 0x35e   : > { %v1344_v4 = vsel %vm1341_vm11, %v1343_v2, %v1339_v8  ;;  %v1349_v42 = vmul.f32 %v3746_v23, %v1348_v56 }
 0x35f   : > { %v1345_v11 = vmul.f32 %v4495_v18, %v1344_v4 }
 0x360   : > { %v1350_v15 = vadd.f32 %v3746_v23, %v1349_v42 }
 0x361   : > { %3520 = vmatmul.msk.f32.vlgmr.msra.gmra.mxu2 %vm794_vm3, %v1345_v11 }
 0x362   : > { %v1354_v32 = vsel %vm1353_vm14, %v3746_v23, %v1350_v15  ;;  %v1267_v46 = vpop.xlane.xlu2 %1266 }
 0x363   : > { %v1285_v52 = vsub.f32 %v4511_v61, %v1267_v46  ;;  %v1359_v10 = vsel %vm1356_vm15, %v1358_v63, %v1354_v32 }
 0x364   : > { %v1360_v39 = vmul.f32 %v4501_v29, %v1359_v10 }
 0x365   : > { %v1295_v38 = vmul.f32 1.442695, %v1285_v52 }
 0x367   : > { %3747 = vpow2.f32 %v1295_v38 }
 0x369   : > { %3521 = vmatmul.msk.f32.gmra.mxu2 %vm794_vm3, %v1360_v39 }
 0x36a   : > { %v3628_v18 = vpop.permute.xlu2 %3627  ;;  %v1270_v20 = vpop.xlane.xlu0 %1269 }
 0x36b   : > { %v3629_v37 = vunpack.i.l.bf16 %v3628_v18  ;;  %v1286_v33 = vsub.f32 %v4518_v1, %v1270_v20  ;;  %v3630_v0 = vunpack.i.h.bf16 %v3628_v18 }
 0x36d   : > { %v4570_v54 = vpop.eup %3747  ;;  %v1297_v23 = vmul.f32 1.442695, %v1286_v33  ;;  %1590 = vmatpush.msra.mxu1 %v3629_v37 }
 0x36e   : > { %v1313_v61 = vsel %vm794_vm3, %v4570_v54, 0.0 }
 0x36f   : > { %3749 = vpow2.f32 %v1297_v23  ;;  %1314 = vadd.xlane.f32.xlu0 %v1313_v61  ;;  %1591 = vmatpush.msra.mxu1 %v3630_v0 }
 0x371   : > { %3530 = vmatmul.msk.f32.vlgmr.msrb.gmra.mxu2 %vm653_vm0, %v4522_v6 }
 0x375   : > { %v4576_v29 = vpop.eup %3749 }
 0x376   : > { %v1316_v2 = vsel %vm794_vm3, %v4576_v29, 0.0 }
 0x377   : > { %1317 = vadd.xlane.f32.xlu0 %v1316_v2 }
 0x379   : > { %3531 = vmatmul.msk.f32.gmra.mxu2 %vm653_vm0, %v4508_v48 }
 0x38b   : > { %1681 = vrot.lane.b32.xlu0 %v4221_v12, %s3887_s18 }
 0x3a0   : > { %v1273_v1 = vpop.xlane.xlu1 %1272 }
 0x3a1   : > { %v1287_v56 = vsub.f32 %v4541_v7, %v1273_v1 }
 0x3a3   : > { %v1299_v8 = vmul.f32 1.442695, %v1287_v56 }
 0x3a5   : > { %3751 = vpow2.f32 %v1299_v8 }
 0x3a7   : > { %v1279_v4 = vpop.xlane.xlu2 %1278 }
 0x3a8   : > { %v1289_v42 = vsub.f32 %v4546_v62, %v1279_v4  ;;  %v1276_v6 = vpop.xlane.xlu0 %1275 }
 0x3a9   : > { %v1288_v43 = vsub.f32 %v4549_v13, %v1276_v6 }
 0x3aa   : > { %v1303_v11 = vmul.f32 1.442695, %v1289_v42 }
 0x3ab   : > { %v1301_v40 = vmul.f32 1.442695, %v1288_v43  ;;  %v4587_v15 = vpop.eup %3751 }
 0x3ac   : > { %3753 = vpow2.f32 %v1303_v11  ;;  %v1319_v13 = vsel %vm794_vm3, %v4587_v15, 0.0 }
 0x3ad   : > { %3755 = vpow2.f32 %v1301_v40 }
 0x3af   : > { %v1282_v32 = vpop.xlane.xlu2 %1281 }
 0x3b0   : > { %v1290_v10 = vsub.f32 %v4556_v58, %v1282_v32 }
 0x3b2   : > { %v4589_v48 = vpop.eup %3753  ;;  %v1305_v38 = vmul.f32 1.442695, %v1290_v10 }
 0x3b3   : > { %v4591_v63 = vpop.eup %3755  ;;  %v1325_v7 = vsel %vm794_vm3, %v4589_v48, 0.0 }
 0x3b4   : > { %1326 = vadd.xlane.f32.xlu2 %v1325_v7  ;;  %v1322_v62 = vsel %vm794_vm3, %v4591_v63, 0.0 }
 0x3b5   : > { %1323 = vadd.xlane.f32.xlu1 %v1322_v62  ;;  %1320 = vadd.xlane.f32.xlu0 %v1319_v13 }
 0x3c9   : > { %1677 = vrot.lane.b32.xlu0 %v4245_v22, %s3887_s18 }
 0x3cc   : > { %1720 = vrot.lane.b32.xlu2 %v4263_v30, %s3887_s18 }
 0x3ce   : > { %1722 = vrot.lane.b32.xlu1 %v4257_v28, %s3887_s18 }
 0x3d1   : > { %1679 = vrot.lane.b32.xlu0 %v4253_v26, %s3887_s18 }
 0x3d9   : > { %1716 = vrot.lane.b32.xlu0 %v4267_v31, %s3887_s18 }
 0x3e2   : > { %v1315_v46 = vpop.xlane.xlu0 %1314 }
 0x3e3   : > { %3757 = vrcp.f32 %v1315_v46  ;;  %v1372_v23 = vand.u32 2147483648, %v1315_v46  ;;  %v1370_v2 = vand.u32 2147483647, %v1315_v46  ;;  %vm1366_vm2 = vweird.f32 %v1315_v46 }
 0x3e4   : > { %v4609_v52 = vpop.f32.mrf.mxu2 }
 0x3e5   : > { %v1373_v58 = vor.u32 1.1754944e-38, %v1372_v23  ;;  %vm1371_vm5 = vcmp.eq.f32.partialorder %v1370_v2, 8.507059e+37 }
 0x3e9   : > { %v3758_v39 = vpop.eup %3757 }
 0x3ea   : > { %v1362_v18 = vmul.f32 %v3758_v39, %v1315_v46  ;;  %v1318_v20 = vpop.xlane.xlu0 %1317  ;;  %vm1367_vm1 = vweird.f32 %v3758_v39 }
 0x3eb   : > { %3759 = vrcp.f32 %v1318_v20  ;;  %vm1368_vm4 = vmor %vm1366_vm2, %vm1367_vm1  ;;  %v1387_v62 = vand.u32 2147483648, %v1318_v20  ;;  %v1385_v10 = vand.u32 2147483647, %v1318_v20  ;;  %vm1381_vm7 = vweird.f32 %v1318_v20 }
 0x3ec   : > { %v4612_v37 = vpop.f32.mrf.mxu2  ;;  %3761 = vpow2.f32 %v1305_v38  ;;  %v1363_v33 = vsub.f32 1.0, %v1362_v18 }
 0x3ed   : > { %v3671_v0 = vpack.i.bf16 %v4612_v37, %v4609_v52  ;;  %vm1386_vm9 = vcmp.eq.f32.partialorder %v1385_v10, 8.507059e+37 }
 0x3ee   : > { %v1364_v61 = vmul.f32 %v3758_v39, %v1363_v33 }
 0x3f0   : > { %v1365_v1 = vadd.f32 %v3758_v39, %v1364_v61 }
 0x3f1   : > { %v3760_v56 = vpop.eup %3759 }
 0x3f2   : > { %v4616_v8 = vpop.eup %3761  ;;  %v1369_v4 = vsel %vm1368_vm4, %v3758_v39, %v1365_v1  ;;  %v1377_v42 = vmul.f32 %v3760_v56, %v1318_v20  ;;  %vm1382_vm6 = vweird.f32 %v3760_v56  ;;  %v1388_v39 = vor.u32 1.1754944e-38, %v1387_v62 }
 0x3f3   : > { %v1374_v6 = vsel %vm1371_vm5, %v1373_v58, %v1369_v4  ;;  %v1328_v13 = vsel %vm794_vm3, %v4616_v8, 0.0  ;;  %vm1383_vm8 = vmor %vm1381_vm7, %vm1382_vm6 }
 0x3f4   : > { %v1632_v43 = vpop.f32.mrf.mxu2  ;;  %v1378_v11 = vsub.f32 1.0, %v1377_v42  ;;  %v1375_v7 = vmul.f32 %v4570_v54, %v1374_v6 }
 0x3f5   : > { %v4619_v40 = vadd.f32 %v1632_v43, %v4286_v49 }
 0x3f6   : > { %v1379_v32 = vmul.f32 %v3760_v56, %v1378_v11  ;;  %3522 = vmatmul.msk.f32.vlgmr.msra.gmra.mxu3 %vm794_vm3, %v1375_v7 }
 0x3f7   : > { %v1755_v46 = vsel %vm794_vm3, %v4619_v40, -inf }
 0x3f8   : > { %1329 = vadd.xlane.f32.xlu1 %v1328_v13  ;;  %1756 = vmax.xlane.f32.xlu2 %v1755_v46  ;;  %v1380_v38 = vadd.f32 %v3760_v56, %v1379_v32 }
 0x3fa   : > { %v1384_v18 = vsel %vm1383_vm8, %v3760_v56, %v1380_v38 }
 0x3fb   : > { %v1389_v33 = vsel %vm1386_vm9, %v1388_v39, %v1384_v18 }
 0x3fc   : > { %v1635_v54 = vpop.f32.mrf.mxu2  ;;  %v1390_v23 = vmul.f32 %v4576_v29, %v1389_v33 }
 0x3fd   : > { %v1682_v61 = vpop.permute.xlu0 %1681  ;;  %v4629_v2 = vadd.f32 %v1635_v54, %v4290_v50 }
 0x3fe   : > { %3523 = vmatmul.msk.f32.gmra.mxu3 %vm794_vm3, %v1390_v23  ;;  %3537 = vmatpush.xpose.msk.msrb.mxu0 %vm653_vm0, %v1682_v61 }
 0x3ff   : > { %v1758_v20 = vsel %vm794_vm3, %v4629_v2, -inf }
 0x403   : > { %1759 = vmax.xlane.f32.xlu0 %v1758_v20 }
 0x406   : > { %3534 = vmatmul.msk.f32.vlgmr.msrb.gmra.mxu3 %vm653_vm0, %v4558_v45 }
 0x40e   : > { %3535 = vmatmul.msk.f32.gmra.mxu3 %vm653_vm0, %v4562_v41 }
 0x410   : > { %3637 = vrot.lane.b32.xlu2 %v4447_v16, %s3887_s18 }
 0x411   : > { %1718 = vrot.lane.b32.xlu1 %v4275_v34, %s3887_s18 }
 0x417   : > { %2093 = vrot.lane.b32.xlu0 %v4144_v51, %s3888_s26 }
 0x418   : > { %2089 = vrot.lane.b32.xlu2 %v4164_v57, %s3888_s26 }
 0x419   : > { %3632 = vrot.lane.b32.xlu1 %v4457_v21, %s3887_s18 }
 0x41f   : > { %2091 = vrot.lane.b32.xlu0 %v4128_v44, %s3888_s26 }
 0x420   : > { %2130 = vrot.lane.b32.xlu2 %v4172_v60, %s3888_s26 }
 0x421   : > { %2087 = vrot.lane.b32.xlu1 %v4133_v47, %s3888_s26 }
 0x427   : > { %v1327_v45 = vpop.xlane.xlu2 %1326 }
 0x428   : > { %3763 = vrcp.f32 %v1327_v45  ;;  %v1324_v41 = vpop.xlane.xlu1 %1323  ;;  %2126 = vrot.lane.b32.xlu2 %v4192_v3, %s3888_s26  ;;  %v1321_v51 = vpop.xlane.xlu0 %1320  ;;  %v1432_v47 = vand.u32 2147483648, %v1327_v45  ;;  %v1430_v6 = vand.u32 2147483647, %v1327_v45  ;;  %vm1426_vm11 = vweird.f32 %v1327_v45 }
 0x429   : > { %3765 = vrcp.f32 %v1324_v41  ;;  %2132 = vrot.lane.b32.xlu1 %v4198_v5, %s3888_s26  ;;  %v1400_v3 = vand.u32 2147483647, %v1321_v51  ;;  %v1402_v11 = vand.u32 2147483648, %v1321_v51  ;;  %vm1396_vm15 = vweird.f32 %v1321_v51 }
 0x42a   : > { %3767 = vrcp.f32 %v1321_v51  ;;  %v1433_v13 = vor.u32 1.1754944e-38, %v1432_v47  ;;  %vm1431_vm14 = vcmp.eq.f32.partialorder %v1430_v6, 8.507059e+37  ;;  %v1417_v33 = vand.u32 2147483648, %v1324_v41 }
 0x42b   : > { %vm1401_vm2 = vcmp.eq.f32.partialorder %v1400_v3, 8.507059e+37  ;;  %v1403_v38 = vor.u32 1.1754944e-38, %v1402_v11  ;;  %vm1411_vm5 = vweird.f32 %v1324_v41  ;;  %v1415_v20 = vand.u32 2147483647, %v1324_v41 }
 0x42d   : > { %vm1416_vm7 = vcmp.eq.f32.partialorder %v1415_v20, 8.507059e+37 }
 0x42e   : > { %v3764_v57 = vpop.eup %3763 }
 0x42f   : > { %v3766_v44 = vpop.eup %3765  ;;  %v1422_v29 = vmul.f32 %v3764_v57, %v1327_v45  ;;  %vm1427_vm10 = vweird.f32 %v3764_v57 }
 0x430   : > { %v3768_v1 = vpop.eup %3767  ;;  %v1407_v60 = vmul.f32 %v3766_v44, %v1324_v41  ;;  %vm1428_vm13 = vmor %vm1426_vm11, %vm1427_vm10  ;;  %vm1412_vm4 = vweird.f32 %v3766_v44 }
 0x431   : > { %v1423_v56 = vsub.f32 1.0, %v1422_v29  ;;  %v1392_v58 = vmul.f32 %v3768_v1, %v1321_v51  ;;  %vm1397_vm12 = vweird.f32 %v3768_v1  ;;  %vm1413_vm6 = vmor %vm1411_vm5, %vm1412_vm4  ;;  %v1418_v51 = vor.u32 1.1754944e-38, %v1417_v33 }
 0x432   : > { %v1408_v4 = vsub.f32 1.0, %v1407_v60  ;;  %vm1398_vm1 = vmor %vm1396_vm15, %vm1397_vm12 }
 0x433   : > { %v1424_v42 = vmul.f32 %v3764_v57, %v1423_v56  ;;  %v1393_v43 = vsub.f32 1.0, %v1392_v58 }
 0x434   : > { %v1409_v5 = vmul.f32 %v3766_v44, %v1408_v4 }
 0x435   : > { %v1425_v7 = vadd.f32 %v3764_v57, %v1424_v42  ;;  %v1394_v62 = vmul.f32 %v3768_v1, %v1393_v43 }
 0x436   : > { %v1410_v54 = vadd.f32 %v3766_v44, %v1409_v5 }
 0x437   : > { %v1429_v32 = vsel %vm1428_vm13, %v3764_v57, %v1425_v7  ;;  %v1395_v46 = vadd.f32 %v3768_v1, %v1394_v62 }
 0x438   : > { %v1434_v10 = vsel %vm1431_vm14, %v1433_v13, %v1429_v32  ;;  %v1414_v45 = vsel %vm1413_vm6, %v3766_v44, %v1410_v54 }
 0x439   : > { %v1399_v39 = vsel %vm1398_vm1, %v3768_v1, %v1395_v46  ;;  %v1435_v18 = vmul.f32 %v4589_v48, %v1434_v10  ;;  %v1419_v29 = vsel %vm1416_vm7, %v1418_v51, %v1414_v45  ;;  %v1721_v1 = vpop.permute.xlu2 %1720 }
 0x43a   : > { %v1404_v23 = vsel %vm1401_vm2, %v1403_v38, %v1399_v39  ;;  %v1420_v48 = vmul.f32 %v4591_v63, %v1419_v29 }
 0x43b   : > { %3526 = vmatmul.msk.f32.vlgmr.msra.gmra.mxu1 %vm794_vm3, %v1435_v18  ;;  %v1405_v61 = vmul.f32 %v4587_v15, %v1404_v23  ;;  %v1678_v60 = vpop.permute.xlu0 %1677 }
 0x43d   : > { %3524 = vmatmul.msk.f32.vlgmr.msra.gmra.mxu0 %vm794_vm3, %v1405_v61 }
 0x440   : > { %v1723_v57 = vpop.permute.xlu1 %1722 }
 0x441   : > { %3540 = vmatpush.xpose.msk.msrb.mxu1 %vm653_vm0, %v1723_v57 }
 0x443   : > { %v1680_v15 = vpop.permute.xlu0 %1679 }
 0x445   : > { %3525 = vmatmul.msk.f32.gmra.mxu0 %vm794_vm3, %v1420_v48  ;;  %3541 = vmatpush.xpose.msk.msrb.mxu1 %vm653_vm0, %v1721_v1 }
 0x44b   : > { %v1717_v47 = vpop.permute.xlu0 %1716 }
 0x44d   : > { %3538 = vmatmul.msk.f32.vlgmr.msrb.gmra.mxu0 %vm653_vm0, %v1678_v60 }
 0x455   : > { %3539 = vmatmul.msk.f32.gmra.mxu0 %vm653_vm0, %v1680_v15 }
 0x46b   : > { %v1330_v41 = vpop.xlane.xlu1 %1329  ;;  %v1757_v44 = vpop.xlane.xlu2 %1756 }
 0x46c   : > { %3769 = vrcp.f32 %v1330_v41  ;;  %v1779_v56 = vsub.f32 %v4619_v40, %v1757_v44  ;;  %v1447_v11 = vand.u32 2147483648, %v1330_v41  ;;  %v1445_v40 = vand.u32 2147483647, %v1330_v41 }
 0x46d   : > { %vm1441_vm9 = vweird.f32 %v1330_v41 }
 0x46e   : > { %v1787_v58 = vmul.f32 1.442695, %v1779_v56  ;;  %v1448_v10 = vor.u32 1.1754944e-38, %v1447_v11  ;;  %vm1446_vm11 = vcmp.eq.f32.partialorder %v1445_v40, 8.507059e+37 }
 0x470   : > { %3771 = vpow2.f32 %v1787_v58 }
 0x472   : > { %v3770_v63 = vpop.eup %3769 }
 0x473   : > { %v1437_v4 = vmul.f32 %v3770_v63, %v1330_v41  ;;  %v3638_v42 = vpop.permute.xlu2 %3637  ;;  %vm1442_vm8 = vweird.f32 %v3770_v63 }
 0x474   : > { %v3639_v6 = vunpack.i.l.bf16 %v3638_v42  ;;  %v3640_v7 = vunpack.i.h.bf16 %v3638_v42  ;;  %vm1443_vm10 = vmor %vm1441_vm9, %vm1442_vm8 }
 0x475   : > { %v1438_v43 = vsub.f32 1.0, %v1437_v4 }
 0x476   : > { %v4670_v3 = vpop.eup %3771  ;;  %2008 = vmatpush.msra.mxu3 %v3639_v6  ;;  %v1760_v62 = vpop.xlane.xlu0 %1759 }
 0x477   : > { %v1439_v5 = vmul.f32 %v3770_v63, %v1438_v43  ;;  %v1803_v13 = vsel %vm794_vm3, %v4670_v3, 0.0  ;;  %v1780_v32 = vsub.f32 %v4629_v2, %v1760_v62 }
 0x478   : > { %1804 = vadd.xlane.f32.xlu2 %v1803_v13  ;;  %2009 = vmatpush.msra.mxu3 %v3640_v7 }
 0x479   : > { %v1440_v46 = vadd.f32 %v3770_v63, %v1439_v5  ;;  %v1789_v38 = vmul.f32 1.442695, %v1780_v32  ;;  %v4675_v39 = vpop.f32.mrf.mxu3 }
 0x47b   : > { %v1444_v18 = vsel %vm1443_vm10, %v3770_v63, %v1440_v46  ;;  %3773 = vpow2.f32 %v1789_v38  ;;  %v4700_v58 = vpop.permute.xlu2 %2089 }
 0x47c   : > { %v1449_v54 = vsel %vm1446_vm11, %v1448_v10, %v1444_v18 }
 0x47d   : > { %v1450_v33 = vmul.f32 %v4616_v8, %v1449_v54 }
 0x47f   : > { %3527 = vmatmul.msk.f32.gmra.mxu1 %vm794_vm3, %v1450_v33 }
 0x481   : > { %v4679_v23 = vpop.eup %3773  ;;  %v4681_v2 = vpop.f32.mrf.mxu3 }
 0x482   : > { %v3686_v61 = vpack.i.bf16 %v4681_v2, %v4675_v39  ;;  %v1806_v45 = vsel %vm794_vm3, %v4679_v23, 0.0 }
 0x483   : > { %v1719_v20 = vpop.permute.xlu1 %1718  ;;  %1807 = vadd.xlane.f32.xlu1 %v1806_v45  ;;  %v2131_v4 = vpop.permute.xlu2 %2130 }
 0x487   : > { %3542 = vmatmul.msk.f32.vlgmr.msrb.gmra.mxu1 %vm653_vm0, %v1717_v47 }
 0x489   : > { %v2094_v51 = vpop.permute.xlu0 %2093  ;;  %v1671_v57 = vpop.f32.mrf.mxu3 }
 0x48a   : > { %v4689_v8 = vadd.f32 %v1671_v57, %v4286_v49 }
 0x48b   : > { %v3633_v29 = vpop.permute.xlu1 %3632  ;;  %v4723_v32 = vpop.permute.xlu2 %2126 }
 0x48c   : > { %v3634_v48 = vunpack.i.l.bf16 %v3633_v29  ;;  %v1761_v1 = vsel %vm794_vm3, %v4689_v8, -inf  ;;  %v3635_v60 = vunpack.i.h.bf16 %v3633_v29 }
 0x48d   : > { %1762 = vmax.xlane.f32.xlu1 %v1761_v1 }
 0x48e   : > { %1973 = vmatpush.msra.mxu2 %v3634_v48 }
 0x48f   : > { %3543 = vmatmul.msk.f32.gmra.mxu1 %vm653_vm0, %v1719_v20 }
 0x490   : > { %1974 = vmatpush.msra.mxu2 %v3635_v60 }
 0x491   : > { %v1674_v15 = vpop.f32.mrf.mxu3  ;;  %v2092_v56 = vpop.permute.xlu0 %2091 }
 0x492   : > { %3552 = vmatpush.xpose.msk.msrb.mxu2 %vm653_vm0, %v2094_v51  ;;  %v4696_v41 = vadd.f32 %v1674_v15, %v4290_v50 }
 0x493   : > { %v4698_v44 = vpop.permute.xlu1 %2087 }
 0x494   : > { %v1764_v47 = vsel %vm794_vm3, %v4696_v41, -inf }
 0x495   : > { %1765 = vmax.xlane.f32.xlu2 %v1764_v47 }
 0x496   : > { %3553 = vmatpush.xpose.msk.msrb.mxu2 %vm653_vm0, %v2092_v56 }
 0x49b   : > { %v2133_v63 = vpop.permute.xlu1 %2132 }
 0x49c   : > { %3556 = vmatpush.xpose.msk.msrb.mxu3 %vm653_vm0, %v2133_v63 }
 0x4a0   : > { %3557 = vmatpush.xpose.msk.msrb.mxu3 %vm653_vm0, %v2131_v4 }
 0x4b8   : > { %v4727_v18 = vpop.f32.mrf.mxu1 }
 0x4ba   : > { %v4707_v42 = vpop.f32.mrf.mxu0 }
 0x4c2   : > { %v4709_v6 = vpop.f32.mrf.mxu0 }
 0x4c3   : > { %v3696_v43 = vpack.i.bf16 %v4709_v6, %v4707_v42 }
 0x4ca   : > { %v1710_v11 = vpop.f32.mrf.mxu0 }
 0x4cb   : > { %v4714_v7 = vadd.f32 %v1710_v11, %v4286_v49 }
 0x4cd   : > { %v1767_v5 = vsel %vm794_vm3, %v4714_v7, -inf }
 0x4ce   : > { %1768 = vmax.xlane.f32.xlu0 %v1767_v5 }
 0x4d2   : > { %v1713_v62 = vpop.f32.mrf.mxu0 }
 0x4d3   : > { %v4719_v13 = vadd.f32 %v1713_v62, %v4290_v50 }
 0x4d5   : > { %v1770_v40 = vsel %vm794_vm3, %v4719_v13, -inf }
 0x4d6   : > { %1771 = vmax.xlane.f32.xlu1 %v1770_v40 }
 0x4eb   : > { %v1805_v46 = vpop.xlane.xlu2 %1804 }
 0x4ec   : > { %3775 = vrcp.f32 %v1805_v46  ;;  %v1838_v33 = vand.u32 2147483648, %v1805_v46  ;;  %v1836_v45 = vand.u32 2147483647, %v1805_v46  ;;  %vm1832_vm13 = vweird.f32 %v1805_v46 }
 0x4ee   : > { %v1839_v29 = vor.u32 1.1754944e-38, %v1838_v33  ;;  %vm1837_vm15 = vcmp.eq.f32.partialorder %v1836_v45, 8.507059e+37 }
 0x4ef   : > { %3642 = vrot.lane.b32.xlu1 %v4463_v14, %s3887_s18 }
 0x4f2   : > { %v3776_v10 = vpop.eup %3775 }
 0x4f3   : > { %v1828_v38 = vmul.f32 %v3776_v10, %v1805_v46  ;;  %vm1833_vm12 = vweird.f32 %v3776_v10 }
 0x4f4   : > { %vm1834_vm14 = vmor %vm1832_vm13, %vm1833_vm12 }
 0x4f5   : > { %v1829_v54 = vsub.f32 1.0, %v1828_v38 }
 0x4f6   : > { %v1808_v51 = vpop.xlane.xlu1 %1807 }
 0x4f7   : > { %v1830_v20 = vmul.f32 %v3776_v10, %v1829_v54  ;;  %3647 = vrot.lane.b32.xlu1 %v4527_v59, %s3887_s18  ;;  %3777 = vrcp.f32 %v1808_v51  ;;  %v1853_v11 = vand.u32 2147483648, %v1808_v51  ;;  %v1851_v40 = vand.u32 2147483647, %v1808_v51 }
 0x4f8   : > { %vm1847_vm2 = vweird.f32 %v1808_v51 }
 0x4f9   : > { %v1831_v57 = vadd.f32 %v3776_v10, %v1830_v20  ;;  %v1854_v54 = vor.u32 1.1754944e-38, %v1853_v11  ;;  %vm1852_vm5 = vcmp.eq.f32.partialorder %v1851_v40, 8.507059e+37 }
 0x4fb   : > { %v1835_v48 = vsel %vm1834_vm14, %v3776_v10, %v1831_v57 }
 0x4fc   : > { %v1840_v1 = vsel %vm1837_vm15, %v1839_v29, %v1835_v48  ;;  %v4731_v60 = vpop.f32.mrf.mxu1 }
 0x4fd   : > { %v1841_v15 = vmul.f32 %v4670_v3, %v1840_v1  ;;  %v3778_v56 = vpop.eup %3777 }
 0x4fe   : > { %v1843_v47 = vmul.f32 %v3778_v56, %v1808_v51  ;;  %vm1848_vm1 = vweird.f32 %v3778_v56 }
 0x4ff   : > { %2169 = vrot.lane.b32.xlu1 %v4221_v12, %s3888_s26  ;;  %3544 = vmatmul.msk.f32.vlgmr.msra.gmra.mxu2 %vm794_vm3, %v1841_v15  ;;  %vm1849_vm4 = vmor %vm1847_vm2, %vm1848_vm1 }
 0x500   : > { %v1844_v63 = vsub.f32 1.0, %v1843_v47  ;;  %v1763_v4 = vpop.xlane.xlu1 %1762 }
 0x501   : > { %v1781_v5 = vsub.f32 %v4689_v8, %v1763_v4 }
 0x502   : > { %v1845_v62 = vmul.f32 %v3778_v56, %v1844_v63 }
 0x503   : > { %v1791_v46 = vmul.f32 1.442695, %v1781_v5 }
 0x504   : > { %v1749_v10 = vpop.f32.mrf.mxu1  ;;  %v1846_v38 = vadd.f32 %v3778_v56, %v1845_v62 }
 0x505   : > { %v1750_v3 = vadd.f32 %v1749_v10, %v4286_v49  ;;  %3779 = vpow2.f32 %v1791_v46 }
 0x506   : > { %v1850_v33 = vsel %vm1849_vm4, %v3778_v56, %v1846_v38 }
 0x507   : > { %2167 = vrot.lane.b32.xlu1 %v4253_v26, %s3888_s26  ;;  %v1773_v12 = vsel %vm794_vm3, %v1750_v3, -inf  ;;  %v1855_v8 = vsel %vm1852_vm5, %v1854_v54, %v1850_v33 }
 0x508   : > { %1774 = vmax.xlane.f32.xlu0 %v1773_v12  ;;  %v1856_v20 = vmul.f32 %v4679_v23, %v1855_v8  ;;  %v1766_v23 = vpop.xlane.xlu2 %1765 }
 0x509   : > { %v1782_v48 = vsub.f32 %v4696_v41, %v1766_v23 }
 0x50a   : > { %3545 = vmatmul.msk.f32.gmra.mxu2 %vm794_vm3, %v1856_v20 }
 0x50b   : > { %v4744_v45 = vpop.eup %3779  ;;  %v1793_v56 = vmul.f32 1.442695, %v1782_v48 }
 0x50c   : > { %v1752_v51 = vpop.f32.mrf.mxu1  ;;  %v1809_v26 = vsel %vm794_vm3, %v4744_v45, 0.0 }
 0x50d   : > { %v1753_v57 = vadd.f32 %v1752_v51, %v4290_v50 }
 0x50f   : > { %v1776_v29 = vsel %vm794_vm3, %v1753_v57, -inf }
 0x510   : > { %1777 = vmax.xlane.f32.xlu2 %v1776_v29  ;;  %1810 = vadd.xlane.f32.xlu0 %v1809_v26 }
 0x512   : > { %3554 = vmatmul.msk.f32.vlgmr.msrb.gmra.mxu2 %vm653_vm0, %v4698_v44 }
 0x51a   : > { %3555 = vmatmul.msk.f32.gmra.mxu2 %vm653_vm0, %v4700_v58 }
 0x528   : > { %2171 = vrot.lane.b32.xlu2 %v4238_v19, %s3888_s26 }
 0x541   : > { %v1769_v1 = vpop.xlane.xlu0 %1768 }
 0x542   : > { %v1783_v15 = vsub.f32 %v4714_v7, %v1769_v1 }
 0x544   : > { %v1795_v47 = vmul.f32 1.442695, %v1783_v15 }
 0x546   : > { %3781 = vpow2.f32 %v1795_v47 }
 0x547   : > { %3783 = vpow2.f32 %v1793_v56 }
 0x549   : > { %v1772_v63 = vpop.xlane.xlu1 %1771 }
 0x54a   : > { %v1784_v4 = vsub.f32 %v4719_v13, %v1772_v63 }
 0x54c   : > { %v4759_v44 = vpop.eup %3781  ;;  %v1797_v11 = vmul.f32 1.442695, %v1784_v4 }
 0x54d   : > { %v4761_v58 = vpop.eup %3783  ;;  %v1815_v19 = vsel %vm794_vm3, %v4759_v44, 0.0 }
 0x54e   : > { %3785 = vpow2.f32 %v1797_v11  ;;  %1816 = vadd.xlane.f32.xlu0 %v1815_v19  ;;  %v1812_v41 = vsel %vm794_vm3, %v4761_v58, 0.0 }
 0x551   : > { %1813 = vadd.xlane.f32.xlu2 %v1812_v41 }
 0x554   : > { %v4767_v7 = vpop.eup %3785 }
 0x555   : > { %v1818_v5 = vsel %vm794_vm3, %v4767_v7, 0.0 }
 0x556   : > { %1819 = vadd.xlane.f32.xlu1 %v1818_v5 }
 0x561   : > { %v3643_v13 = vpop.permute.xlu1 %3642 }
 0x562   : > { %v3644_v62 = vunpack.i.l.bf16 %v3643_v13  ;;  %2128 = vrot.lane.b32.xlu0 %v4234_v17, %s3888_s26  ;;  %v3645_v40 = vunpack.i.h.bf16 %v3643_v13 }
 0x564   : > { %2043 = vmatpush.msra.mxu0 %v3644_v62 }
 0x566   : > { %2044 = vmatpush.msra.mxu0 %v3645_v40 }
 0x569   : > { %2165 = vrot.lane.b32.xlu2 %v4245_v22, %s3888_s26  ;;  %v3648_v46 = vpop.permute.xlu1 %3647 }
 0x56a   : > { %v3649_v10 = vunpack.i.l.bf16 %v3648_v46  ;;  %v3650_v38 = vunpack.i.h.bf16 %v3648_v46 }
 0x56c   : > { %2078 = vmatpush.msra.mxu1 %v3649_v10 }
 0x56e   : > { %2079 = vmatpush.msra.mxu1 %v3650_v38 }
 0x56f   : > { %2208 = vrot.lane.b32.xlu1 %v4263_v30, %s3888_s26 }
 0x57b   : > { %v1775_v54 = vpop.xlane.xlu0 %1774 }
 0x57c   : > { %v1785_v12 = vsub.f32 %v1750_v3, %v1775_v54 }
 0x57e   : > { %v1799_v33 = vmul.f32 1.442695, %v1785_v12 }
 0x582   : > { %v4777_v51 = vpop.f32.mrf.mxu2 }
 0x583   : > { %v1778_v8 = vpop.xlane.xlu2 %1777  ;;  %v1811_v20 = vpop.xlane.xlu0 %1810 }
 0x584   : > { %v1786_v17 = vsub.f32 %v1753_v57, %v1778_v8  ;;  %3787 = vrcp.f32 %v1811_v20  ;;  %v1866_v3 = vand.u32 2147483647, %v1811_v20  ;;  %v1868_v15 = vand.u32 2147483648, %v1811_v20  ;;  %v2170_v57 = vpop.permute.xlu1 %2169 }
 0x585   : > { %3789 = vpow2.f32 %v1799_v33  ;;  %vm1862_vm7 = vweird.f32 %v1811_v20 }
 0x586   : > { %v1801_v29 = vmul.f32 1.442695, %v1786_v17  ;;  %v1869_v41 = vor.u32 1.1754944e-38, %v1868_v15  ;;  %vm1867_vm9 = vcmp.eq.f32.partialorder %v1866_v3, 8.507059e+37 }
 0x588   : > { %3791 = vpow2.f32 %v1801_v29 }
 0x58a   : > { %v3788_v22 = vpop.eup %3787 }
 0x58b   : > { %v1858_v26 = vmul.f32 %v3788_v22, %v1811_v20  ;;  %v2172_v23 = vpop.permute.xlu2 %2171  ;;  %v4780_v48 = vpop.eup %3789  ;;  %vm1863_vm6 = vweird.f32 %v3788_v22 }
 0x58c   : > { %3560 = vmatpush.xpose.msk.msrb.mxu0 %vm653_vm0, %v2172_v23  ;;  %v1821_v19 = vsel %vm794_vm3, %v4780_v48, 0.0  ;;  %vm1864_vm8 = vmor %vm1862_vm7, %vm1863_vm6 }
 0x58d   : > { %v1859_v30 = vsub.f32 1.0, %v1858_v26  ;;  %v4784_v56 = vpop.f32.mrf.mxu2 }
 0x58e   : > { %v4782_v1 = vpop.eup %3791  ;;  %v3676_v63 = vpack.i.bf16 %v4784_v56, %v4777_v51 }
 0x58f   : > { %v1860_v47 = vmul.f32 %v3788_v22, %v1859_v30  ;;  %v1824_v4 = vsel %vm794_vm3, %v4782_v1, 0.0 }
 0x590   : > { %1825 = vadd.xlane.f32.xlu0 %v1824_v4  ;;  %3561 = vmatpush.xpose.msk.msrb.mxu0 %vm653_vm0, %v2170_v57 }
 0x591   : > { %v1861_v11 = vadd.f32 %v3788_v22, %v1860_v47 }
 0x592   : > { %1822 = vadd.xlane.f32.xlu2 %v1821_v19 }
 0x593   : > { %v1865_v5 = vsel %vm1864_vm8, %v3788_v22, %v1861_v11 }
 0x594   : > { %v1870_v13 = vsel %vm1867_vm9, %v1869_v41, %v1865_v5 }
 0x595   : > { %v1871_v62 = vmul.f32 %v4744_v45, %v1870_v13  ;;  %v2120_v40 = vpop.f32.mrf.mxu2  ;;  %v4806_v45 = vpop.permute.xlu1 %2167 }
 0x596   : > { %v4795_v46 = vadd.f32 %v2120_v40, %v4286_v49 }
 0x597   : > { %3546 = vmatmul.msk.f32.vlgmr.msra.gmra.mxu3 %vm794_vm3, %v1871_v62 }
 0x598   : > { %v2243_v10 = vsel %vm794_vm3, %v4795_v46, -inf }
 0x599   : > { %2244 = vmax.xlane.f32.xlu1 %v2243_v10 }
 0x59d   : > { %v2123_v41 = vpop.f32.mrf.mxu2 }
 0x5a4   : > { %2204 = vrot.lane.b32.xlu0 %v4267_v31, %s3888_s26 }
 0x5aa   : > { %2210 = vrot.lane.b32.xlu2 %v4257_v28, %s3888_s26 }
 0x5b2   : > { %2206 = vrot.lane.b32.xlu2 %v4275_v34, %s3888_s26 }
 0x5c1   : > { %v1817_v38 = vpop.xlane.xlu0 %1816 }
 0x5c2   : > { %3793 = vrcp.f32 %v1817_v38  ;;  %v1898_v29 = vand.u32 2147483648, %v1817_v38  ;;  %v1896_v28 = vand.u32 2147483647, %v1817_v38  ;;  %vm1892_vm11 = vweird.f32 %v1817_v38 }
 0x5c4   : > { %v1814_v54 = vpop.xlane.xlu2 %1813  ;;  %v1899_v3 = vor.u32 1.1754944e-38, %v1898_v29  ;;  %vm1897_vm14 = vcmp.eq.f32.partialorder %v1896_v28, 8.507059e+37 }
 0x5c5   : > { %3795 = vrcp.f32 %v1814_v54  ;;  %v1883_v34 = vand.u32 2147483648, %v1814_v54  ;;  %v1881_v57 = vand.u32 2147483647, %v1814_v54  ;;  %vm1877_vm15 = vweird.f32 %v1814_v54 }
 0x5c7   : > { %v1884_v5 = vor.u32 1.1754944e-38, %v1883_v34  ;;  %vm1882_vm2 = vcmp.eq.f32.partialorder %v1881_v57, 8.507059e+37 }
 0x5c8   : > { %v3794_v12 = vpop.eup %3793 }
 0x5c9   : > { %v1888_v33 = vmul.f32 %v3794_v12, %v1817_v38  ;;  %v1820_v8 = vpop.xlane.xlu1 %1819  ;;  %vm1893_vm10 = vweird.f32 %v3794_v12 }
 0x5ca   : > { %3797 = vrcp.f32 %v1820_v8  ;;  %vm1894_vm12 = vmor %vm1892_vm11, %vm1893_vm10  ;;  %v1913_v40 = vand.u32 2147483648, %v1820_v8  ;;  %vm1907_vm5 = vweird.f32 %v1820_v8 }
 0x5cb   : > { %v3796_v20 = vpop.eup %3795  ;;  %v1889_v17 = vsub.f32 1.0, %v1888_v33 }
 0x5cc   : > { %v1873_v31 = vmul.f32 %v3796_v20, %v1814_v54  ;;  %vm1878_vm13 = vweird.f32 %v3796_v20 }
 0x5cd   : > { %v1890_v22 = vmul.f32 %v3794_v12, %v1889_v17  ;;  %vm1879_vm1 = vmor %vm1877_vm15, %vm1878_vm13  ;;  %v4811_v17 = vadd.f32 %v2123_v41, %v4290_v50 }
 0x5ce   : > { %v1874_v26 = vsub.f32 1.0, %v1873_v31  ;;  %v1914_v31 = vor.u32 1.1754944e-38, %v1913_v40 }
 0x5cf   : > { %v1891_v23 = vadd.f32 %v3794_v12, %v1890_v22 }
 0x5d0   : > { %v3798_v30 = vpop.eup %3797  ;;  %v1875_v15 = vmul.f32 %v3796_v20, %v1874_v26 }
 0x5d1   : > { %v1895_v47 = vsel %vm1894_vm12, %v3794_v12, %v1891_v23  ;;  %v1903_v4 = vmul.f32 %v3798_v30, %v1820_v8  ;;  %vm1908_vm4 = vweird.f32 %v3798_v30  ;;  %v1911_v12 = vand.u32 2147483647, %v1820_v8 }
 0x5d2   : > { %v1900_v11 = vsel %vm1897_vm14, %v1899_v3, %v1895_v47  ;;  %v1876_v19 = vadd.f32 %v3796_v20, %v1875_v15  ;;  %vm1909_vm6 = vmor %vm1907_vm5, %vm1908_vm4 }
 0x5d3   : > { %v1904_v13 = vsub.f32 1.0, %v1903_v4  ;;  %v1901_v62 = vmul.f32 %v4759_v44, %v1900_v11  ;;  %vm1912_vm7 = vcmp.eq.f32.partialorder %v1911_v12, 8.507059e+37 }
 0x5d4   : > { %v1880_v10 = vsel %vm1879_vm1, %v3796_v20, %v1876_v19  ;;  %v2246_v20 = vsel %vm794_vm3, %v4811_v17, -inf  ;;  %v2129_v8 = vpop.permute.xlu0 %2128 }
 0x5d5   : > { %v1905_v38 = vmul.f32 %v3798_v30, %v1904_v13  ;;  %3548 = vmatmul.msk.f32.vlgmr.msra.gmra.mxu0 %vm794_vm3, %v1901_v62  ;;  %v1885_v33 = vsel %vm1882_vm2, %v1884_v5, %v1880_v10 }
 0x5d6   : > { %v1886_v54 = vmul.f32 %v4761_v58, %v1885_v33  ;;  %v2166_v58 = vpop.permute.xlu2 %2165 }
 0x5d7   : > { %v1906_v29 = vadd.f32 %v3798_v30, %v1905_v38 }
 0x5d8   : > { %3547 = vmatmul.msk.f32.gmra.mxu3 %vm794_vm3, %v1886_v54 }
 0x5d9   : > { %v1910_v44 = vsel %vm1909_vm6, %v3798_v30, %v1906_v29 }
 0x5da   : > { %v1915_v22 = vsel %vm1912_vm7, %v1914_v31, %v1910_v44 }
 0x5db   : > { %2247 = vmax.xlane.f32.xlu2 %v2246_v20  ;;  %v1916_v28 = vmul.f32 %v4767_v7, %v1915_v22 }
 0x5dd   : > { %3549 = vmatmul.msk.f32.gmra.mxu0 %vm794_vm3, %v1916_v28 }
 0x5e0   : > { %3558 = vmatmul.msk.f32.vlgmr.msrb.gmra.mxu3 %vm653_vm0, %v4723_v32 }
 0x5e1   : > { %v2209_v4 = vpop.permute.xlu1 %2208 }
 0x5e5   : > { %3562 = vmatmul.msk.f32.vlgmr.msrb.gmra.mxu0 %vm653_vm0, %v2166_v58 }
 0x5e8   : > { %3559 = vmatmul.msk.f32.gmra.mxu3 %vm653_vm0, %v2129_v8 }
 0x5ed   : > { %3563 = vmatmul.msk.f32.gmra.mxu0 %vm653_vm0, %v4806_v45 }
 0x603   : > { %v1826_v26 = vpop.xlane.xlu0 %1825 }
 0x604   : > { %3799 = vrcp.f32 %v1826_v26  ;;  %v1943_v40 = vand.u32 2147483648, %v1826_v26  ;;  %vm1937_vm13 = vweird.f32 %v1826_v26  ;;  %v1941_v33 = vand.u32 2147483647, %v1826_v26 }
 0x605   : > { %v1823_v23 = vpop.xlane.xlu2 %1822 }
 0x606   : > { %3801 = vrcp.f32 %v1823_v23  ;;  %v1928_v47 = vand.u32 2147483648, %v1823_v23  ;;  %v1926_v41 = vand.u32 2147483647, %v1823_v23  ;;  %vm1922_vm9 = vweird.f32 %v1823_v23 }
 0x607   : > { %v1944_v54 = vor.u32 1.1754944e-38, %v1943_v40  ;;  %vm1942_vm15 = vcmp.eq.f32.partialorder %v1941_v33, 8.507059e+37 }
 0x608   : > { %v1929_v5 = vor.u32 1.1754944e-38, %v1928_v47  ;;  %vm1927_vm11 = vcmp.eq.f32.partialorder %v1926_v41, 8.507059e+37 }
 0x60a   : > { %v3800_v34 = vpop.eup %3799 }
 0x60b   : > { %v1933_v7 = vmul.f32 %v3800_v34, %v1826_v26  ;;  %vm1938_vm12 = vweird.f32 %v3800_v34 }
 0x60c   : > { %v3802_v30 = vpop.eup %3801  ;;  %vm1939_vm14 = vmor %vm1937_vm13, %vm1938_vm12  ;;  %v2245_v28 = vpop.xlane.xlu1 %2244 }
 0x60d   : > { %v1934_v3 = vsub.f32 1.0, %v1933_v7  ;;  %v1918_v15 = vmul.f32 %v3802_v30, %v1823_v23  ;;  %v2211_v57 = vpop.permute.xlu2 %2210  ;;  %vm1923_vm8 = vweird.f32 %v3802_v30  ;;  %v2267_v26 = vsub.f32 %v4795_v46, %v2245_v28 }
 0x60e   : > { %3564 = vmatpush.xpose.msk.msrb.mxu1 %vm653_vm0, %v2211_v57  ;;  %vm1924_vm10 = vmor %vm1922_vm9, %vm1923_vm8 }
 0x60f   : > { %v1919_v32 = vsub.f32 1.0, %v1918_v15  ;;  %v1935_v11 = vmul.f32 %v3800_v34, %v1934_v3  ;;  %v2275_v23 = vmul.f32 1.442695, %v2267_v26 }
 0x611   : > { %v1920_v19 = vmul.f32 %v3802_v30, %v1919_v32  ;;  %v1936_v62 = vadd.f32 %v3800_v34, %v1935_v11  ;;  %3803 = vpow2.f32 %v2275_v23 }
 0x612   : > { %3565 = vmatpush.xpose.msk.msrb.mxu1 %vm653_vm0, %v2209_v4 }
 0x613   : > { %v1921_v45 = vadd.f32 %v3802_v30, %v1920_v19  ;;  %v1940_v12 = vsel %vm1939_vm14, %v3800_v34, %v1936_v62 }
 0x614   : > { %v1945_v29 = vsel %vm1942_vm15, %v1944_v54, %v1940_v12 }
 0x615   : > { %v1925_v13 = vsel %vm1924_vm10, %v3802_v30, %v1921_v45  ;;  %v1946_v31 = vmul.f32 %v4782_v1, %v1945_v29  ;;  %v2207_v20 = vpop.permute.xlu2 %2206 }
 0x616   : > { %v1930_v10 = vsel %vm1927_vm11, %v1929_v5, %v1925_v13  ;;  %v2205_v44 = vpop.permute.xlu0 %2204 }
 0x617   : > { %v1931_v38 = vmul.f32 %v4780_v48, %v1930_v10  ;;  %v4848_v47 = vpop.eup %3803 }
 0x618   : > { %v2291_v41 = vsel %vm794_vm3, %v4848_v47, 0.0 }
 0x619   : > { %3550 = vmatmul.msk.f32.vlgmr.msra.gmra.mxu1 %vm794_vm3, %v1931_v38 }
 0x61a   : > { %v4835_v48 = vpop.f32.mrf.mxu3 }
 0x621   : > { %3551 = vmatmul.msk.f32.gmra.mxu1 %vm794_vm3, %v1946_v31 }
 0x629   : > { %3566 = vmatmul.msk.f32.vlgmr.msrb.gmra.mxu1 %vm653_vm0, %v2205_v44 }
 0x631   : > { %3567 = vmatmul.msk.f32.gmra.mxu1 %vm653_vm0, %v2207_v20 }
 0x64e   : > { %v2248_v32 = vpop.xlane.xlu2 %2247 }
 0x64f   : > { %v2268_v11 = vsub.f32 %v4811_v17, %v2248_v32 }
 0x651   : > { %v2277_v5 = vmul.f32 1.442695, %v2268_v11 }
 0x652   : > { %v4833_v22 = vpop.f32.mrf.mxu0 }
 0x653   : > { %3805 = vpow2.f32 %v2277_v5 }
 0x659   : > { %v4857_v40 = vpop.eup %3805 }
 0x65a   : > { %v4837_v58 = vpop.f32.mrf.mxu0  ;;  %v2294_v17 = vsel %vm794_vm3, %v4857_v40, 0.0 }
 0x65b   : > { %v4839_v8 = vpop.f32.mrf.mxu3 }
 0x65c   : > { %v3691_v1 = vpack.i.bf16 %v4839_v8, %v4835_v48 }
 0x662   : > { %v2198_v34 = vpop.f32.mrf.mxu0 }
 0x663   : > { %v2199_v7 = vadd.f32 %v2198_v34, %v4286_v49  ;;  %v2159_v30 = vpop.f32.mrf.mxu3 }
 0x664   : > { %v2160_v3 = vadd.f32 %v2159_v30, %v4286_v49 }
 0x665   : > { %v2255_v15 = vsel %vm794_vm3, %v2199_v7, -inf }
 0x666   : > { %2256 = vmax.xlane.f32.xlu2 %v2255_v15  ;;  %v2249_v57 = vsel %vm794_vm3, %v2160_v3, -inf }
 0x667   : > { %2250 = vmax.xlane.f32.xlu0 %v2249_v57 }
 0x66a   : > { %v2201_v46 = vpop.f32.mrf.mxu0 }
 0x66b   : > { %v2202_v4 = vadd.f32 %v2201_v46, %v4290_v50  ;;  %v2162_v45 = vpop.f32.mrf.mxu3 }
 0x66c   : > { %v2163_v13 = vadd.f32 %v2162_v45, %v4290_v50 }
 0x66d   : > { %v2258_v19 = vsel %vm794_vm3, %v2202_v4, -inf }
 0x66e   : > { %2259 = vmax.xlane.f32.xlu1 %v2258_v19  ;;  %2292 = vadd.xlane.f32.xlu2 %v2291_v41  ;;  %v2252_v62 = vsel %vm794_vm3, %v2163_v13, -inf }
 0x676   : > { %2253 = vmax.xlane.f32.xlu1 %v2252_v62 }
 0x67e   : > { %2295 = vadd.xlane.f32.xlu1 %v2294_v17 }
 0x696   : > { %v4861_v10 = vpop.f32.mrf.mxu1 }
 0x697   : > { %3652 = vrot.lane.b32.xlu1 %v4457_v21, %s3888_s26 }
 0x69e   : > { %v4865_v38 = vpop.f32.mrf.mxu1 }
 0x6a6   : > { %v2237_v33 = vpop.f32.mrf.mxu1 }
 0x6a7   : > { %v4868_v12 = vadd.f32 %v2237_v33, %v4286_v49 }
 0x6a9   : > { %v2261_v54 = vsel %vm794_vm3, %v4868_v12, -inf }
 0x6aa   : > { %2262 = vmax.xlane.f32.xlu0 %v2261_v54 }
 0x6ae   : > { %v2240_v29 = vpop.f32.mrf.mxu1 }
 0x6af   : > { %v4873_v31 = vadd.f32 %v2240_v29, %v4290_v50 }
 0x6b1   : > { %v2264_v44 = vsel %vm794_vm3, %v4873_v31, -inf }
 0x6b2   : > { %2265 = vmax.xlane.f32.xlu2 %v2264_v44 }
 0x6d9   : > { %v2257_v26 = vpop.xlane.xlu2 %2256 }
 0x6da   : > { %v2251_v20 = vpop.xlane.xlu0 %2250  ;;  %v2271_v57 = vsub.f32 %v2199_v7, %v2257_v26 }
 0x6db   : > { %v2269_v21 = vsub.f32 %v2160_v3, %v2251_v20 }
 0x6dc   : > { %v2283_v46 = vmul.f32 1.442695, %v2271_v57 }
 0x6dd   : > { %v2279_v28 = vmul.f32 1.442695, %v2269_v21 }
 0x6df   : > { %3807 = vpow2.f32 %v2279_v28 }
 0x6e1   : > { %v2260_v23 = vpop.xlane.xlu1 %2259  ;;  %v2293_v15 = vpop.xlane.xlu2 %2292 }
 0x6e2   : > { %3809 = vrcp.f32 %v2293_v15  ;;  %v2272_v41 = vsub.f32 %v2202_v4, %v2260_v23  ;;  %v2326_v21 = vand.u32 2147483648, %v2293_v15  ;;  %vm2320_vm2 = vweird.f32 %v2293_v15 }
 0x6e3   : > { %v2324_v28 = vand.u32 2147483647, %v2293_v15 }
 0x6e4   : > { %v2285_v62 = vmul.f32 1.442695, %v2272_v41 }
 0x6e5   : > { %v4877_v49 = vpop.eup %3807  ;;  %vm2325_vm5 = vcmp.eq.f32.partialorder %v2324_v28, 8.507059e+37 }
 0x6e6   : > { %v2297_v34 = vsel %vm794_vm3, %v4877_v49, 0.0 }
 0x6e7   : > { %2298 = vadd.xlane.f32.xlu0 %v2297_v34  ;;  %v2327_v34 = vor.u32 1.1754944e-38, %v2326_v21 }
 0x6e8   : > { %v3810_v11 = vpop.eup %3809 }
 0x6e9   : > { %v2254_v30 = vpop.xlane.xlu1 %2253  ;;  %v2316_v5 = vmul.f32 %v3810_v11, %v2293_v15  ;;  %vm2321_vm1 = vweird.f32 %v3810_v11 }
 0x6ea   : > { %v2270_v50 = vsub.f32 %v2163_v13, %v2254_v30  ;;  %vm2322_vm4 = vmor %vm2320_vm2, %vm2321_vm1 }
 0x6eb   : > { %v2317_v7 = vsub.f32 1.0, %v2316_v5 }
 0x6ec   : > { %v2281_v32 = vmul.f32 1.442695, %v2270_v50 }
 0x6ed   : > { %v2318_v4 = vmul.f32 %v3810_v11, %v2317_v7 }
 0x6ee   : > { %3811 = vpow2.f32 %v2281_v32 }
 0x6ef   : > { %3813 = vpow2.f32 %v2283_v46  ;;  %v2319_v44 = vadd.f32 %v3810_v11, %v2318_v4 }
 0x6f1   : > { %v2296_v3 = vpop.xlane.xlu1 %2295  ;;  %v2323_v26 = vsel %vm2322_vm4, %v3810_v11, %v2319_v44 }
 0x6f2   : > { %3815 = vrcp.f32 %v2296_v3  ;;  %v2328_v50 = vsel %vm2325_vm5, %v2327_v34, %v2323_v26  ;;  %vm2335_vm7 = vweird.f32 %v2296_v3  ;;  %v2339_v41 = vand.u32 2147483647, %v2296_v3 }
 0x6f3   : > { %3817 = vpow2.f32 %v2285_v62  ;;  %v2329_v15 = vmul.f32 %v4848_v47, %v2328_v50 }
 0x6f4   : > { %v4881_v19 = vpop.eup %3811  ;;  %vm2340_vm9 = vcmp.eq.f32.partialorder %v2339_v41, 8.507059e+37 }
 0x6f5   : > { %v2300_v45 = vsel %vm794_vm3, %v4881_v19, 0.0  ;;  %v4885_v17 = vpop.eup %3813 }
 0x6f6   : > { %2301 = vadd.xlane.f32.xlu2 %v2300_v45  ;;  %v2303_v33 = vsel %vm794_vm3, %v4885_v17, 0.0 }
 0x6f8   : > { %v3816_v13 = vpop.eup %3815 }
 0x6f9   : > { %v2331_v54 = vmul.f32 %v3816_v13, %v2296_v3  ;;  %v4891_v29 = vpop.eup %3817  ;;  %vm2336_vm6 = vweird.f32 %v3816_v13 }
 0x6fa   : > { %vm2337_vm8 = vmor %vm2335_vm7, %vm2336_vm6 }
 0x6fb   : > { %3657 = vrot.lane.b32.xlu0 %v4447_v16, %s3888_s26  ;;  %v2332_v20 = vsub.f32 1.0, %v2331_v54  ;;  %v2306_v16 = vsel %vm794_vm3, %v4891_v29, 0.0 }
 0x6fd   : > { %v2333_v23 = vmul.f32 %v3816_v13, %v2332_v20 }
 0x6fe   : > { %2304 = vadd.xlane.f32.xlu2 %v2303_v33 }
 0x6ff   : > { %v2334_v32 = vadd.f32 %v3816_v13, %v2333_v23 }
 0x701   : > { %v2338_v11 = vsel %vm2337_vm8, %v3816_v13, %v2334_v32 }
 0x703   : > { %3662 = vrot.lane.b32.xlu0 %v4463_v14, %s3888_s26  ;;  %v2341_v14 = vand.u32 2147483648, %v2296_v3 }
 0x705   : > { %v2342_v45 = vor.u32 1.1754944e-38, %v2341_v14 }
 0x706   : > { %2307 = vadd.xlane.f32.xlu2 %v2306_v16 }
 0x707   : > { %v2343_v5 = vsel %vm2340_vm9, %v2342_v45, %v2338_v11 }
 0x709   : > { %v3653_v30 = vpop.permute.xlu1 %3652 }
 0x70a   : > { %v3654_v57 = vunpack.i.l.bf16 %v3653_v30  ;;  %v3655_v46 = vunpack.i.h.bf16 %v3653_v30 }
 0x70b   : > { %3667 = vrot.lane.b32.xlu0 %v4527_v59, %s3888_s26  ;;  %v2344_v59 = vmul.f32 %v4857_v40, %v2343_v5 }
 0x70c   : > { %2461 = vmatpush.msra.mxu2 %v3654_v57 }
 0x70e   : > { %2462 = vmatpush.msra.mxu2 %v3655_v46 }
 0x70f   : > { %3568 = vmatmul.msk.f32.vlgmr.msra.gmra.mxu2 %vm794_vm3, %v2329_v15 }
 0x713   : > { %3677 = vrot.lane.b32.xlu0 %v3676_v63, %s3887_s18 }
 0x717   : > { %3569 = vmatmul.msk.f32.gmra.mxu2 %vm794_vm3, %v2344_v59 }
 0x71d   : > { %v2263_v62 = vpop.xlane.xlu0 %2262 }
 0x71e   : > { %v2273_v47 = vsub.f32 %v4868_v12, %v2263_v62 }
 0x720   : > { %v2287_v3 = vmul.f32 1.442695, %v2273_v47 }
 0x722   : > { %3819 = vpow2.f32 %v2287_v3 }
 0x725   : > { %v2266_v7 = vpop.xlane.xlu2 %2265 }
 0x726   : > { %v2274_v13 = vsub.f32 %v4873_v31, %v2266_v7 }
 0x728   : > { %v4909_v33 = vpop.eup %3819  ;;  %v2289_v4 = vmul.f32 1.442695, %v2274_v13 }
 0x729   : > { %v2309_v54 = vsel %vm794_vm3, %v4909_v33, 0.0 }
 0x72a   : > { %3821 = vpow2.f32 %v2289_v4  ;;  %2310 = vadd.xlane.f32.xlu1 %v2309_v54 }
 0x730   : > { %v4913_v51 = vpop.eup %3821 }
 0x731   : > { %v2312_v56 = vsel %vm794_vm3, %v4913_v51, 0.0 }
 0x732   : > { %2313 = vadd.xlane.f32.xlu2 %v2312_v56 }
 0x74a   : > { %3672 = vrot.lane.b32.xlu2 %v3671_v0, %s3888_s26 }
 0x752   : > { %3692 = vrot.lane.b32.xlu2 %v3691_v1, %s3887_s18 }
 0x75a   : > { %v2299_v63 = vpop.xlane.xlu0 %2298  ;;  %3697 = vrot.lane.b32.xlu2 %v3696_v43, %s3888_s26 }
 0x75b   : > { %3823 = vrcp.f32 %v2299_v63  ;;  %v2356_v52 = vand.u32 2147483648, %v2299_v63  ;;  %vm2350_vm11 = vweird.f32 %v2299_v63  ;;  %v2354_v37 = vand.u32 2147483647, %v2299_v63 }
 0x75d   : > { %v2357_v8 = vor.u32 1.1754944e-38, %v2356_v52  ;;  %vm2355_vm13 = vcmp.eq.f32.partialorder %v2354_v37, 8.507059e+37 }
 0x761   : > { %v3824_v40 = vpop.eup %3823 }
 0x762   : > { %v2346_v12 = vmul.f32 %v3824_v40, %v2299_v63  ;;  %vm2351_vm10 = vweird.f32 %v3824_v40 }
 0x763   : > { %vm2352_vm12 = vmor %vm2350_vm11, %vm2351_vm10 }
 0x764   : > { %v2347_v31 = vsub.f32 1.0, %v2346_v12 }
 0x766   : > { %v2348_v44 = vmul.f32 %v3824_v40, %v2347_v31 }
 0x768   : > { %v2349_v20 = vadd.f32 %v3824_v40, %v2348_v44 }
 0x769   : > { %v2302_v0 = vpop.xlane.xlu2 %2301 }
 0x76a   : > { %3825 = vrcp.f32 %v2302_v0  ;;  %v2353_v48 = vsel %vm2352_vm12, %v3824_v40, %v2349_v20  ;;  %v2371_v34 = vand.u32 2147483648, %v2302_v0  ;;  %v2369_v57 = vand.u32 2147483647, %v2302_v0 }
 0x76b   : > { %v2358_v21 = vsel %vm2355_vm13, %v2357_v8, %v2353_v48  ;;  %vm2365_vm15 = vweird.f32 %v2302_v0 }
 0x76c   : > { %v2359_v26 = vmul.f32 %v4877_v49, %v2358_v21  ;;  %v2372_v15 = vor.u32 1.1754944e-38, %v2371_v34  ;;  %vm2370_vm2 = vcmp.eq.f32.partialorder %v2369_v57, 8.507059e+37 }
 0x76d   : > { %v3658_v1 = vpop.permute.xlu0 %3657 }
 0x76e   : > { %v3659_v42 = vunpack.i.l.bf16 %v3658_v1  ;;  %v3660_v43 = vunpack.i.h.bf16 %v3658_v1 }
 0x770   : > { %v3826_v6 = vpop.eup %3825  ;;  %2496 = vmatpush.msra.mxu3 %v3659_v42 }
 0x771   : > { %v2361_v28 = vmul.f32 %v3826_v6, %v2302_v0  ;;  %v2305_v16 = vpop.xlane.xlu2 %2304  ;;  %vm2366_vm14 = vweird.f32 %v3826_v6 }
 0x772   : > { %3827 = vrcp.f32 %v2305_v16  ;;  %2497 = vmatpush.msra.mxu3 %v3660_v43  ;;  %vm2367_vm1 = vmor %vm2365_vm15, %vm2366_vm14  ;;  %v2386_v47 = vand.u32 2147483648, %v2305_v16  ;;  %v2384_v7 = vand.u32 2147483647, %v2305_v16  ;;  %vm2380_vm5 = vweird.f32 %v2305_v16 }
 0x773   : > { %v2362_v23 = vsub.f32 1.0, %v2361_v28  ;;  %3570 = vmatmul.msk.f32.vlgmr.msra.gmra.mxu3 %vm794_vm3, %v2359_v26 }
 0x774   : > { %v2387_v63 = vor.u32 1.1754944e-38, %v2386_v47  ;;  %vm2385_vm7 = vcmp.eq.f32.partialorder %v2384_v7, 8.507059e+37  ;;  %v2710_v7 = vld [vmem:[%s5535_s3 + $0x68] sm:$0xff] }
 0x775   : > { %v2363_v30 = vmul.f32 %v3826_v6, %v2362_v23  ;;  %v3663_v50 = vpop.permute.xlu0 %3662 }
 0x776   : > { %v3664_v32 = vunpack.i.l.bf16 %v3663_v50  ;;  %v3665_v41 = vunpack.i.h.bf16 %v3663_v50 }
 0x777   : > { %v2364_v14 = vadd.f32 %v3826_v6, %v2363_v30 }
 0x778   : > { %v3828_v46 = vpop.eup %3827  ;;  %2531 = vmatpush.msra.mxu0 %v3664_v32 }
 0x779   : > { %v2376_v11 = vmul.f32 %v3828_v46, %v2305_v16  ;;  %v2308_v49 = vpop.xlane.xlu2 %2307  ;;  %v2368_v45 = vsel %vm2367_vm1, %v3826_v6, %v2364_v14  ;;  %vm2381_vm4 = vweird.f32 %v3828_v46  ;;  %v2712_v16 = vld [vmem:[%s5535_s3 + $0x78] sm:$0xff] }
 0x77a   : > { %3829 = vrcp.f32 %v2308_v49  ;;  %2532 = vmatpush.msra.mxu0 %v3665_v41  ;;  %v2373_v5 = vsel %vm2370_vm2, %v2372_v15, %v2368_v45  ;;  %vm2382_vm6 = vmor %vm2380_vm5, %vm2381_vm4  ;;  %v2401_v52 = vand.u32 2147483648, %v2308_v49  ;;  %v2399_v0 = vand.u32 2147483647, %v2308_v49  ;;  %2717 = vmatpush.msrb.mxu2 %v2712_v16 }
 0x77b   : > { %v2377_v59 = vsub.f32 1.0, %v2376_v11  ;;  %v2374_v62 = vmul.f32 %v4881_v19, %v2373_v5  ;;  %vm2395_vm9 = vweird.f32 %v2308_v49  ;;  %3582 = vmatpush.msrb.mxu3 %v2712_v16 }
 0x77c   : > { %v2402_v8 = vor.u32 1.1754944e-38, %v2401_v52  ;;  %vm2400_vm11 = vcmp.eq.f32.partialorder %v2399_v0, 8.507059e+37  ;;  %v2697_v52 = vld [vmem:[%s5535_s3] sm:$0xff] }
 0x77d   : > { %v2378_v3 = vmul.f32 %v3828_v46, %v2377_v59  ;;  %v3668_v13 = vpop.permute.xlu0 %3667  ;;  %3571 = vmatmul.msk.f32.gmra.mxu3 %vm794_vm3, %v2374_v62 }
 0x77e   : > { %v3669_v4 = vunpack.i.l.bf16 %v3668_v13  ;;  %v3670_v40 = vunpack.i.h.bf16 %v3668_v13  ;;  %v2709_v13 = vld [vmem:[%s5535_s3 + $0x60] sm:$0xff] }
 0x77f   : > { %v2379_v54 = vadd.f32 %v3828_v46, %v2378_v3 }
 0x780   : > { %v3830_v56 = vpop.eup %3829  ;;  %2566 = vmatpush.msra.mxu1 %v3669_v4  ;;  %v2707_v4 = vld [vmem:[%s5535_s3 + $0x50] sm:$0xff] }
 0x781   : > { %v2383_v12 = vsel %vm2382_vm6, %v3828_v46, %v2379_v54  ;;  %v2391_v31 = vmul.f32 %v3830_v56, %v2308_v49  ;;  %vm2396_vm8 = vweird.f32 %v3830_v56  ;;  %v2706_v54 = vld [vmem:[%s5535_s3 + $0x48] sm:$0xff]  ;;  %vm2688_vm6 = vcmask 785408  }
 0x782   : > { %v2388_v44 = vsel %vm2385_vm7, %v2387_v63, %v2383_v12  ;;  %2567 = vmatpush.msra.mxu1 %v3670_v40  ;;  %vm2397_vm10 = vmor %vm2395_vm9, %vm2396_vm8  ;;  %v2704_v63 = vld [vmem:[%s5535_s3 + $0x38] sm:$0xff]  ;;  %v2703_v40 = vld [vmem:[%s5535_s3 + $0x30] sm:$0xff] }
 0x783   : > { %v2392_v19 = vsub.f32 1.0, %v2391_v31  ;;  %v2389_v20 = vmul.f32 %v4885_v17, %v2388_v44  ;;  %v2702_v12 = vld [vmem:[%s5535_s3 + $0x28] sm:$0xff]  ;;  %v2701_v31 = vld [vmem:[%s5535_s3 + $0x20] sm:$0xff]  ;;  %v2700_v44 = vld [vmem:[%s5535_s3 + $0x18] sm:$0xff] }
 0x785   : > { %v2393_v37 = vmul.f32 %v3830_v56, %v2392_v19  ;;  %3572 = vmatmul.msk.f32.vlgmr.msra.gmra.mxu0 %vm794_vm3, %v2389_v20  ;;  %v2699_v19 = vld [vmem:[%s5535_s3 + $0x10] sm:$0xff]  ;;  %v2698_v20 = vld [vmem:[%s5535_s3 + $0x8] sm:$0xff] }
 0x787   : > { %v2394_v48 = vadd.f32 %v3830_v56, %v2393_v37 }
 0x789   : > { %v2398_v1 = vsel %vm2397_vm10, %v3830_v56, %v2394_v48  ;;  %v2705_v56 = vld [vmem:[%s5535_s3 + $0x40] sm:$0xff] }
 0x78a   : > { %v2403_v21 = vsel %vm2400_vm11, %v2402_v8, %v2398_v1  ;;  %v3678_v8 = vpop.permute.xlu0 %3677 }
 0x78b   : > { %v2404_v42 = vmul.f32 %v4891_v29, %v2403_v21 }
 0x78d   : > { %3573 = vmatmul.msk.f32.gmra.mxu0 %vm794_vm3, %v2404_v42 }
 0x792   : > { %v2464_v6 = vpop.f32.mrf.mxu2 }
 0x79a   : > { %v2467_v43 = vpop.f32.mrf.mxu2 }
 0x79b   : > { %v3681_v17 = vpack.i.bf16 %v2467_v43, %v2464_v6  ;;  %v3679_v6 = vunpack.i.l.bf16 %v3678_v8 }
 0x79d   : > { %v2311_v28 = vpop.xlane.xlu1 %2310  ;;  %3682 = vrot.lane.b32.xlu0 %v3681_v17, %s3885_s21 }
 0x79e   : > { %3831 = vrcp.f32 %v2311_v28  ;;  %v2416_v30 = vand.u32 2147483648, %v2311_v28  ;;  %v2414_v57 = vand.u32 2147483647, %v2311_v28  ;;  %vm2410_vm13 = vweird.f32 %v2311_v28 }
 0x7a0   : > { %v2417_v46 = vor.u32 1.1754944e-38, %v2416_v30  ;;  %vm2415_vm15 = vcmp.eq.f32.partialorder %v2414_v57, 8.507059e+37 }
 0x7a4   : > { %v3832_v26 = vpop.eup %3831 }
 0x7a5   : > { %v2406_v23 = vmul.f32 %v3832_v26, %v2311_v28  ;;  %3687 = vrot.lane.b32.xlu0 %v3686_v61, %s3888_s26  ;;  %v2314_v29 = vpop.xlane.xlu2 %2313  ;;  %vm2411_vm12 = vweird.f32 %v3832_v26 }
 0x7a6   : > { %3833 = vrcp.f32 %v2314_v29  ;;  %vm2412_vm14 = vmor %vm2410_vm13, %vm2411_vm12  ;;  %v2431_v2 = vand.u32 2147483648, %v2314_v29  ;;  %v2429_v45 = vand.u32 2147483647, %v2314_v29  ;;  %vm2425_vm2 = vweird.f32 %v2314_v29 }
 0x7a7   : > { %v2407_v34 = vsub.f32 1.0, %v2406_v23  ;;  %v3680_v23 = vunpack.i.h.bf16 %v3678_v8 }
 0x7a8   : > { %v2432_v59 = vor.u32 1.1754944e-38, %v2431_v2  ;;  %vm2430_vm5 = vcmp.eq.f32.partialorder %v2429_v45, 8.507059e+37 }
 0x7a9   : > { %v2408_v50 = vmul.f32 %v3832_v26, %v2407_v34 }
 0x7ab   : > { %v2409_v32 = vadd.f32 %v3832_v26, %v2408_v50 }
 0x7ac   : > { %v3834_v14 = vpop.eup %3833 }
 0x7ad   : > { %v2413_v15 = vsel %vm2412_vm14, %v3832_v26, %v2409_v32  ;;  %v2421_v41 = vmul.f32 %v3834_v14, %v2314_v29  ;;  %vm2426_vm1 = vweird.f32 %v3834_v14  ;;  %v3673_v1 = vpop.permute.xlu2 %3672 }
 0x7ae   : > { %v2418_v11 = vsel %vm2415_vm15, %v2417_v46, %v2413_v15  ;;  %vm2427_vm4 = vmor %vm2425_vm2, %vm2426_vm1  ;;  %v3674_v21 = vunpack.i.l.bf16 %v3673_v1  ;;  %v3675_v28 = vunpack.i.h.bf16 %v3673_v1  ;;  %v3870_v1 = vld [vmem:[%s4062_s24 + $0x8] sm:$0xff] }
 0x7af   : > { %v2422_v49 = vsub.f32 1.0, %v2421_v41  ;;  %v2419_v39 = vmul.f32 %v4909_v33, %v2418_v11  ;;  %v2711_v33 = vld [vmem:[%s5535_s3 + $0x70] sm:$0xff] }
 0x7b0   : > { %2718 = vmatpush.msrb.mxu2 %v2711_v33  ;;  %3583 = vmatpush.msrb.mxu3 %v2711_v33  ;;  %v2672_v26 = vsel %vm653_vm0, %v4493_v36, %v3675_v28 }
 0x7b1   : > { %v2423_v61 = vmul.f32 %v3834_v14, %v2422_v49  ;;  %3574 = vmatmul.msk.f32.vlgmr.msra.gmra.mxu1 %vm794_vm3, %v2419_v39 }
 0x7b2   : > { %2719 = vmatpush.msrb.mxu2 %v2710_v7  ;;  %3584 = vmatpush.msrb.mxu3 %v2710_v7 }
 0x7b3   : > { %v2424_v5 = vadd.f32 %v3834_v14, %v2423_v61 }
 0x7b4   : > { %2720 = vmatpush.msrb.mxu2 %v2709_v13  ;;  %3585 = vmatpush.msrb.mxu3 %v2709_v13 }
 0x7b5   : > { %v2428_v62 = vsel %vm2427_vm4, %v3834_v14, %v2424_v5  ;;  %v3693_v50 = vpop.permute.xlu2 %3692 }
 0x7b6   : > { %v2433_v47 = vsel %vm2430_vm5, %v2432_v59, %v2428_v62  ;;  %v3694_v57 = vunpack.i.l.bf16 %v3693_v50  ;;  %v3695_v41 = vunpack.i.h.bf16 %v3693_v50 }
 0x7b7   : > { %v2434_v3 = vmul.f32 %v4913_v51, %v2433_v47  ;;  %v2708_v51 = vld [vmem:[%s5535_s3 + $0x58] sm:$0xff] }
 0x7b8   : > { %2721 = vmatpush.msrb.mxu2 %v2708_v51  ;;  %3586 = vmatpush.msrb.mxu3 %v2708_v51 }
 0x7b9   : > { %3575 = vmatmul.msk.f32.gmra.mxu1 %vm794_vm3, %v2434_v3  ;;  %vm2679_vm3 = vcmask 523264  }
 0x7ba   : > { %2722 = vmatpush.msrb.mxu2 %v2707_v4  ;;  %3587 = vmatpush.msrb.mxu3 %v2707_v4 }
 0x7bc   : > { %2723 = vmatpush.msrb.mxu2 %v2706_v54  ;;  %3588 = vmatpush.msrb.mxu3 %v2706_v54 }
 0x7bd   : > { %v3698_v11 = vpop.permute.xlu2 %3697 }
 0x7be   : > { %2724 = vmatpush.msrb.mxu2 %v2705_v56  ;;  %3589 = vmatpush.msrb.mxu3 %v2705_v56 }
 0x7c0   : > { %2725 = vmatpush.msrb.mxu2 %v2704_v63  ;;  %3590 = vmatpush.msrb.mxu3 %v2704_v63 }
 0x7c2   : > { %2726 = vmatpush.msrb.mxu2 %v2703_v40  ;;  %3591 = vmatpush.msrb.mxu3 %v2703_v40 }
 0x7c4   : > { %2727 = vmatpush.msrb.mxu2 %v2702_v12  ;;  %3592 = vmatpush.msrb.mxu3 %v2702_v12 }
 0x7c6   : > { %2728 = vmatpush.msrb.mxu2 %v2701_v31  ;;  %3593 = vmatpush.msrb.mxu3 %v2701_v31 }
 0x7c8   : > { %2729 = vmatpush.msrb.mxu2 %v2700_v44  ;;  %3594 = vmatpush.msrb.mxu3 %v2700_v44 }
 0x7ca   : > { %2730 = vmatpush.msrb.mxu2 %v2699_v19  ;;  %3595 = vmatpush.msrb.mxu3 %v2699_v19 }
 0x7cc   : > { %2731 = vmatpush.msrb.mxu2 %v2698_v20  ;;  %3596 = vmatpush.msrb.mxu3 %v2698_v20 }
 0x7ce   : > { %2732 = vmatpush.msrb.mxu2 %v2697_v52  ;;  %3597 = vmatpush.msrb.mxu3 %v2697_v52 }
 0x7f6   : > { %v2499_v37 = vpop.f32.mrf.mxu3 }
 0x7f7   : > { %2651 = vrot.lane.b32.xlu1 %v2499_v37, %s3885_s21  ;;  %v3869_v37 = vld [vmem:[%s4062_s24] sm:$0xff] }
 0x7ff   : > { %2627 = vrot.lane.b32.xlu1 %v4861_v10, %s3887_s18  ;;  %v2671_v10 = vsel %vm653_vm0, %v4489_v27, %v3674_v21  ;;  %v2681_v27 = vsel %vm2679_vm3, %v2672_v26, %v3680_v23 }
 0x800   : > { %v2502_v0 = vpop.f32.mrf.mxu3 }
 0x801   : > { %2653 = vrot.lane.b32.xlu0 %v2502_v0, %s3885_s21 }
 0x802   : > { %v2534_v48 = vpop.f32.mrf.mxu0 }
 0x803   : > { %2655 = vrot.lane.b32.xlu2 %v2534_v48, %s3885_s21 }
 0x807   : > { %2629 = vrot.lane.b32.xlu1 %v4865_v38, %s3887_s18  ;;  %v2680_v38 = vsel %vm2679_vm3, %v2671_v10, %v3679_v6  ;;  %v3871_v10 = vld [vmem:[%s4062_s24 + $0x10] sm:$0xff] }
 0x809   : > { %2623 = vrot.lane.b32.xlu0 %v4833_v22, %s3887_s18 }
 0x80a   : > { %v2537_v42 = vpop.f32.mrf.mxu0 }
 0x80b   : > { %2657 = vrot.lane.b32.xlu2 %v2537_v42, %s3885_s21 }
 0x80f   : > { %v3683_v43 = vpop.permute.xlu0 %3682 }
 0x810   : > { %v3684_v17 = vunpack.i.l.bf16 %v3683_v43  ;;  %v3685_v16 = vunpack.i.h.bf16 %v3683_v43  ;;  %v3889_v43 = vmov 128.0  }
 0x811   : > { %2625 = vrot.lane.b32.xlu0 %v4837_v58, %s3887_s18  ;;  %3835 = vrcp.f32 %v3889_v43 }
 0x812   : > { %v2689_v22 = vsel %vm2688_vm6, %v2680_v38, %v3684_v17  ;;  %v2690_v29 = vsel %vm2688_vm6, %v2681_v27, %v3685_v16 }
 0x813   : > { %2733 = vmatmul.f32.vlgmr.msrb.gmra.mxu2 %v2689_v22  ;;  %v3872_v22 = vld [vmem:[%s4062_s24 + $0x18] sm:$0xff] }
 0x817   : > { %v3688_v30 = vpop.permute.xlu0 %3687  ;;  %v3836_v38 = vpop.eup %3835 }
 0x818   : > { %v3689_v36 = vunpack.i.l.bf16 %v3688_v30  ;;  %v2785_v26 = vmul.f32 128.0, %v3836_v38 }
 0x819   : > { %2595 = vrot.lane.b32.xlu0 %v4727_v18, %s3888_s26 }
 0x81a   : > { %v2673_v18 = vsel %vm653_vm0, %v4499_v24, %v3689_v36  ;;  %v3699_v24 = vunpack.i.l.bf16 %v3698_v11  ;;  %v2786_v23 = vsub.f32 1.0, %v2785_v26 }
 0x81b   : > { %2736 = vmatmul.f32.gmra.mxu2 %v2690_v29  ;;  %v2682_v14 = vsel %vm2679_vm3, %v2673_v18, %v3694_v57  ;;  %v3874_v57 = vld [vmem:[%s4062_s24 + $0x28] sm:$0xff] }
 0x81c   : > { %v2675_v5 = vsel %vm653_vm0, %v4532_v9, %v3699_v24 }
 0x821   : > { %2597 = vrot.lane.b32.xlu0 %v4731_v60, %s3888_s26  ;;  %v3690_v60 = vunpack.i.h.bf16 %v3688_v30  ;;  %v2787_v30 = vmul.f32 %v3836_v38, %v2786_v23  ;;  %v2963_v23 = vld [vmem:[%s5539_s7 + $0x30] sm:$0xff] }
 0x823   : > { %v2674_v15 = vsel %vm653_vm0, %v4505_v35, %v3690_v60  ;;  %v3700_v35 = vunpack.i.h.bf16 %v3698_v11  ;;  %v2788_v36 = vadd.f32 %v3836_v38, %v2787_v30 }
 0x824   : > { %v2683_v39 = vsel %vm2679_vm3, %v2674_v15, %v3695_v41 }
 0x825   : > { %v2676_v33 = vsel %vm653_vm0, %v4536_v55, %v3700_v35  ;;  %v3701_v55 = vld [vmem:[%s5536_s4] ss:$0 sm:$0xff]  ;;  %v3876_v35 = vld [vmem:[%s4062_s24 + $0x38] sm:$0xff] }
 0x82e   : > { %v2569_v58 = vpop.f32.mrf.mxu1 }
 0x82f   : > { %2659 = vrot.lane.b32.xlu2 %v2569_v58, %s3885_s21  ;;  %v3873_v58 = vld [vmem:[%s4062_s24 + $0x20] sm:$0xff] }
 0x836   : > { %v2572_v34 = vpop.f32.mrf.mxu1 }
 0x837   : > { %2661 = vrot.lane.b32.xlu2 %v2572_v34, %s3885_s21 }
 0x85d   : > { %v2656_v61 = vpop.permute.xlu2 %2655 }
 0x865   : > { %v2658_v47 = vpop.permute.xlu2 %2657 }
 0x869   : > { %v2652_v32 = vpop.permute.xlu1 %2651 }
 0x86a   : > { %v2691_v46 = vsel %vm2688_vm6, %v2682_v14, %v2652_v32 }
 0x86b   : > { %2739 = vmatmul.f32.gmra.mxu2 %v2691_v46 }
 0x871   : > { %v2628_v51 = vpop.permute.xlu1 %2627 }
 0x873   : > { %v2654_v49 = vpop.permute.xlu0 %2653 }
 0x874   : > { %v2692_v2 = vsel %vm2688_vm6, %v2683_v39, %v2654_v49  ;;  %v3875_v39 = vld [vmem:[%s4062_s24 + $0x30] sm:$0xff] }
 0x875   : > { %2742 = vmatmul.f32.gmra.mxu2 %v2692_v2 }
 0x879   : > { %v2630_v12 = vpop.permute.xlu1 %2629 }
 0x87b   : > { %v2624_v45 = vpop.permute.xlu0 %2623 }
 0x87c   : > { %v2684_v59 = vsel %vm2679_vm3, %v2675_v5, %v2624_v45 }
 0x87d   : > { %v2693_v62 = vsel %vm2688_vm6, %v2684_v59, %v2656_v61 }
 0x87e   : > { %2745 = vmatmul.f32.vlgmr.msrb.gmra.mxu3 %v2693_v62 }
 0x883   : > { %v2626_v3 = vpop.permute.xlu0 %2625 }
 0x884   : > { %v2685_v7 = vsel %vm2679_vm3, %v2676_v33, %v2626_v3  ;;  %v2987_v3 = vld [vmem:[%s5539_s7 + $0xf0] sm:$0xff]  ;;  %v2988_v33 = vld [vmem:[%s5539_s7 + $0xf8] sm:$0xff] }
 0x885   : > { %v2694_v13 = vsel %vm2688_vm6, %v2685_v7, %v2658_v47  ;;  %v2985_v7 = vld [vmem:[%s5539_s7 + $0xe0] sm:$0xff]  ;;  %2995 = vmatpush.msra.mxu3 %v2987_v3  ;;  %3036 = vmatpush.msrb.mxu0 %v2988_v33 }
 0x886   : > { %2748 = vmatmul.f32.gmra.mxu3 %v2694_v13  ;;  %v2986_v13 = vld [vmem:[%s5539_s7 + $0xe8] sm:$0xff] }
 0x887   : > { %2996 = vmatpush.msra.mxu3 %v2985_v7  ;;  %3037 = vmatpush.msrb.mxu0 %v2986_v13 }
 0x889   : > { %v2660_v4 = vpop.permute.xlu2 %2659 }
 0x88b   : > { %v2596_v9 = vpop.permute.xlu0 %2595 }
 0x88c   : > { %v2677_v54 = vsel %vm653_vm0, %v4534_v53, %v2596_v9 }
 0x88d   : > { %v2686_v56 = vsel %vm2679_vm3, %v2677_v54, %v2628_v51  ;;  %v2983_v54 = vld [vmem:[%s5539_s7 + $0xd0] sm:$0xff] }
 0x88e   : > { %v2695_v63 = vsel %vm2688_vm6, %v2686_v56, %v2660_v4  ;;  %v2984_v56 = vld [vmem:[%s5539_s7 + $0xd8] sm:$0xff]  ;;  %2997 = vmatpush.msra.mxu3 %v2983_v54 }
 0x88f   : > { %2751 = vmatmul.f32.gmra.mxu3 %v2695_v63  ;;  %3038 = vmatpush.msrb.mxu0 %v2984_v56 }
 0x891   : > { %v2662_v44 = vpop.permute.xlu2 %2661 }
 0x893   : > { %v2598_v40 = vpop.permute.xlu0 %2597 }
 0x894   : > { %v2678_v31 = vsel %vm653_vm0, %v4538_v25, %v2598_v40  ;;  %vm2789_vm0 = vweird.f32 %v3836_v38  ;;  %v2981_v40 = vld [vmem:[%s5539_s7 + $0xc0] sm:$0xff] }
 0x895   : > { %v2687_v19 = vsel %vm2679_vm3, %v2678_v31, %v2630_v12  ;;  %v5061_v14 = vsel %vm2789_vm0, %v3836_v38, %v2788_v36  ;;  %2998 = vmatpush.msra.mxu3 %v2981_v40  ;;  %v2979_v12 = vld [vmem:[%s5539_s7 + $0xb0] sm:$0xff]  ;;  %v2980_v31 = vld [vmem:[%s5539_s7 + $0xb8] sm:$0xff] }
 0x896   : > { %v2734_v53 = vpop.f32.mrf.mxu2  ;;  %v2696_v20 = vsel %vm2688_vm6, %v2687_v19, %v2662_v44  ;;  %v2977_v19 = vld [vmem:[%s5539_s7 + $0xa0] sm:$0xff]  ;;  %v2968_v38 = vld [vmem:[%s5539_s7 + $0x58] sm:$0xff]  ;;  %v2959_v36 = vld [vmem:[%s5539_s7 + $0x10] sm:$0xff] }
 0x897   : > { %v2735_v52 = vadd.f32 %v3701_v55, %v2734_v53  ;;  %2754 = vmatmul.f32.gmra.mxu3 %v2696_v20  ;;  %v2978_v53 = vld [vmem:[%s5539_s7 + $0xa8] sm:$0xff] }
 0x898   : > { %2999 = vmatpush.msra.mxu3 %v2979_v12 }
 0x899   : > { %v2758_v0 = vadd.f32 %v3869_v37, %v2735_v52  ;;  %v2975_v52 = vld [vmem:[%s5539_s7 + $0x90] sm:$0xff]  ;;  %v2976_v37 = vld [vmem:[%s5539_s7 + $0x98] sm:$0xff] }
 0x89a   : > { %3000 = vmatpush.msra.mxu3 %v2977_v19 }
 0x89b   : > { %2768 = vadd.xlane.f32.xlu0 %v2758_v0 }
 0x89c   : > { %3001 = vmatpush.msra.mxu3 %v2975_v52 }
 0x89e   : > { %v2737_v48 = vpop.f32.mrf.mxu2 }
 0x89f   : > { %v2738_v8 = vadd.f32 %v3701_v55, %v2737_v48  ;;  %v2973_v48 = vld [vmem:[%s5539_s7 + $0x80] sm:$0xff] }
 0x8a0   : > { %3002 = vmatpush.msra.mxu3 %v2973_v48 }
 0x8a1   : > { %v2759_v21 = vadd.f32 %v3870_v1, %v2738_v8  ;;  %v2974_v8 = vld [vmem:[%s5539_s7 + $0x88] sm:$0xff] }
 0x8a3   : > { %2770 = vadd.xlane.f32.xlu1 %v2759_v21 }
 0x8ee   : > { %v2740_v42 = vpop.f32.mrf.mxu2 }
 0x8ef   : > { %v2741_v25 = vadd.f32 %v3701_v55, %v2740_v42  ;;  %v2972_v42 = vld [vmem:[%s5539_s7 + $0x78] sm:$0xff] }
 0x8f1   : > { %v2760_v6 = vadd.f32 %v3871_v10, %v2741_v25  ;;  %v2969_v25 = vld [vmem:[%s5539_s7 + $0x60] sm:$0xff]  ;;  %v2970_v10 = vld [vmem:[%s5539_s7 + $0x68] sm:$0xff] }
 0x8f3   : > { %2772 = vadd.xlane.f32.xlu2 %v2760_v6 }
 0x8f8   : > { %v2743_v17 = vpop.f32.mrf.mxu2 }
 0x8f9   : > { %v2744_v28 = vadd.f32 %v3701_v55, %v2743_v17  ;;  %v2967_v17 = vld [vmem:[%s5539_s7 + $0x50] sm:$0xff] }
 0x8fb   : > { %v5051_v16 = vadd.f32 %v3872_v22, %v2744_v28  ;;  %v2965_v22 = vld [vmem:[%s5539_s7 + $0x40] sm:$0xff] }
 0x8fd   : > { %2774 = vadd.xlane.f32.xlu2 %v5051_v16 }
 0x901   : > { %v2746_v27 = vpop.f32.mrf.mxu3 }
 0x902   : > { %v2747_v29 = vadd.f32 %v3701_v55, %v2746_v27  ;;  %v2964_v27 = vld [vmem:[%s5539_s7 + $0x38] sm:$0xff] }
 0x904   : > { %v5055_v34 = vadd.f32 %v3873_v58, %v2747_v29  ;;  %v2961_v29 = vld [vmem:[%s5539_s7 + $0x20] sm:$0xff]  ;;  %v2962_v58 = vld [vmem:[%s5539_s7 + $0x28] sm:$0xff] }
 0x906   : > { %2776 = vadd.xlane.f32.xlu0 %v5055_v34 }
 0x909   : > { %v2749_v50 = vpop.f32.mrf.mxu3 }
 0x90a   : > { %v2750_v18 = vadd.f32 %v3701_v55, %v2749_v50  ;;  %v2960_v50 = vld [vmem:[%s5539_s7 + $0x18] sm:$0xff] }
 0x90c   : > { %v5059_v32 = vadd.f32 %v3874_v57, %v2750_v18  ;;  %v2957_v57 = vld [vmem:[%s5539_s7] sm:$0xff] }
 0x90e   : > { %2778 = vadd.xlane.f32.xlu1 %v5059_v32  ;;  %v2769_v46 = vpop.xlane.xlu0 %2768 }
 0x90f   : > { %v2791_v60 = vmul.f32 %v5061_v14, %v2769_v46  ;;  %v2958_v46 = vld [vmem:[%s5539_s7 + $0x8] sm:$0xff] }
 0x911   : > { %v5065_v15 = vsub.f32 %v2758_v0, %v2791_v60 }
 0x912   : > { %v2752_v41 = vpop.f32.mrf.mxu3 }
 0x913   : > { %v2753_v11 = vadd.f32 %v3701_v55, %v2752_v41  ;;  %v2807_v49 = vmul.f32 %v5065_v15, %v5065_v15 }
 0x915   : > { %v5070_v2 = vadd.f32 %v3875_v39, %v2753_v11  ;;  %2815 = vadd.xlane.f32.xlu2 %v2807_v49 }
 0x916   : > { %v2771_v24 = vpop.xlane.xlu1 %2770 }
 0x917   : > { %v2792_v61 = vmul.f32 %v5061_v14, %v2771_v24  ;;  %2780 = vadd.xlane.f32.xlu0 %v5070_v2 }
 0x919   : > { %v5074_v45 = vsub.f32 %v2759_v21, %v2792_v61  ;;  %v2971_v21 = vld [vmem:[%s5539_s7 + $0x70] sm:$0xff] }
 0x91a   : > { %v2755_v5 = vpop.f32.mrf.mxu3  ;;  %3003 = vmatpush.msra.mxu3 %v2971_v21 }
 0x91b   : > { %v2756_v59 = vadd.f32 %v3701_v55, %v2755_v5  ;;  %v2808_v62 = vmul.f32 %v5074_v45, %v5074_v45  ;;  %v2982_v55 = vld [vmem:[%s5539_s7 + $0xc8] sm:$0xff] }
 0x91c   : > { %3039 = vmatpush.msrb.mxu0 %v2982_v55  ;;  %3004 = vmatpush.msra.mxu3 %v2969_v25  ;;  %v5218_v55 = vld [vmem:[%s5537_s5] ss:$0 sm:$0xff] }
 0x91d   : > { %v5079_v47 = vadd.f32 %v3876_v35, %v2756_v59  ;;  %2817 = vadd.xlane.f32.xlu1 %v2808_v62 }
 0x91e   : > { %3040 = vmatpush.msrb.mxu0 %v2980_v31  ;;  %3005 = vmatpush.msra.mxu3 %v2967_v17 }
 0x91f   : > { %2782 = vadd.xlane.f32.xlu2 %v5079_v47 }
 0x920   : > { %3041 = vmatpush.msrb.mxu0 %v2978_v53  ;;  %3006 = vmatpush.msra.mxu3 %v2965_v22  ;;  %v3122_v22 = vld [vmem:[%s5541_s9 + $0xe8] sm:$0xff] }
 0x922   : > { %3042 = vmatpush.msrb.mxu0 %v2976_v37  ;;  %3007 = vmatpush.msra.mxu3 %v2963_v23  ;;  %v3108_v23 = vld [vmem:[%s5541_s9 + $0x78] sm:$0xff] }
 0x923   : > { %3129 = vmatpush.msrb.mxu1 %v3108_v23  ;;  %v3109_v23 = vld [vmem:[%s5541_s9 + $0x80] sm:$0xff] }
 0x924   : > { %3043 = vmatpush.msrb.mxu0 %v2974_v8  ;;  %3008 = vmatpush.msra.mxu3 %v2961_v29 }
 0x926   : > { %3044 = vmatpush.msrb.mxu0 %v2972_v42  ;;  %3009 = vmatpush.msra.mxu3 %v2959_v36  ;;  %v3106_v36 = vld [vmem:[%s5541_s9 + $0x68] sm:$0xff] }
 0x928   : > { %3045 = vmatpush.msrb.mxu0 %v2970_v10  ;;  %3010 = vmatpush.msra.mxu3 %v2957_v57  ;;  %v3124_v10 = vld [vmem:[%s5541_s9 + $0xf8] sm:$0xff] }
 0x929   : > { %3170 = vmatpush.msra.mxu2 %v3124_v10  ;;  %v3111_v10 = vld [vmem:[%s5541_s9 + $0x90] sm:$0xff] }
 0x92a   : > { %3046 = vmatpush.msrb.mxu0 %v2968_v38 }
 0x966   : > { %v2773_v51 = vpop.xlane.xlu2 %2772 }
 0x967   : > { %v2793_v4 = vmul.f32 %v5061_v14, %v2773_v51 }
 0x969   : > { %v5095_v9 = vsub.f32 %v2760_v6, %v2793_v4 }
 0x96b   : > { %v2809_v63 = vmul.f32 %v5095_v9, %v5095_v9 }
 0x96d   : > { %2819 = vadd.xlane.f32.xlu0 %v2809_v63 }
 0x970   : > { %v2775_v44 = vpop.xlane.xlu2 %2774 }
 0x971   : > { %v2794_v20 = vmul.f32 %v5061_v14, %v2775_v44  ;;  %v5224_v44 = vld [vmem:[%s5538_s6] ss:$0 sm:$0xff] }
 0x973   : > { %v5131_v0 = vsub.f32 %v5051_v16, %v2794_v20  ;;  %v2966_v16 = vld [vmem:[%s5539_s7 + $0x48] sm:$0xff] }
 0x974   : > { %3047 = vmatpush.msrb.mxu0 %v2966_v16 }
 0x975   : > { %v2810_v1 = vmul.f32 %v5131_v0, %v5131_v0 }
 0x976   : > { %3048 = vmatpush.msrb.mxu0 %v2964_v27  ;;  %v3121_v27 = vld [vmem:[%s5541_s9 + $0xe0] sm:$0xff] }
 0x977   : > { %2821 = vadd.xlane.f32.xlu1 %v2810_v1 }
 0x978   : > { %3049 = vmatpush.msrb.mxu0 %v2962_v58  ;;  %v3107_v58 = vld [vmem:[%s5541_s9 + $0x70] sm:$0xff] }
 0x979   : > { %v2777_v6 = vpop.xlane.xlu0 %2776  ;;  %3130 = vmatpush.msrb.mxu1 %v3107_v58 }
 0x97a   : > { %v2795_v43 = vmul.f32 %v5061_v14, %v2777_v6  ;;  %3050 = vmatpush.msrb.mxu0 %v2960_v50  ;;  %v3123_v6 = vld [vmem:[%s5541_s9 + $0xf0] sm:$0xff] }
 0x97b   : > { %3171 = vmatpush.msra.mxu2 %v3123_v6  ;;  %v3119_v50 = vld [vmem:[%s5541_s9 + $0xd0] sm:$0xff]  ;;  %3131 = vmatpush.msrb.mxu1 %v3106_v36 }
 0x97c   : > { %v5161_v28 = vsub.f32 %v5055_v34, %v2795_v43  ;;  %3051 = vmatpush.msrb.mxu0 %v2958_v46 }
 0x97d   : > { %3172 = vmatpush.msra.mxu2 %v3122_v22 }
 0x97e   : > { %v2811_v26 = vmul.f32 %v5161_v28, %v5161_v28 }
 0x97f   : > { %3173 = vmatpush.msra.mxu2 %v3121_v27 }
 0x980   : > { %2823 = vadd.xlane.f32.xlu2 %v2811_v26 }
 0x981   : > { %v2779_v34 = vpop.xlane.xlu1 %2778 }
 0x982   : > { %v2796_v30 = vmul.f32 %v5061_v14, %v2779_v34  ;;  %v3120_v34 = vld [vmem:[%s5541_s9 + $0xd8] sm:$0xff] }
 0x983   : > { %3174 = vmatpush.msra.mxu2 %v3120_v34 }
 0x984   : > { %v5191_v18 = vsub.f32 %v5059_v32, %v2796_v30 }
 0x985   : > { %3175 = vmatpush.msra.mxu2 %v3119_v50 }
 0x986   : > { %v2812_v60 = vmul.f32 %v5191_v18, %v5191_v18 }
 0x988   : > { %2825 = vadd.xlane.f32.xlu0 %v2812_v60  ;;  %v2816_v41 = vpop.xlane.xlu2 %2815 }
 0x989   : > { %v2831_v11 = vmul.f32 %v2816_v41, %v5061_v14  ;;  %v3105_v41 = vld [vmem:[%s5541_s9 + $0x60] sm:$0xff] }
 0x98a   : > { %v2781_v32 = vpop.xlane.xlu0 %2780  ;;  %3132 = vmatpush.msrb.mxu1 %v3105_v41 }
 0x98b   : > { %v2839_v49 = vadd.f32 1e-05, %v2831_v11  ;;  %v2797_v39 = vmul.f32 %v5061_v14, %v2781_v32  ;;  %v3118_v11 = vld [vmem:[%s5541_s9 + $0xc8] sm:$0xff] }
 0x98c   : > { %3176 = vmatpush.msra.mxu2 %v3118_v11 }
 0x98d   : > { %3837 = vrsqrt.f32 %v2839_v49  ;;  %v5204_v24 = vsub.f32 %v5070_v2, %v2797_v39  ;;  %vm2853_vm8 = vweird.f32 %v2839_v49 }
 0x98f   : > { %v2813_v61 = vmul.f32 %v5204_v24, %v5204_v24 }
 0x990   : > { %v2818_v5 = vpop.xlane.xlu1 %2817 }
 0x991   : > { %v2832_v59 = vmul.f32 %v2818_v5, %v5061_v14  ;;  %2827 = vadd.xlane.f32.xlu1 %v2813_v61  ;;  %v3104_v5 = vld [vmem:[%s5541_s9 + $0x58] sm:$0xff] }
 0x992   : > { %v2783_v62 = vpop.xlane.xlu2 %2782  ;;  %3133 = vmatpush.msrb.mxu1 %v3104_v5 }
 0x993   : > { %v3838_v35 = vpop.eup %3837  ;;  %v2840_v3 = vadd.f32 1e-05, %v2832_v59  ;;  %v2798_v33 = vmul.f32 %v5061_v14, %v2783_v62  ;;  %v3117_v59 = vld [vmem:[%s5541_s9 + $0xc0] sm:$0xff] }
 0x994   : > { %v2848_v7 = vmul.f32 %v3838_v35, %v2839_v49  ;;  %vm2854_vm7 = vweird.f32 %v3838_v35  ;;  %3177 = vmatpush.msra.mxu2 %v3117_v59 }
 0x995   : > { %3839 = vrsqrt.f32 %v2840_v3  ;;  %v5211_v13 = vsub.f32 %v5079_v47, %v2798_v33  ;;  %vm2855_vm9 = vmor %vm2853_vm8, %vm2854_vm7  ;;  %vm2863_vm11 = vweird.f32 %v2840_v3  ;;  %v3116_v33 = vld [vmem:[%s5541_s9 + $0xb8] sm:$0xff] }
 0x996   : > { %v2849_v51 = vmul.f32 %v3838_v35, %v2848_v7  ;;  %3178 = vmatpush.msra.mxu2 %v3116_v33 }
 0x997   : > { %v2814_v2 = vmul.f32 %v5211_v13, %v5211_v13 }
 0x998   : > { %v2850_v4 = vmul.f32 0.5, %v2849_v51 }
 0x999   : > { %2829 = vadd.xlane.f32.xlu2 %v2814_v2  ;;  %v3115_v2 = vld [vmem:[%s5541_s9 + $0xb0] sm:$0xff] }
 0x99a   : > { %v2851_v54 = vsub.f32 1.5, %v2850_v4  ;;  %3179 = vmatpush.msra.mxu2 %v3115_v2 }
 0x99b   : > { %v3840_v56 = vpop.eup %3839 }
 0x99c   : > { %v2852_v63 = vmul.f32 %v3838_v35, %v2851_v54  ;;  %v2858_v40 = vmul.f32 %v3840_v56, %v2840_v3  ;;  %vm2864_vm10 = vweird.f32 %v3840_v56  ;;  %v3103_v3 = vld [vmem:[%s5541_s9 + $0x50] sm:$0xff] }
 0x99d   : > { %vm2865_vm12 = vmor %vm2863_vm11, %vm2864_vm10  ;;  %3134 = vmatpush.msrb.mxu1 %v3103_v3 }
 0x99e   : > { %v2856_v47 = vsel %vm2855_vm9, %v3838_v35, %v2852_v63  ;;  %v2859_v12 = vmul.f32 %v3840_v56, %v2858_v40  ;;  %v3101_v40 = vld [vmem:[%s5541_s9 + $0x40] sm:$0xff] }
 0x99f   : > { %v2927_v31 = vmul.f32 %v2856_v47, %v5065_v15  ;;  %v3114_v47 = vld [vmem:[%s5541_s9 + $0xa8] sm:$0xff] }
 0x9a0   : > { %v2860_v19 = vmul.f32 0.5, %v2859_v12  ;;  %3180 = vmatpush.msra.mxu2 %v3114_v47 }
 0x9a1   : > { %v2938_v53 = vmul.f32 %v5218_v55, %v2927_v31 }
 0x9a2   : > { %v2861_v20 = vsub.f32 1.5, %v2860_v19 }
 0x9a3   : > { %v5228_v52 = vadd.f32 %v5224_v44, %v2938_v53  ;;  %v3100_v53 = vld [vmem:[%s5541_s9 + $0x38] sm:$0xff] }
 0x9a4   : > { %v2862_v37 = vmul.f32 %v3840_v56, %v2861_v20  ;;  %v3113_v20 = vld [vmem:[%s5541_s9 + $0xa0] sm:$0xff] }
 0x9a5   : > { %3011 = vmatmul.f32.vlgmr.msra.gmra.mxu3 %v5228_v52  ;;  %3052 = vmatmul.f32.vlgmr.msrb.gmra.mxu0 %v5228_v52 }
 0x9a6   : > { %v2866_v15 = vsel %vm2865_vm12, %v3840_v56, %v2862_v37  ;;  %3181 = vmatpush.msra.mxu2 %v3113_v20 }
 0x9a7   : > { %v2928_v48 = vmul.f32 %v2866_v15, %v5074_v45 }
 0x9a9   : > { %v2939_v8 = vmul.f32 %v5218_v55, %v2928_v48  ;;  %v3099_v48 = vld [vmem:[%s5541_s9 + $0x30] sm:$0xff] }
 0x9ab   : > { %v5235_v1 = vadd.f32 %v5224_v44, %v2939_v8  ;;  %v3112_v8 = vld [vmem:[%s5541_s9 + $0x98] sm:$0xff] }
 0x9ac   : > { %3182 = vmatpush.msra.mxu2 %v3112_v8 }
 0x9ad   : > { %3014 = vmatmul.f32.gmra.mxu3 %v5235_v1  ;;  %3055 = vmatmul.f32.gmra.mxu0 %v5235_v1 }
 0x9ae   : > { %3183 = vmatpush.msra.mxu2 %v3111_v10 }
 0x9e0   : > { %v2820_v21 = vpop.xlane.xlu0 %2819 }
 0x9e1   : > { %v2833_v42 = vmul.f32 %v2820_v21, %v5061_v14 }
 0x9e3   : > { %v2841_v25 = vadd.f32 1e-05, %v2833_v42 }
 0x9e5   : > { %3841 = vrsqrt.f32 %v2841_v25  ;;  %vm2873_vm14 = vweird.f32 %v2841_v25 }
 0x9ea   : > { %v2822_v45 = vpop.xlane.xlu1 %2821 }
 0x9eb   : > { %v3842_v43 = vpop.eup %3841  ;;  %v2834_v17 = vmul.f32 %v2822_v45, %v5061_v14 }
 0x9ec   : > { %v2868_v38 = vmul.f32 %v3842_v43, %v2841_v25  ;;  %vm2874_vm13 = vweird.f32 %v3842_v43  ;;  %v3098_v25 = vld [vmem:[%s5541_s9 + $0x28] sm:$0xff] }
 0x9ed   : > { %v5250_v16 = vadd.f32 1e-05, %v2834_v17  ;;  %vm2875_vm15 = vmor %vm2873_vm14, %vm2874_vm13  ;;  %v3110_v17 = vld [vmem:[%s5541_s9 + $0x88] sm:$0xff] }
 0x9ee   : > { %v2869_v26 = vmul.f32 %v3842_v43, %v2868_v38  ;;  %3184 = vmatpush.msra.mxu2 %v3110_v17 }
 0x9ef   : > { %3843 = vrsqrt.f32 %v5250_v16  ;;  %vm2883_vm2 = vweird.f32 %v5250_v16 }
 0x9f0   : > { %v2870_v29 = vmul.f32 0.5, %v2869_v26  ;;  %v3096_v26 = vld [vmem:[%s5541_s9 + $0x18] sm:$0xff]  ;;  %3185 = vmatpush.msra.mxu2 %v3109_v23 }
 0x9f2   : > { %v2871_v30 = vsub.f32 1.5, %v2870_v29 }
 0x9f3   : > { %v2824_v57 = vpop.xlane.xlu2 %2823 }
 0x9f4   : > { %v2872_v46 = vmul.f32 %v3842_v43, %v2871_v30  ;;  %v2835_v60 = vmul.f32 %v2824_v57, %v5061_v14  ;;  %v3095_v30 = vld [vmem:[%s5541_s9 + $0x10] sm:$0xff] }
 0x9f5   : > { %v3844_v32 = vpop.eup %3843 }
 0x9f6   : > { %v2876_v49 = vsel %vm2875_vm15, %v3842_v43, %v2872_v46  ;;  %v2878_v39 = vmul.f32 %v3844_v32, %v5250_v16  ;;  %v5279_v61 = vadd.f32 1e-05, %v2835_v60  ;;  %vm2884_vm1 = vweird.f32 %v3844_v32  ;;  %v3094_v46 = vld [vmem:[%s5541_s9 + $0x8] sm:$0xff] }
 0x9f7   : > { %v2929_v62 = vmul.f32 %v2876_v49, %v5095_v9  ;;  %v3102_v9 = vld [vmem:[%s5541_s9 + $0x48] sm:$0xff]  ;;  %vm2885_vm4 = vmor %vm2883_vm2, %vm2884_vm1 }
 0x9f8   : > { %v2879_v35 = vmul.f32 %v3844_v32, %v2878_v39  ;;  %3845 = vrsqrt.f32 %v5279_v61  ;;  %3135 = vmatpush.msrb.mxu1 %v3102_v9  ;;  %vm2893_vm3 = vweird.f32 %v5279_v61 }
 0x9f9   : > { %v2940_v7 = vmul.f32 %v5218_v55, %v2929_v62 }
 0x9fa   : > { %v2880_v51 = vmul.f32 0.5, %v2879_v35  ;;  %3136 = vmatpush.msrb.mxu1 %v3101_v40 }
 0x9fb   : > { %v2826_v4 = vpop.xlane.xlu0 %2825  ;;  %v5303_v54 = vadd.f32 %v5224_v44, %v2940_v7 }
 0x9fc   : > { %v2881_v56 = vsub.f32 1.5, %v2880_v51  ;;  %v2836_v63 = vmul.f32 %v2826_v4, %v5061_v14  ;;  %3137 = vmatpush.msrb.mxu1 %v3100_v53 }
 0x9fd   : > { %3017 = vmatmul.f32.gmra.mxu3 %v5303_v54  ;;  %3058 = vmatmul.f32.gmra.mxu0 %v5303_v54 }
 0x9fe   : > { %v3846_v12 = vpop.eup %3845  ;;  %v2882_v31 = vmul.f32 %v3844_v32, %v2881_v56  ;;  %v5315_v19 = vadd.f32 1e-05, %v2836_v63  ;;  %3138 = vmatpush.msrb.mxu1 %v3099_v48 }
 0x9ff   : > { %v2888_v37 = vmul.f32 %v3846_v12, %v5279_v61  ;;  %vm2894_vm5 = vweird.f32 %v3846_v12 }
 0xa00   : > { %v2886_v15 = vsel %vm2885_vm4, %v3844_v32, %v2882_v31  ;;  %3847 = vrsqrt.f32 %v5315_v19  ;;  %3139 = vmatpush.msrb.mxu1 %v3098_v25  ;;  %vm2895_vm6 = vmor %vm2893_vm3, %vm2894_vm5  ;;  %v3093_v32 = vld [vmem:[%s5541_s9] sm:$0xff]  ;;  %vm2903_vm7 = vweird.f32 %v5315_v19 }
 0xa01   : > { %v2889_v21 = vmul.f32 %v3846_v12, %v2888_v37  ;;  %v2930_v42 = vmul.f32 %v2886_v15, %v5131_v0  ;;  %v3097_v0 = vld [vmem:[%s5541_s9 + $0x20] sm:$0xff] }
 0xa02   : > { %3140 = vmatpush.msrb.mxu1 %v3097_v0  ;;  %v2989_v31 = vld [vmem:[%s5540_s8] sm:$0x3] }
 0xa03   : > { %v2890_v45 = vmul.f32 0.5, %v2889_v21  ;;  %v2941_v6 = vmul.f32 %v5218_v55, %v2930_v42  ;;  %v5392_v37 = vperm.slane %v2989_v31, 1  ;;  %v5398_v25 = vperm.slane %v2989_v31, 0 }
 0xa04   : > { %v2828_v43 = vpop.xlane.xlu1 %2827  ;;  %3141 = vmatpush.msrb.mxu1 %v3096_v26 }
 0xa05   : > { %v2891_v38 = vsub.f32 1.5, %v2890_v45  ;;  %v2837_v22 = vmul.f32 %v2828_v43, %v5061_v14  ;;  %v5347_v16 = vadd.f32 %v5224_v44, %v2941_v6 }
 0xa06   : > { %v3848_v27 = vpop.eup %3847  ;;  %3142 = vmatpush.msrb.mxu1 %v3095_v30 }
 0xa07   : > { %v2892_v29 = vmul.f32 %v3846_v12, %v2891_v38  ;;  %v2898_v58 = vmul.f32 %v3848_v27, %v5315_v19  ;;  %v2845_v34 = vadd.f32 1e-05, %v2837_v22  ;;  %3020 = vmatmul.f32.gmra.mxu3 %v5347_v16  ;;  %3061 = vmatmul.f32.gmra.mxu0 %v5347_v16  ;;  %vm2904_vm0 = vweird.f32 %v3848_v27 }
 0xa08   : > { %3143 = vmatpush.msrb.mxu1 %v3094_v46  ;;  %vm2905_vm8 = vmor %vm2903_vm7, %vm2904_vm0 }
 0xa09   : > { %v2896_v36 = vsel %vm2895_vm6, %v3846_v12, %v2892_v29  ;;  %v2899_v50 = vmul.f32 %v3848_v27, %v2898_v58  ;;  %3849 = vrsqrt.f32 %v2845_v34  ;;  %vm2913_vm10 = vweird.f32 %v2845_v34 }
 0xa0a   : > { %v2931_v57 = vmul.f32 %v2896_v36, %v5161_v28  ;;  %3144 = vmatpush.msrb.mxu1 %v3093_v32 }
 0xa0b   : > { %v2900_v60 = vmul.f32 0.5, %v2899_v50 }
 0xa0c   : > { %v2830_v41 = vpop.xlane.xlu2 %2829  ;;  %v2942_v11 = vmul.f32 %v5218_v55, %v2931_v57 }
 0xa0d   : > { %v2901_v49 = vsub.f32 1.5, %v2900_v60  ;;  %v2838_v39 = vmul.f32 %v2830_v41, %v5061_v14 }
 0xa0e   : > { %v5372_v28 = vadd.f32 %v5224_v44, %v2942_v11 }
 0xa0f   : > { %v3850_v61 = vpop.eup %3849  ;;  %v2902_v5 = vmul.f32 %v3848_v27, %v2901_v49  ;;  %v2846_v59 = vadd.f32 1e-05, %v2838_v39 }
 0xa10   : > { %v2908_v62 = vmul.f32 %v3850_v61, %v2845_v34  ;;  %3023 = vmatmul.f32.gmra.mxu3 %v5372_v28  ;;  %3064 = vmatmul.f32.gmra.mxu0 %v5372_v28  ;;  %vm2914_vm9 = vweird.f32 %v3850_v61 }
 0xa11   : > { %v2906_v35 = vsel %vm2905_vm8, %v3848_v27, %v2902_v5  ;;  %3851 = vrsqrt.f32 %v2846_v59  ;;  %vm2915_vm11 = vmor %vm2913_vm10, %vm2914_vm9  ;;  %vm2923_vm13 = vweird.f32 %v2846_v59 }
 0xa12   : > { %v2909_v3 = vmul.f32 %v3850_v61, %v2908_v62  ;;  %v2932_v33 = vmul.f32 %v2906_v35, %v5191_v18 }
 0xa14   : > { %v2910_v7 = vmul.f32 0.5, %v2909_v3  ;;  %v2943_v51 = vmul.f32 %v5218_v55, %v2932_v33 }
 0xa16   : > { %v2911_v9 = vsub.f32 1.5, %v2910_v7  ;;  %v5380_v2 = vadd.f32 %v5224_v44, %v2943_v51 }
 0xa17   : > { %v3852_v4 = vpop.eup %3851 }
 0xa18   : > { %v2912_v56 = vmul.f32 %v3850_v61, %v2911_v9  ;;  %v2918_v63 = vmul.f32 %v3852_v4, %v2846_v59  ;;  %3026 = vmatmul.f32.gmra.mxu3 %v5380_v2  ;;  %3067 = vmatmul.f32.gmra.mxu0 %v5380_v2  ;;  %vm2924_vm12 = vweird.f32 %v3852_v4 }
 0xa19   : > { %vm2925_vm14 = vmor %vm2923_vm13, %vm2924_vm12 }
 0xa1a   : > { %v2916_v40 = vsel %vm2915_vm11, %v3850_v61, %v2912_v56  ;;  %v2919_v47 = vmul.f32 %v3852_v4, %v2918_v63 }
 0xa1b   : > { %v2933_v18 = vmul.f32 %v2916_v40, %v5204_v24 }
 0xa1c   : > { %v2920_v12 = vmul.f32 0.5, %v2919_v47 }
 0xa1d   : > { %v2944_v19 = vmul.f32 %v5218_v55, %v2933_v18  ;;  %v3704_v18 = vld [vmem:[%s5542_s10] ss:$0 sm:$0xff] }
 0xa1e   : > { %v2921_v53 = vsub.f32 1.5, %v2920_v12 }
 0xa1f   : > { %v5390_v20 = vadd.f32 %v5224_v44, %v2944_v19 }
 0xa20   : > { %v2922_v15 = vmul.f32 %v3852_v4, %v2921_v53 }
 0xa21   : > { %3029 = vmatmul.f32.gmra.mxu3 %v5390_v20  ;;  %3070 = vmatmul.f32.gmra.mxu0 %v5390_v20 }
 0xa22   : > { %v2926_v24 = vsel %vm2925_vm14, %v3852_v4, %v2922_v15  ;;  %v3053_v48 = vpop.f32.mrf.mxu0 }
 0xa23   : > { %v3054_v8 = vadd.f32 %v3053_v48, %v5392_v37  ;;  %v2934_v21 = vmul.f32 %v2926_v24, %v5211_v13 }
 0xa25   : > { %v3078_v42 = vmax.f32 %v3054_v8, 0.0  ;;  %v2945_v10 = vmul.f32 %v5218_v55, %v2934_v21 }
 0xa27   : > { %3186 = vmatmul.f32.vlgmr.msra.gmra.mxu2 %v3078_v42  ;;  %v5402_v45 = vadd.f32 %v5224_v44, %v2945_v10 }
 0xa28   : > { %v3012_v6 = vpop.f32.mrf.mxu3 }
 0xa29   : > { %v3013_v43 = vadd.f32 %v3012_v6, %v5398_v25  ;;  %3032 = vmatmul.f32.gmra.mxu3 %v5402_v45  ;;  %3073 = vmatmul.f32.gmra.mxu0 %v5402_v45 }
 0xa2a   : > { %v3056_v0 = vpop.f32.mrf.mxu0 }
 0xa2b   : > { %v3077_v17 = vmax.f32 %v3013_v43, 0.0  ;;  %v3057_v13 = vadd.f32 %v3056_v0, %v5392_v37 }
 0xa2d   : > { %v3080_v38 = vmax.f32 %v3057_v13, 0.0  ;;  %3145 = vmatmul.f32.vlgmr.msrb.gmra.mxu1 %v3077_v17 }
 0xa2f   : > { %3189 = vmatmul.f32.gmra.mxu2 %v3080_v38 }
 0xa30   : > { %v3015_v22 = vpop.f32.mrf.mxu3 }
 0xa31   : > { %v3016_v55 = vadd.f32 %v3015_v22, %v5398_v25 }
 0xa33   : > { %v3079_v26 = vmax.f32 %v3016_v55, 0.0 }
 0xa35   : > { %3148 = vmatmul.f32.gmra.mxu1 %v3079_v26 }
 0xa7a   : > { %v3059_v44 = vpop.f32.mrf.mxu0 }
 0xa7b   : > { %v3060_v23 = vadd.f32 %v3059_v44, %v5392_v37 }
 0xa7d   : > { %v3082_v27 = vmax.f32 %v3060_v23, 0.0 }
 0xa7f   : > { %3192 = vmatmul.f32.gmra.mxu2 %v3082_v27 }
 0xa80   : > { %v3018_v29 = vpop.f32.mrf.mxu3 }
 0xa81   : > { %v3019_v58 = vadd.f32 %v3018_v29, %v5398_v25 }
 0xa83   : > { %v3081_v34 = vmax.f32 %v3019_v58, 0.0 }
 0xa84   : > { %v3062_v30 = vpop.f32.mrf.mxu0 }
 0xa85   : > { %v3063_v36 = vadd.f32 %v3062_v30, %v5392_v37  ;;  %3151 = vmatmul.f32.gmra.mxu1 %v3081_v34 }
 0xa87   : > { %v3084_v50 = vmax.f32 %v3063_v36, 0.0 }
 0xa89   : > { %3195 = vmatmul.f32.gmra.mxu2 %v3084_v50 }
 0xa8a   : > { %v3021_v57 = vpop.f32.mrf.mxu3 }
 0xa8b   : > { %v3022_v46 = vadd.f32 %v3021_v57, %v5398_v25 }
 0xa8d   : > { %v3083_v60 = vmax.f32 %v3022_v46, 0.0  ;;  %v3065_v41 = vpop.f32.mrf.mxu0 }
 0xa8e   : > { %v3066_v11 = vadd.f32 %v3065_v41, %v5392_v37 }
 0xa8f   : > { %3154 = vmatmul.f32.gmra.mxu1 %v3083_v60 }
 0xa90   : > { %v3086_v32 = vmax.f32 %v3066_v11, 0.0 }
 0xa92   : > { %3198 = vmatmul.f32.gmra.mxu2 %v3086_v32 }
 0xa93   : > { %v3024_v49 = vpop.f32.mrf.mxu3 }
 0xa94   : > { %v3025_v39 = vadd.f32 %v3024_v49, %v5398_v25 }
 0xa95   : > { %v3068_v61 = vpop.f32.mrf.mxu0 }
 0xa96   : > { %v3085_v5 = vmax.f32 %v3025_v39, 0.0  ;;  %v3069_v59 = vadd.f32 %v3068_v61, %v5392_v37 }
 0xa98   : > { %v3088_v62 = vmax.f32 %v3069_v59, 0.0  ;;  %3157 = vmatmul.f32.gmra.mxu1 %v3085_v5 }
 0xa9a   : > { %3201 = vmatmul.f32.gmra.mxu2 %v3088_v62 }
 0xa9b   : > { %v3027_v35 = vpop.f32.mrf.mxu3 }
 0xa9c   : > { %v3028_v3 = vadd.f32 %v3027_v35, %v5398_v25 }
 0xa9e   : > { %v3087_v33 = vmax.f32 %v3028_v3, 0.0  ;;  %v3071_v7 = vpop.f32.mrf.mxu0 }
 0xa9f   : > { %v3072_v51 = vadd.f32 %v3071_v7, %v5392_v37 }
 0xaa0   : > { %3160 = vmatmul.f32.gmra.mxu1 %v3087_v33 }
 0xaa1   : > { %v3090_v9 = vmax.f32 %v3072_v51, 0.0 }
 0xaa3   : > { %3204 = vmatmul.f32.gmra.mxu2 %v3090_v9 }
 0xaa4   : > { %v3030_v4 = vpop.f32.mrf.mxu3 }
 0xaa5   : > { %v3031_v56 = vadd.f32 %v3030_v4, %v5398_v25 }
 0xaa6   : > { %v3074_v63 = vpop.f32.mrf.mxu0 }
 0xaa7   : > { %v3089_v40 = vmax.f32 %v3031_v56, 0.0  ;;  %v3075_v47 = vadd.f32 %v3074_v63, %v5392_v37 }
 0xaa9   : > { %v3092_v12 = vmax.f32 %v3075_v47, 0.0  ;;  %3163 = vmatmul.f32.gmra.mxu1 %v3089_v40 }
 0xaaa   : > { %v3146_v31 = vpop.f32.mrf.mxu1  ;;  %v3187_v19 = vpop.f32.mrf.mxu2 }
 0xaab   : > { %v3147_v53 = vadd.f32 %v3704_v18, %v3146_v31  ;;  %3207 = vmatmul.f32.gmra.mxu2 %v3092_v12 }
 0xaac   : > { %v3033_v15 = vpop.f32.mrf.mxu3 }
 0xaad   : > { %v3188_v24 = vadd.f32 %v3187_v19, %v3147_v53  ;;  %v3034_v48 = vadd.f32 %v3033_v15, %v5398_v25 }
 0xaaf   : > { %v3211_v8 = vadd.f32 %v3188_v24, %v5228_v52  ;;  %v3091_v21 = vmax.f32 %v3034_v48, 0.0 }
 0xab1   : > { %3221 = vadd.xlane.f32.xlu0 %v3211_v8  ;;  %3166 = vmatmul.f32.gmra.mxu1 %v3091_v21 }
 0xab2   : > { %v3149_v37 = vpop.f32.mrf.mxu1  ;;  %v3190_v10 = vpop.f32.mrf.mxu2 }
 0xab3   : > { %v3150_v42 = vadd.f32 %v3704_v18, %v3149_v37 }
 0xab5   : > { %v3191_v6 = vadd.f32 %v3190_v10, %v3150_v42 }
 0xab7   : > { %v3212_v43 = vadd.f32 %v3191_v6, %v5235_v1 }
 0xab9   : > { %3223 = vadd.xlane.f32.xlu1 %v3212_v43 }
 0xb02   : > { %v3152_v0 = vpop.f32.mrf.mxu1  ;;  %v3193_v13 = vpop.f32.mrf.mxu2 }
 0xb03   : > { %v3153_v17 = vadd.f32 %v3704_v18, %v3152_v0 }
 0xb05   : > { %v3194_v38 = vadd.f32 %v3193_v13, %v3153_v17 }
 0xb07   : > { %v3213_v22 = vadd.f32 %v3194_v38, %v5303_v54 }
 0xb09   : > { %3225 = vadd.xlane.f32.xlu2 %v3213_v22 }
 0xb0c   : > { %v3155_v25 = vpop.f32.mrf.mxu1  ;;  %v3196_v55 = vpop.f32.mrf.mxu2 }
 0xb0d   : > { %v3156_v52 = vadd.f32 %v3704_v18, %v3155_v25 }
 0xb0f   : > { %v3197_v26 = vadd.f32 %v3196_v55, %v3156_v52 }
 0xb11   : > { %v3214_v44 = vadd.f32 %v3197_v26, %v5347_v16 }
 0xb13   : > { %3227 = vadd.xlane.f32.xlu0 %v3214_v44 }
 0xb15   : > { %v3158_v23 = vpop.f32.mrf.mxu1  ;;  %v3199_v27 = vpop.f32.mrf.mxu2 }
 0xb16   : > { %v3159_v29 = vadd.f32 %v3704_v18, %v3158_v23 }
 0xb18   : > { %v3200_v58 = vadd.f32 %v3199_v27, %v3159_v29  ;;  %v5477_v29 = vld [vmem:[%s5543_s11] ss:$0 sm:$0xff] }
 0xb1a   : > { %v3215_v1 = vadd.f32 %v3200_v58, %v5372_v28 }
 0xb1c   : > { %3229 = vadd.xlane.f32.xlu1 %v3215_v1 }
 0xb1d   : > { %v3161_v34 = vpop.f32.mrf.mxu1  ;;  %v3202_v30 = vpop.f32.mrf.mxu2 }
 0xb1e   : > { %v3162_v36 = vadd.f32 %v3704_v18, %v3161_v34  ;;  %v5482_v34 = vld [vmem:[%s5544_s12] ss:$0 sm:$0xff] }
 0xb20   : > { %v3203_v50 = vadd.f32 %v3202_v30, %v3162_v36 }
 0xb22   : > { %v3216_v54 = vadd.f32 %v3203_v50, %v5380_v2 }
 0xb24   : > { %3231 = vadd.xlane.f32.xlu2 %v3216_v54  ;;  %v3222_v57 = vpop.xlane.xlu0 %3221 }
 0xb25   : > { %v3237_v46 = vmul.f32 %v3222_v57, %v5061_v14 }
 0xb26   : > { %v3164_v60 = vpop.f32.mrf.mxu1  ;;  %v3205_v16 = vpop.f32.mrf.mxu2 }
 0xb27   : > { %v5431_v41 = vsub.f32 %v3211_v8, %v3237_v46  ;;  %v3165_v11 = vadd.f32 %v3704_v18, %v3164_v60 }
 0xb29   : > { %v3206_v32 = vadd.f32 %v3205_v16, %v3165_v11  ;;  %v3253_v28 = vmul.f32 %v5431_v41, %v5431_v41 }
 0xb2b   : > { %v3217_v49 = vadd.f32 %v3206_v32, %v5390_v20 }
 0xb2c   : > { %v3224_v39 = vpop.xlane.xlu1 %3223  ;;  %3261 = vadd.xlane.f32.xlu2 %v3253_v28 }
 0xb2d   : > { %v3238_v61 = vmul.f32 %v3224_v39, %v5061_v14  ;;  %3233 = vadd.xlane.f32.xlu0 %v3217_v49 }
 0xb2e   : > { %v3167_v2 = vpop.f32.mrf.mxu1  ;;  %v3208_v62 = vpop.f32.mrf.mxu2 }
 0xb2f   : > { %v5437_v5 = vsub.f32 %v3212_v43, %v3238_v61  ;;  %v3168_v59 = vadd.f32 %v3704_v18, %v3167_v2 }
 0xb31   : > { %v3209_v35 = vadd.f32 %v3208_v62, %v3168_v59  ;;  %v3254_v33 = vmul.f32 %v5437_v5, %v5437_v5 }
 0xb33   : > { %v3218_v3 = vadd.f32 %v3209_v35, %v5402_v45 }
 0xb35   : > { %3235 = vadd.xlane.f32.xlu1 %v3218_v3  ;;  %3263 = vadd.xlane.f32.xlu0 %v3254_v33 }
 0xb7c   : > { %v3226_v7 = vpop.xlane.xlu2 %3225 }
 0xb7d   : > { %v3239_v20 = vmul.f32 %v3226_v7, %v5061_v14 }
 0xb7f   : > { %v5443_v51 = vsub.f32 %v3213_v22, %v3239_v20 }
 0xb81   : > { %v3255_v9 = vmul.f32 %v5443_v51, %v5443_v51 }
 0xb83   : > { %3265 = vadd.xlane.f32.xlu1 %v3255_v9 }
 0xb86   : > { %v3228_v4 = vpop.xlane.xlu0 %3227 }
 0xb87   : > { %v3240_v56 = vmul.f32 %v3228_v4, %v5061_v14 }
 0xb89   : > { %v5448_v63 = vsub.f32 %v3214_v44, %v3240_v56 }
 0xb8b   : > { %v3256_v45 = vmul.f32 %v5448_v63, %v5448_v63 }
 0xb8d   : > { %3267 = vadd.xlane.f32.xlu2 %v3256_v45 }
 0xb8f   : > { %v3230_v40 = vpop.xlane.xlu1 %3229 }
 0xb90   : > { %v3241_v47 = vmul.f32 %v3230_v40, %v5061_v14 }
 0xb92   : > { %v5453_v18 = vsub.f32 %v3215_v1, %v3241_v47 }
 0xb94   : > { %v3257_v12 = vmul.f32 %v5453_v18, %v5453_v18 }
 0xb96   : > { %3269 = vadd.xlane.f32.xlu0 %v3257_v12 }
 0xb97   : > { %v3232_v31 = vpop.xlane.xlu2 %3231 }
 0xb98   : > { %v3242_v19 = vmul.f32 %v3232_v31, %v5061_v14 }
 0xb9a   : > { %v5458_v53 = vsub.f32 %v3216_v54, %v3242_v19 }
 0xb9c   : > { %v3258_v15 = vmul.f32 %v5458_v53, %v5458_v53 }
 0xb9e   : > { %3271 = vadd.xlane.f32.xlu1 %v3258_v15 }
 0xb9f   : > { %v3262_v24 = vpop.xlane.xlu2 %3261 }
 0xba0   : > { %v3277_v48 = vmul.f32 %v3262_v24, %v5061_v14  ;;  %v3234_v8 = vpop.xlane.xlu0 %3233 }
 0xba1   : > { %v3243_v21 = vmul.f32 %v3234_v8, %v5061_v14 }
 0xba2   : > { %v3285_v37 = vadd.f32 1e-05, %v3277_v48 }
 0xba3   : > { %v5464_v42 = vsub.f32 %v3217_v49, %v3243_v21 }
 0xba4   : > { %3853 = vrsqrt.f32 %v3285_v37  ;;  %vm3299_vm1 = vweird.f32 %v3285_v37 }
 0xba5   : > { %v3259_v10 = vmul.f32 %v5464_v42, %v5464_v42 }
 0xba7   : > { %3273 = vadd.xlane.f32.xlu2 %v3259_v10 }
 0xba8   : > { %v3236_v6 = vpop.xlane.xlu1 %3235  ;;  %v3264_v43 = vpop.xlane.xlu0 %3263 }
 0xba9   : > { %v3244_v0 = vmul.f32 %v3236_v6, %v5061_v14  ;;  %v3278_v17 = vmul.f32 %v3264_v43, %v5061_v14 }
 0xbaa   : > { %v3854_v13 = vpop.eup %3853 }
 0xbab   : > { %v3294_v38 = vmul.f32 %v3854_v13, %v3285_v37  ;;  %v5470_v22 = vsub.f32 %v3218_v3, %v3244_v0  ;;  %v3286_v25 = vadd.f32 1e-05, %v3278_v17  ;;  %vm3300_vm15 = vweird.f32 %v3854_v13 }
 0xbac   : > { %vm3301_vm2 = vmor %vm3299_vm1, %vm3300_vm15 }
 0xbad   : > { %v3295_v55 = vmul.f32 %v3854_v13, %v3294_v38  ;;  %3855 = vrsqrt.f32 %v3286_v25  ;;  %v3260_v52 = vmul.f32 %v5470_v22, %v5470_v22  ;;  %vm3309_vm5 = vweird.f32 %v3286_v25 }
 0xbaf   : > { %v3296_v26 = vmul.f32 0.5, %v3295_v55  ;;  %3275 = vadd.xlane.f32.xlu0 %v3260_v52 }
 0xbb1   : > { %v3297_v44 = vsub.f32 1.5, %v3296_v26 }
 0xbb3   : > { %v3856_v23 = vpop.eup %3855  ;;  %v3298_v27 = vmul.f32 %v3854_v13, %v3297_v44 }
 0xbb4   : > { %v3304_v58 = vmul.f32 %v3856_v23, %v3286_v25  ;;  %vm3310_vm4 = vweird.f32 %v3856_v23 }
 0xbb5   : > { %v3302_v1 = vsel %vm3301_vm2, %v3854_v13, %v3298_v27  ;;  %vm3311_vm3 = vmor %vm3309_vm5, %vm3310_vm4 }
 0xbb6   : > { %v3373_v30 = vmul.f32 %v3302_v1, %v5431_v41  ;;  %v3305_v36 = vmul.f32 %v3856_v23, %v3304_v58 }
 0xbb8   : > { %v3384_v50 = vmul.f32 %v5477_v29, %v3373_v30  ;;  %v3306_v54 = vmul.f32 0.5, %v3305_v36 }
 0xbba   : > { %v3395_v57 = vadd.f32 %v5482_v34, %v3384_v50  ;;  %v3307_v46 = vsub.f32 1.5, %v3306_v54 }
 0xbbc   : > { %3403 = vst [vmem:[%s5491_s23] sm:$0xff] %v3395_v57  ;;  %v3308_v60 = vmul.f32 %v3856_v23, %v3307_v46 }
 0xbbe   : > { %v3312_v16 = vsel %vm3311_vm3, %v3856_v23, %v3308_v60 }
 0xbbf   : > { %v3374_v41 = vmul.f32 %v3312_v16, %v5437_v5 }
 0xbc1   : > { %v3385_v11 = vmul.f32 %v5477_v29, %v3374_v41 }
 0xbc3   : > { %v3396_v32 = vadd.f32 %v5482_v34, %v3385_v11 }
 0xbc5   : > { %3404 = vst [vmem:[%s5491_s23 + $0x8] sm:$0xff] %v3396_v32 }
 0xbf6   : > { %v3266_v28 = vpop.xlane.xlu1 %3265 }
 0xbf7   : > { %v3279_v49 = vmul.f32 %v3266_v28, %v5061_v14 }
 0xbf9   : > { %v3287_v39 = vadd.f32 1e-05, %v3279_v49 }
 0xbfb   : > { %3857 = vrsqrt.f32 %v3287_v39  ;;  %vm3319_vm0 = vweird.f32 %v3287_v39 }
 0xc00   : > { %v3268_v61 = vpop.xlane.xlu2 %3267 }
 0xc01   : > { %v3858_v2 = vpop.eup %3857  ;;  %v3280_v59 = vmul.f32 %v3268_v61, %v5061_v14 }
 0xc02   : > { %v3314_v62 = vmul.f32 %v3858_v2, %v3287_v39  ;;  %vm3320_vm6 = vweird.f32 %v3858_v2 }
 0xc03   : > { %v3288_v35 = vadd.f32 1e-05, %v3280_v59  ;;  %vm3321_vm7 = vmor %vm3319_vm0, %vm3320_vm6 }
 0xc04   : > { %v3315_v3 = vmul.f32 %v3858_v2, %v3314_v62 }
 0xc05   : > { %3859 = vrsqrt.f32 %v3288_v35  ;;  %vm3329_vm9 = vweird.f32 %v3288_v35 }
 0xc06   : > { %v3316_v33 = vmul.f32 0.5, %v3315_v3 }
 0xc08   : > { %v3317_v5 = vsub.f32 1.5, %v3316_v33 }
 0xc09   : > { %v3270_v7 = vpop.xlane.xlu0 %3269 }
 0xc0a   : > { %v3318_v20 = vmul.f32 %v3858_v2, %v3317_v5  ;;  %v3281_v9 = vmul.f32 %v3270_v7, %v5061_v14 }
 0xc0b   : > { %v3860_v4 = vpop.eup %3859 }
 0xc0c   : > { %v3322_v56 = vsel %vm3321_vm7, %v3858_v2, %v3318_v20  ;;  %v3324_v45 = vmul.f32 %v3860_v4, %v3288_v35  ;;  %v3289_v40 = vadd.f32 1e-05, %v3281_v9  ;;  %vm3330_vm8 = vweird.f32 %v3860_v4 }
 0xc0d   : > { %v3375_v47 = vmul.f32 %v3322_v56, %v5443_v51  ;;  %vm3331_vm10 = vmor %vm3329_vm9, %vm3330_vm8 }
 0xc0e   : > { %v3325_v12 = vmul.f32 %v3860_v4, %v3324_v45  ;;  %3861 = vrsqrt.f32 %v3289_v40  ;;  %vm3339_vm12 = vweird.f32 %v3289_v40 }
 0xc0f   : > { %v3386_v31 = vmul.f32 %v5477_v29, %v3375_v47 }
 0xc10   : > { %v3326_v19 = vmul.f32 0.5, %v3325_v12 }
 0xc11   : > { %v3397_v15 = vadd.f32 %v5482_v34, %v3386_v31  ;;  %v3272_v24 = vpop.xlane.xlu1 %3271 }
 0xc12   : > { %v3327_v48 = vsub.f32 1.5, %v3326_v19  ;;  %v3282_v8 = vmul.f32 %v3272_v24, %v5061_v14 }
 0xc13   : > { %3405 = vst [vmem:[%s5491_s23 + $0x10] sm:$0xff] %v3397_v15 }
 0xc14   : > { %v3862_v21 = vpop.eup %3861  ;;  %v3328_v37 = vmul.f32 %v3860_v4, %v3327_v48  ;;  %v3290_v10 = vadd.f32 1e-05, %v3282_v8 }
 0xc15   : > { %v3334_v51 = vmul.f32 %v3862_v21, %v3289_v40  ;;  %vm3340_vm11 = vweird.f32 %v3862_v21 }
 0xc16   : > { %v3332_v6 = vsel %vm3331_vm10, %v3860_v4, %v3328_v37  ;;  %3863 = vrsqrt.f32 %v3290_v10  ;;  %vm3341_vm13 = vmor %vm3339_vm12, %vm3340_vm11  ;;  %vm3349_vm15 = vweird.f32 %v3290_v10 }
 0xc17   : > { %v3376_v43 = vmul.f32 %v3332_v6, %v5448_v63  ;;  %v3335_v0 = vmul.f32 %v3862_v21, %v3334_v51 }
 0xc19   : > { %v3387_v17 = vmul.f32 %v5477_v29, %v3376_v43  ;;  %v3336_v13 = vmul.f32 0.5, %v3335_v0 }
 0xc1a   : > { %v3274_v38 = vpop.xlane.xlu2 %3273 }
 0xc1b   : > { %v3398_v25 = vadd.f32 %v5482_v34, %v3387_v17  ;;  %v3337_v55 = vsub.f32 1.5, %v3336_v13  ;;  %v3283_v52 = vmul.f32 %v3274_v38, %v5061_v14 }
 0xc1c   : > { %v3864_v26 = vpop.eup %3863 }
 0xc1d   : > { %3406 = vst [vmem:[%s5491_s23 + $0x18] sm:$0xff] %v3398_v25  ;;  %v3338_v44 = vmul.f32 %v3862_v21, %v3337_v55  ;;  %v3344_v23 = vmul.f32 %v3864_v26, %v3290_v10  ;;  %v3291_v27 = vadd.f32 1e-05, %v3283_v52  ;;  %vm3350_vm14 = vweird.f32 %v3864_v26 }
 0xc1e   : > { %vm3351_vm1 = vmor %vm3349_vm15, %vm3350_vm14 }
 0xc1f   : > { %v3342_v63 = vsel %vm3341_vm13, %v3862_v21, %v3338_v44  ;;  %v3345_v58 = vmul.f32 %v3864_v26, %v3344_v23  ;;  %3865 = vrsqrt.f32 %v3291_v27  ;;  %vm3359_vm4 = vweird.f32 %v3291_v27 }
 0xc20   : > { %v3377_v1 = vmul.f32 %v3342_v63, %v5453_v18 }
 0xc21   : > { %v3346_v30 = vmul.f32 0.5, %v3345_v58 }
 0xc22   : > { %v3388_v36 = vmul.f32 %v5477_v29, %v3377_v1  ;;  %v3276_v50 = vpop.xlane.xlu0 %3275 }
 0xc23   : > { %v3347_v54 = vsub.f32 1.5, %v3346_v30  ;;  %v3284_v57 = vmul.f32 %v3276_v50, %v5061_v14 }
 0xc24   : > { %v3399_v46 = vadd.f32 %v5482_v34, %v3388_v36 }
 0xc25   : > { %v3866_v60 = vpop.eup %3865  ;;  %v3348_v16 = vmul.f32 %v3864_v26, %v3347_v54  ;;  %v3292_v41 = vadd.f32 1e-05, %v3284_v57 }
 0xc26   : > { %3407 = vst [vmem:[%s5491_s23 + $0x20] sm:$0xff] %v3399_v46  ;;  %v3354_v11 = vmul.f32 %v3866_v60, %v3291_v27  ;;  %vm3360_vm2 = vweird.f32 %v3866_v60 }
 0xc27   : > { %v3352_v32 = vsel %vm3351_vm1, %v3864_v26, %v3348_v16  ;;  %3867 = vrsqrt.f32 %v3292_v41  ;;  %vm3361_vm5 = vmor %vm3359_vm4, %vm3360_vm2  ;;  %vm3369_vm6 = vweird.f32 %v3292_v41 }
 0xc28   : > { %v3378_v18 = vmul.f32 %v3352_v32, %v5458_v53  ;;  %v3355_v28 = vmul.f32 %v3866_v60, %v3354_v11 }
 0xc2a   : > { %v3389_v49 = vmul.f32 %v5477_v29, %v3378_v18  ;;  %v3356_v39 = vmul.f32 0.5, %v3355_v28 }
 0xc2c   : > { %v3400_v14 = vadd.f32 %v5482_v34, %v3389_v49  ;;  %v3357_v61 = vsub.f32 1.5, %v3356_v39 }
 0xc2d   : > { %v3868_v2 = vpop.eup %3867 }
 0xc2e   : > { %3408 = vst [vmem:[%s5491_s23 + $0x28] sm:$0xff] %v3400_v14  ;;  %v3358_v59 = vmul.f32 %v3866_v60, %v3357_v61  ;;  %v3364_v62 = vmul.f32 %v3868_v2, %v3292_v41  ;;  %vm3370_vm3 = vweird.f32 %v3868_v2 }
 0xc2f   : > { %vm3371_vm0 = vmor %vm3369_vm6, %vm3370_vm3 }
 0xc30   : > { %v3362_v35 = vsel %vm3361_vm5, %v3866_v60, %v3358_v59  ;;  %v3365_v3 = vmul.f32 %v3868_v2, %v3364_v62 }
 0xc31   : > { %v3379_v53 = vmul.f32 %v3362_v35, %v5464_v42 }
 0xc32   : > { %v3366_v33 = vmul.f32 0.5, %v3365_v3 }
 0xc33   : > { %v3390_v5 = vmul.f32 %v5477_v29, %v3379_v53 }
 0xc34   : > { %v3367_v7 = vsub.f32 1.5, %v3366_v33 }
 0xc35   : > { %v3401_v20 = vadd.f32 %v5482_v34, %v3390_v5 }
 0xc36   : > { %v3368_v9 = vmul.f32 %v3868_v2, %v3367_v7 }
 0xc37   : > { %3409 = vst [vmem:[%s5491_s23 + $0x30] sm:$0xff] %v3401_v20 }
 0xc38   : > { %v3372_v4 = vsel %vm3371_vm0, %v3868_v2, %v3368_v9 }
 0xc39   : > { %v3380_v56 = vmul.f32 %v3372_v4, %v5470_v22 }
 0xc3b   : > { %v3391_v45 = vmul.f32 %v5477_v29, %v3380_v56 }
 0xc3d   : > { %v3402_v40 = vadd.f32 %v5482_v34, %v3391_v45 }
 0xc3f   : > { %3410 = vst [vmem:[%s5491_s23 + $0x38] sm:$0xff] %v3402_v40 }
 0xc40 PF: > { %s23_s25 = sadd.s32 1, %s3883_s25  }
 0xc41   : > { %p20_p4 = scmp.ge.s32.totalorder %s23_s25, 4  }
 0xc43   :  { %22 = sbr.rel (!%p20_p4) target bundleno = 1 (0x1), region = 102 }

</bundles_post_ra>
